<compile_context>
chip_gen: v7x
topology: tpu7x:2x2x1
jax: 0.10.0
libtpu: 0.0.40
codegen_flags: <defaults>
</compile_context>

<pallas_src>
import math

import jax
import jax.numpy as jnp
from jax import lax
from jax.experimental import pallas as pl
from jax.experimental.pallas import tpu as pltpu

CIN_PAD = 8                        # pad RGB 3 -> 8 input channels (zeros)
CHANNELS = [64, 128, 256, 256]     # conv output channels
STRIDES = [(2, 2), (2, 2), (2, 1), (2, 1)]


def _out_dim(x, s):
    return (x - 1) // s + 1


def _geometry(H, W):
    hs, ws = [H], [W]
    for (sh, sw) in STRIDES:
        hs.append(_out_dim(hs[-1], sh))
        ws.append(_out_dim(ws[-1], sw))
    return hs, ws                 # hs[i]/ws[i]: input size of layer i; [4]=final


# ------------------------------ fused kernel ------------------------------- #

def _make_fused_kernel(H, W):
    C1, C2, C3, C4 = CHANNELS
    hs, ws = _geometry(H, W)
    Ho1, Wo1 = hs[1], ws[1]
    Ho2, Wo2 = hs[2], ws[2]
    Ho3, Wo3 = hs[3], ws[3]
    Ho4, Wo4 = hs[4], ws[4]
    Wh1 = Wo1 // 2                # half width of layer-1 output (parity split)
    kblk2 = 4 * C1                # per-kh K block of layer 2 (kw=0..3, kw3 = 0)

    def kernel(l1_ref, w1_ref, b1_ref, w2_ref, b2_ref, w3_ref, b3_ref,
               w4_ref, b4_ref, out_ref,
               pk2_ref, pd3_ref, pd4_ref, im2_ref, im3_ref, im4_ref):
        # Zero the padded activation buffers (scratch persists across the batch
        # grid; only the halo actually needs it, but the buffers are tiny).
        pk2_ref[...] = jnp.zeros_like(pk2_ref)
        pd3_ref[...] = jnp.zeros_like(pd3_ref)
        pd4_ref[...] = jnp.zeros_like(pd4_ref)

        def conv_out(lhs, w_ref, b_ref):
            acc = jnp.dot(lhs, w_ref[...], preferred_element_type=jnp.float32)
            return jnp.maximum(acc + b_ref[...], 0.0)        # folded BN + ReLU

        # ---- layer 1: host-built im2row, one matmul (M=Ho1*Wo1, K=9*CIN_PAD) -
        y1 = conv_out(l1_ref[...], w1_ref, b1_ref).astype(jnp.bfloat16)
        # Scatter into the padded layer-2 input with even/odd columns packed
        # along channels.  Host row order of y1 is (oh, col-parity, j), ow=2j+p.
        for oh in range(Ho1):
            r = oh * Wo1
            # even output cols (ow=2j)   -> padded col 2j+1 (odd)  -> high half
            pk2_ref[1 + oh, 0:Wh1, C1:2 * C1] = y1[r:r + Wh1, :]
            # odd output cols (ow=2j+1)  -> padded col 2j+2 (even) -> low half
            pk2_ref[1 + oh, 1:1 + Wh1, 0:C1] = y1[r + Wh1:r + Wo1, :]

        # ---- layer 2 (stride 2,2): in-VMEM im2row, one matmul K=12*C1 --------
        for oh in range(Ho2):
            m0 = oh * Wo2
            for kh in range(3):
                r, c0 = 2 * oh + kh, kh * kblk2
                im2_ref[m0:m0 + Wo2, c0:c0 + 2 * C1] = pk2_ref[r, 0:Wo2, :]
                im2_ref[m0:m0 + Wo2, c0 + 2 * C1:c0 + 4 * C1] = (
                    pk2_ref[r, 1:1 + Wo2, :])
        y2 = conv_out(im2_ref[...], w2_ref, b2_ref).astype(jnp.bfloat16)
        for oh in range(Ho2):
            pd3_ref[1 + oh, 1:1 + Wo2, :] = y2[oh * Wo2:(oh + 1) * Wo2, :]

        # ---- layer 3 (stride 2,1): in-VMEM im2row, one matmul K=9*C2 ---------
        for oh in range(Ho3):
            m0 = oh * Wo3
            for kh in range(3):
                for kw in range(3):
                    c0 = (kh * 3 + kw) * C2
                    im3_ref[m0:m0 + Wo3, c0:c0 + C2] = (
                        pd3_ref[2 * oh + kh, kw:kw + Wo3, :])
        y3 = conv_out(im3_ref[...], w3_ref, b3_ref).astype(jnp.bfloat16)
        for oh in range(Ho3):
            pd4_ref[1 + oh, 1:1 + Wo3, :] = y3[oh * Wo3:(oh + 1) * Wo3, :]

        # ---- layer 4 (stride 2,1) + fused AdaptiveAvgPool2d((1, None)) -------
        for oh in range(Ho4):
            m0 = oh * Wo4
            for kh in range(3):
                for kw in range(3):
                    c0 = (kh * 3 + kw) * C3
                    im4_ref[m0:m0 + Wo4, c0:c0 + C3] = (
                        pd4_ref[2 * oh + kh, kw:kw + Wo4, :])
        y4 = conv_out(im4_ref[...], w4_ref, b4_ref)                      # f32
        acc = y4[0:Wo4, :]
        for oh in range(1, Ho4):                                  # height sum
            acc = acc + y4[oh * Wo4:(oh + 1) * Wo4, :]
        out_ref[...] = acc * (1.0 / Ho4)              # single deferred 1/Ho scale

    return kernel


# --------------------------- parameter preparation -------------------------- #

def _prep_params(params):
    """Fold BN scale into the weights; pack each layer as one (K, Cout) bf16
    matmul operand whose K ordering matches the kernel's im2row layout."""
    wq, bq = [], []
    for idx, (w, scale, bias) in enumerate(params):
        cout, cin, _, _ = w.shape
        w_hwio = jnp.transpose(w, (2, 3, 1, 0)) * scale[None, None, None, :]
        if idx == 0:                          # pad RGB 3 -> CIN_PAD channels
            w_hwio = jnp.pad(w_hwio, ((0, 0), (0, 0), (0, CIN_PAD - cin), (0, 0)))
        if idx == 1:                          # even/odd packed layer: zero kw=3
            w_hwio = jnp.pad(w_hwio, ((0, 0), (0, 1), (0, 0), (0, 0)))
        k = w_hwio.shape[0] * w_hwio.shape[1] * w_hwio.shape[2]
        wq.append(w_hwio.reshape(k, cout).astype(jnp.bfloat16))
        bq.append(bias.reshape(1, cout).astype(jnp.float32))
    return wq, bq


# --------------------------------- wrapper ---------------------------------- #

def _nbytes(shape, dtype):
    return math.prod(shape) * jnp.dtype(dtype).itemsize


def cnn_feature_extractor(x_nchw, params):
    """Full fused forward pass: (N, 3, H, W) float32 -> (N, W_out, 256) float32."""
    N, Cin, H, W = x_nchw.shape
    assert Cin == 3 and W % 4 == 0 and W >= 4 and H >= 2

    C1, C2, C3, C4 = CHANNELS
    hs, ws = _geometry(H, W)
    Ho1, Wo1 = hs[1], ws[1]
    Ho2, Wo2 = hs[2], ws[2]
    Ho3, Wo3 = hs[3], ws[3]
    Ho4, Wo4 = hs[4], ws[4]

    # Host prep: im2row of the (tiny) raw image for layer 1, with the output
    # columns reordered as (oh, parity, j) so the kernel's scatter into the
    # even/odd channel-packed layer-2 buffer is contiguous.
    x = jnp.transpose(x_nchw, (0, 2, 3, 1)).astype(jnp.float32)      # NHWC
    xp = jnp.pad(x, ((0, 0), (1, 1), (1, 1), (0, CIN_PAD - Cin)))
    taps = [xp[:, kh:kh + 2 * Ho1:2, kw:kw + 2 * Wo1:2, :]
            for kh in range(3) for kw in range(3)]
    patches = jnp.concatenate(taps, axis=-1)                 # (N, Ho1, Wo1, 72)
    patches = patches.reshape(N, Ho1, Wo1 // 2, 2, 9 * CIN_PAD)
    patches = patches.transpose(0, 1, 3, 2, 4)                # (oh, parity, j)
    l1_lhs = patches.reshape(N, Ho1 * Wo1, 9 * CIN_PAD).astype(jnp.bfloat16)

    wq, bq = _prep_params(params)
    K1, K2, K3, K4 = 9 * CIN_PAD, 12 * C1, 9 * C2, 9 * C3

    # VMEM scratch: padded activations (layer-2 input even/odd channel-packed)
    # and per-layer im2row staging buffers.
    Hp2, Wp2h = Ho1 + 2, Wo1 // 2 + 1
    Hp3, Wp3 = Ho2 + 2, Wo2 + 2
    Hp4, Wp4 = Ho3 + 2, Wo3 + 2
    scratch = [
        ((Hp2, Wp2h, 2 * C1), jnp.bfloat16),
        ((Hp3, Wp3, C2), jnp.bfloat16),
        ((Hp4, Wp4, C3), jnp.bfloat16),
        ((Ho2 * Wo2, K2), jnp.bfloat16),
        ((Ho3 * Wo3, K3), jnp.bfloat16),
        ((Ho4 * Wo4, K4), jnp.bfloat16),
    ]
    scratch_shapes = [pltpu.VMEM(s, d) for s, d in scratch]

    def _const(shape):
        return pl.BlockSpec(shape, lambda n: (0, 0))

    in_specs = [
        pl.BlockSpec((None, Ho1 * Wo1, K1), lambda n: (n, 0, 0)),
        _const((K1, C1)), _const((1, C1)),
        _const((K2, C2)), _const((1, C2)),
        _const((K3, C3)), _const((1, C3)),
        _const((K4, C4)), _const((1, C4)),
    ]
    out_specs = pl.BlockSpec((None, Wo4, C4), lambda n: (n, 0, 0))
    out_shape = jax.ShapeDtypeStruct((N, Wo4, C4), jnp.float32)

    # VMEM budget from the actual block sizes (double-buffered pipeline blocks
    # + scratch + headroom), capped to stay safe on v7x (64 MiB VMEM);
    # v5e/v6e have 128 MiB so the same cap is conservative there too.
    blk_bytes = (_nbytes((Ho1 * Wo1, K1), jnp.bfloat16)
                 + sum(_nbytes(w.shape, w.dtype) for w in wq)
                 + sum(_nbytes(b.shape, b.dtype) for b in bq)
                 + _nbytes((Wo4, C4), jnp.float32))
    scr_bytes = sum(_nbytes(s, d) for s, d in scratch)
    vmem_bytes = min(2 * blk_bytes + scr_bytes + (8 << 20), 48 << 20)

    kernel = _make_fused_kernel(H, W)
    return pl.pallas_call(
        kernel,
        grid=(N,),
        in_specs=in_specs,
        out_specs=out_specs,
        out_shape=out_shape,
        scratch_shapes=scratch_shapes,
        compiler_params=pltpu.CompilerParams(
            dimension_semantics=("parallel",),
            vmem_limit_bytes=vmem_bytes,
        ),
    )(l1_lhs, wq[0], bq[0], wq[1], bq[1], wq[2], bq[2], wq[3], bq[3])


# --------------------------- parameter generation --------------------------- #

def init_conv_bn(key, cout, cin):
    k1, k2, k3, k4, k5 = jax.random.split(key, 5)
    w = 0.05 * jax.random.normal(k1, (cout, cin, 3, 3), jnp.float32)
    gamma = 1.0 + 0.1 * jax.random.normal(k2, (cout,), jnp.float32)
    beta = 0.1 * jax.random.normal(k3, (cout,), jnp.float32)
    running_mean = 0.1 * jax.random.normal(k4, (cout,), jnp.float32)
    running_var = 1.0 + 0.1 * jax.random.uniform(k5, (cout,), jnp.float32)
    eps = 1e-5
    scale = gamma / jnp.sqrt(running_var + eps)
    bias = beta - running_mean * scale
    return w, scale, bias


def make_params(key):
    shapes = [(64, 3), (128, 64), (256, 128), (256, 256)]
    keys = jax.random.split(key, len(shapes))
    return [init_conv_bn(k, co, ci) for k, (co, ci) in zip(keys, shapes)]


# ------------------------------ pure-JAX reference -------------------------- #

def reference(x_nchw, params):
    """lax.conv reference mirroring the kernel's bf16 quantization points."""
    def q(v):
        return v.astype(jnp.bfloat16).astype(jnp.float32)

    x = q(jnp.transpose(x_nchw, (0, 2, 3, 1)).astype(jnp.float32))
    y = None
    for (w, scale, bias), st in zip(params, STRIDES):
        w_hwio = q(jnp.transpose(w, (2, 3, 1, 0)) * scale[None, None, None, :])
        y = lax.conv_general_dilated(
            x, w_hwio, window_strides=st, padding=((1, 1), (1, 1)),
            dimension_numbers=("NHWC", "HWIO", "NHWC"),
            precision=lax.Precision.HIGHEST)
        y = jnp.maximum(y + bias, 0.0)
        x = q(y)                                  # kernel keeps bf16 activations
    return jnp.mean(y, axis=1)                    # AdaptiveAvgPool -> (N, W, C)


# ----------------------------------- main ----------------------------------- #

if __name__ == "__main__":
    root = jax.random.PRNGKey(0)
    k_params, k_x = jax.random.split(root)

    params = make_params(k_params)
    # Small input consistent with the module: N=2, C=3 (RGB), 16x16 spatial.
    x = jax.random.normal(k_x, (2, 3, 16, 16), jnp.float32)

    fwd = jax.jit(cnn_feature_extractor)
    out = jax.block_until_ready(fwd(x, params))
    ref = jax.block_until_ready(reference(x, params))

    assert out.shape == (2, 4, 256), out.shape
    assert bool(jnp.all(jnp.isfinite(out)))
    max_err = float(jnp.max(jnp.abs(out - ref)))
    assert jnp.allclose(out, ref, rtol=1e-2, atol=1e-2), max_err

    print("KERNEL_OK")
</pallas_src>

<mosaic_0001>
module attributes {stable_mosaic.version = 11 : i64} {
  func.func @kernel(%arg0: i32, %arg1: memref<1x64x72xbf16, #tpu.memory_space<vmem>>, %arg2: memref<72x64xbf16, #tpu.memory_space<vmem>>, %arg3: memref<1x64xf32, #tpu.memory_space<vmem>>, %arg4: memref<768x128xbf16, #tpu.memory_space<vmem>>, %arg5: memref<1x128xf32, #tpu.memory_space<vmem>>, %arg6: memref<1152x256xbf16, #tpu.memory_space<vmem>>, %arg7: memref<1x256xf32, #tpu.memory_space<vmem>>, %arg8: memref<2304x256xbf16, #tpu.memory_space<vmem>>, %arg9: memref<1x256xf32, #tpu.memory_space<vmem>>, %arg10: memref<1x4x256xf32, #tpu.memory_space<vmem>>, %arg11: memref<10x5x128xbf16, #tpu.memory_space<vmem>>, %arg12: memref<6x6x128xbf16, #tpu.memory_space<vmem>>, %arg13: memref<4x6x256xbf16, #tpu.memory_space<vmem>>, %arg14: memref<16x768xbf16, #tpu.memory_space<vmem>>, %arg15: memref<8x1152xbf16, #tpu.memory_space<vmem>>, %arg16: memref<4x2304xbf16, #tpu.memory_space<vmem>>) attributes {dimension_semantics = [#tpu.dimension_semantics<parallel>], iteration_bounds = array<i64: 2>, scalar_prefetch = 0 : i64, scratch_operands = 6 : i64, tpu.core_type = #tpu.core_type<tc>, window_params = [{transform_indices = @transform_0, window_bounds = array<i64: 1, 64, 72>}, {pipeline_mode = #tpu.pipeline_mode<synchronous>, transform_indices = @transform_1, window_bounds = array<i64: 72, 64>}, {pipeline_mode = #tpu.pipeline_mode<synchronous>, transform_indices = @transform_2, window_bounds = array<i64: 1, 64>}, {pipeline_mode = #tpu.pipeline_mode<synchronous>, transform_indices = @transform_3, window_bounds = array<i64: 768, 128>}, {pipeline_mode = #tpu.pipeline_mode<synchronous>, transform_indices = @transform_4, window_bounds = array<i64: 1, 128>}, {pipeline_mode = #tpu.pipeline_mode<synchronous>, transform_indices = @transform_5, window_bounds = array<i64: 1152, 256>}, {pipeline_mode = #tpu.pipeline_mode<synchronous>, transform_indices = @transform_6, window_bounds = array<i64: 1, 256>}, {pipeline_mode = #tpu.pipeline_mode<synchronous>, transform_indices = @transform_7, window_bounds = array<i64: 2304, 256>}, {pipeline_mode = #tpu.pipeline_mode<synchronous>, transform_indices = @transform_8, window_bounds = array<i64: 1, 256>}, {transform_indices = @transform_9, window_bounds = array<i64: 1, 4, 256>}]} {
    %cst = arith.constant 0.000000e+00 : bf16
    %0 = vector.broadcast %cst : bf16 to vector<10x5x128xbf16>
    %c0 = arith.constant 0 : index
    %c0_0 = arith.constant 0 : index
    %c0_1 = arith.constant 0 : index
    %1 = vector.load %arg11[%c0, %c0_0, %c0_1] : memref<10x5x128xbf16, #tpu.memory_space<vmem>>, vector<10x5x128xbf16>
    tpu.vector_store %arg11[%c0, %c0_0, %c0_1], %0 {strides = array<i32>} : memref<10x5x128xbf16, #tpu.memory_space<vmem>>, vector<10x5x128xbf16>,
    %cst_2 = arith.constant 0.000000e+00 : bf16
    %2 = vector.broadcast %cst_2 : bf16 to vector<6x6x128xbf16>
    %c0_3 = arith.constant 0 : index
    %c0_4 = arith.constant 0 : index
    %c0_5 = arith.constant 0 : index
    %3 = vector.load %arg12[%c0_3, %c0_4, %c0_5] : memref<6x6x128xbf16, #tpu.memory_space<vmem>>, vector<6x6x128xbf16>
    tpu.vector_store %arg12[%c0_3, %c0_4, %c0_5], %2 {strides = array<i32>} : memref<6x6x128xbf16, #tpu.memory_space<vmem>>, vector<6x6x128xbf16>,
    %cst_6 = arith.constant 0.000000e+00 : bf16
    %4 = vector.broadcast %cst_6 : bf16 to vector<4x6x256xbf16>
    %c0_7 = arith.constant 0 : index
    %c0_8 = arith.constant 0 : index
    %c0_9 = arith.constant 0 : index
    %5 = vector.load %arg13[%c0_7, %c0_8, %c0_9] : memref<4x6x256xbf16, #tpu.memory_space<vmem>>, vector<4x6x256xbf16>
    tpu.vector_store %arg13[%c0_7, %c0_8, %c0_9], %4 {strides = array<i32>} : memref<4x6x256xbf16, #tpu.memory_space<vmem>>, vector<4x6x256xbf16>,
    %c0_10 = arith.constant 0 : index
    %c0_11 = arith.constant 0 : index
    %c0_12 = arith.constant 0 : index
    %6 = vector.load %arg1[%c0_10, %c0_11, %c0_12] : memref<1x64x72xbf16, #tpu.memory_space<vmem>>, vector<1x64x72xbf16>
    %7 = vector.shape_cast %6 : vector<1x64x72xbf16> to vector<64x72xbf16>
    %c0_13 = arith.constant 0 : index
    %c0_14 = arith.constant 0 : index
    %8 = vector.load %arg2[%c0_13, %c0_14] : memref<72x64xbf16, #tpu.memory_space<vmem>>, vector<72x64xbf16>
    %cst_15 = arith.constant dense<0.000000e+00> : vector<64x64xf32>
    %9 = tpu.matmul %7, %8, %cst_15 {dimension_numbers = #tpu.dot_dimension_numbers<[1], [0], [0], [1], [0, 0, 1, 1], [], []>} : vector<64x72xbf16>, vector<72x64xbf16>, vector<64x64xf32> -> vector<64x64xf32>
    %c0_16 = arith.constant 0 : index
    %c0_17 = arith.constant 0 : index
    %10 = vector.load %arg3[%c0_16, %c0_17] : memref<1x64xf32, #tpu.memory_space<vmem>>, vector<1x64xf32>
    %11 = vector.broadcast %10 : vector<1x64xf32> to vector<64x64xf32>
    %12 = arith.addf %9, %11 : vector<64x64xf32>
    %cst_18 = arith.constant 0.000000e+00 : f32
    %13 = vector.broadcast %cst_18 : f32 to vector<64x64xf32>
    %14 = arith.maximumf %12, %13 : vector<64x64xf32>
    %15 = arith.truncf %14 : vector<64x64xf32> to vector<64x64xbf16>
    %16 = vector.extract_strided_slice %15 {offsets = [0, 0], sizes = [4, 64], strides = [1, 1]} : vector<64x64xbf16> to vector<4x64xbf16>
    %c1 = arith.constant 1 : index
    %c0_19 = arith.constant 0 : index
    %c64 = arith.constant 64 : index
    %17 = vector.load %arg11[%c1, %c0_19, %c64] : memref<10x5x128xbf16, #tpu.memory_space<vmem>>, vector<1x4x64xbf16>
    %18 = vector.shape_cast %17 : vector<1x4x64xbf16> to vector<4x64xbf16>
    %19 = vector.shape_cast %16 : vector<4x64xbf16> to vector<1x4x64xbf16>
    tpu.vector_store %arg11[%c1, %c0_19, %c64], %19 {strides = array<i32>} : memref<10x5x128xbf16, #tpu.memory_space<vmem>>, vector<1x4x64xbf16>,
    %20 = vector.extract_strided_slice %15 {offsets = [4, 0], sizes = [4, 64], strides = [1, 1]} : vector<64x64xbf16> to vector<4x64xbf16>
    %c1_20 = arith.constant 1 : index
    %c1_21 = arith.constant 1 : index
    %c0_22 = arith.constant 0 : index
    %21 = vector.load %arg11[%c1_20, %c1_21, %c0_22] : memref<10x5x128xbf16, #tpu.memory_space<vmem>>, vector<1x4x64xbf16>
    %22 = vector.shape_cast %21 : vector<1x4x64xbf16> to vector<4x64xbf16>
    %23 = vector.shape_cast %20 : vector<4x64xbf16> to vector<1x4x64xbf16>
    tpu.vector_store %arg11[%c1_20, %c1_21, %c0_22], %23 {strides = array<i32>} : memref<10x5x128xbf16, #tpu.memory_space<vmem>>, vector<1x4x64xbf16>,
    %24 = vector.extract_strided_slice %15 {offsets = [8, 0], sizes = [4, 64], strides = [1, 1]} : vector<64x64xbf16> to vector<4x64xbf16>
    %c2 = arith.constant 2 : index
    %c0_23 = arith.constant 0 : index
    %c64_24 = arith.constant 64 : index
    %25 = vector.load %arg11[%c2, %c0_23, %c64_24] : memref<10x5x128xbf16, #tpu.memory_space<vmem>>, vector<1x4x64xbf16>
    %26 = vector.shape_cast %25 : vector<1x4x64xbf16> to vector<4x64xbf16>
    %27 = vector.shape_cast %24 : vector<4x64xbf16> to vector<1x4x64xbf16>
    tpu.vector_store %arg11[%c2, %c0_23, %c64_24], %27 {strides = array<i32>} : memref<10x5x128xbf16, #tpu.memory_space<vmem>>, vector<1x4x64xbf16>,
    %28 = vector.extract_strided_slice %15 {offsets = [12, 0], sizes = [4, 64], strides = [1, 1]} : vector<64x64xbf16> to vector<4x64xbf16>
    %c2_25 = arith.constant 2 : index
    %c1_26 = arith.constant 1 : index
    %c0_27 = arith.constant 0 : index
    %29 = vector.load %arg11[%c2_25, %c1_26, %c0_27] : memref<10x5x128xbf16, #tpu.memory_space<vmem>>, vector<1x4x64xbf16>
    %30 = vector.shape_cast %29 : vector<1x4x64xbf16> to vector<4x64xbf16>
    %31 = vector.shape_cast %28 : vector<4x64xbf16> to vector<1x4x64xbf16>
    tpu.vector_store %arg11[%c2_25, %c1_26, %c0_27], %31 {strides = array<i32>} : memref<10x5x128xbf16, #tpu.memory_space<vmem>>, vector<1x4x64xbf16>,
    %32 = vector.extract_strided_slice %15 {offsets = [16, 0], sizes = [4, 64], strides = [1, 1]} : vector<64x64xbf16> to vector<4x64xbf16>
    %c3 = arith.constant 3 : index
    %c0_28 = arith.constant 0 : index
    %c64_29 = arith.constant 64 : index
    %33 = vector.load %arg11[%c3, %c0_28, %c64_29] : memref<10x5x128xbf16, #tpu.memory_space<vmem>>, vector<1x4x64xbf16>
    %34 = vector.shape_cast %33 : vector<1x4x64xbf16> to vector<4x64xbf16>
    %35 = vector.shape_cast %32 : vector<4x64xbf16> to vector<1x4x64xbf16>
    tpu.vector_store %arg11[%c3, %c0_28, %c64_29], %35 {strides = array<i32>} : memref<10x5x128xbf16, #tpu.memory_space<vmem>>, vector<1x4x64xbf16>,
    %36 = vector.extract_strided_slice %15 {offsets = [20, 0], sizes = [4, 64], strides = [1, 1]} : vector<64x64xbf16> to vector<4x64xbf16>
    %c3_30 = arith.constant 3 : index
    %c1_31 = arith.constant 1 : index
    %c0_32 = arith.constant 0 : index
    %37 = vector.load %arg11[%c3_30, %c1_31, %c0_32] : memref<10x5x128xbf16, #tpu.memory_space<vmem>>, vector<1x4x64xbf16>
    %38 = vector.shape_cast %37 : vector<1x4x64xbf16> to vector<4x64xbf16>
    %39 = vector.shape_cast %36 : vector<4x64xbf16> to vector<1x4x64xbf16>
    tpu.vector_store %arg11[%c3_30, %c1_31, %c0_32], %39 {strides = array<i32>} : memref<10x5x128xbf16, #tpu.memory_space<vmem>>, vector<1x4x64xbf16>,
    %40 = vector.extract_strided_slice %15 {offsets = [24, 0], sizes = [4, 64], strides = [1, 1]} : vector<64x64xbf16> to vector<4x64xbf16>
    %c4 = arith.constant 4 : index
    %c0_33 = arith.constant 0 : index
    %c64_34 = arith.constant 64 : index
    %41 = vector.load %arg11[%c4, %c0_33, %c64_34] : memref<10x5x128xbf16, #tpu.memory_space<vmem>>, vector<1x4x64xbf16>
    %42 = vector.shape_cast %41 : vector<1x4x64xbf16> to vector<4x64xbf16>
    %43 = vector.shape_cast %40 : vector<4x64xbf16> to vector<1x4x64xbf16>
    tpu.vector_store %arg11[%c4, %c0_33, %c64_34], %43 {strides = array<i32>} : memref<10x5x128xbf16, #tpu.memory_space<vmem>>, vector<1x4x64xbf16>,
    %44 = vector.extract_strided_slice %15 {offsets = [28, 0], sizes = [4, 64], strides = [1, 1]} : vector<64x64xbf16> to vector<4x64xbf16>
    %c4_35 = arith.constant 4 : index
    %c1_36 = arith.constant 1 : index
    %c0_37 = arith.constant 0 : index
    %45 = vector.load %arg11[%c4_35, %c1_36, %c0_37] : memref<10x5x128xbf16, #tpu.memory_space<vmem>>, vector<1x4x64xbf16>
    %46 = vector.shape_cast %45 : vector<1x4x64xbf16> to vector<4x64xbf16>
    %47 = vector.shape_cast %44 : vector<4x64xbf16> to vector<1x4x64xbf16>
    tpu.vector_store %arg11[%c4_35, %c1_36, %c0_37], %47 {strides = array<i32>} : memref<10x5x128xbf16, #tpu.memory_space<vmem>>, vector<1x4x64xbf16>,
    %48 = vector.extract_strided_slice %15 {offsets = [32, 0], sizes = [4, 64], strides = [1, 1]} : vector<64x64xbf16> to vector<4x64xbf16>
    %c5 = arith.constant 5 : index
    %c0_38 = arith.constant 0 : index
    %c64_39 = arith.constant 64 : index
    %49 = vector.load %arg11[%c5, %c0_38, %c64_39] : memref<10x5x128xbf16, #tpu.memory_space<vmem>>, vector<1x4x64xbf16>
    %50 = vector.shape_cast %49 : vector<1x4x64xbf16> to vector<4x64xbf16>
    %51 = vector.shape_cast %48 : vector<4x64xbf16> to vector<1x4x64xbf16>
    tpu.vector_store %arg11[%c5, %c0_38, %c64_39], %51 {strides = array<i32>} : memref<10x5x128xbf16, #tpu.memory_space<vmem>>, vector<1x4x64xbf16>,
    %52 = vector.extract_strided_slice %15 {offsets = [36, 0], sizes = [4, 64], strides = [1, 1]} : vector<64x64xbf16> to vector<4x64xbf16>
    %c5_40 = arith.constant 5 : index
    %c1_41 = arith.constant 1 : index
    %c0_42 = arith.constant 0 : index
    %53 = vector.load %arg11[%c5_40, %c1_41, %c0_42] : memref<10x5x128xbf16, #tpu.memory_space<vmem>>, vector<1x4x64xbf16>
    %54 = vector.shape_cast %53 : vector<1x4x64xbf16> to vector<4x64xbf16>
    %55 = vector.shape_cast %52 : vector<4x64xbf16> to vector<1x4x64xbf16>
    tpu.vector_store %arg11[%c5_40, %c1_41, %c0_42], %55 {strides = array<i32>} : memref<10x5x128xbf16, #tpu.memory_space<vmem>>, vector<1x4x64xbf16>,
    %56 = vector.extract_strided_slice %15 {offsets = [40, 0], sizes = [4, 64], strides = [1, 1]} : vector<64x64xbf16> to vector<4x64xbf16>
    %c6 = arith.constant 6 : index
    %c0_43 = arith.constant 0 : index
    %c64_44 = arith.constant 64 : index
    %57 = vector.load %arg11[%c6, %c0_43, %c64_44] : memref<10x5x128xbf16, #tpu.memory_space<vmem>>, vector<1x4x64xbf16>
    %58 = vector.shape_cast %57 : vector<1x4x64xbf16> to vector<4x64xbf16>
    %59 = vector.shape_cast %56 : vector<4x64xbf16> to vector<1x4x64xbf16>
    tpu.vector_store %arg11[%c6, %c0_43, %c64_44], %59 {strides = array<i32>} : memref<10x5x128xbf16, #tpu.memory_space<vmem>>, vector<1x4x64xbf16>,
    %60 = vector.extract_strided_slice %15 {offsets = [44, 0], sizes = [4, 64], strides = [1, 1]} : vector<64x64xbf16> to vector<4x64xbf16>
    %c6_45 = arith.constant 6 : index
    %c1_46 = arith.constant 1 : index
    %c0_47 = arith.constant 0 : index
    %61 = vector.load %arg11[%c6_45, %c1_46, %c0_47] : memref<10x5x128xbf16, #tpu.memory_space<vmem>>, vector<1x4x64xbf16>
    %62 = vector.shape_cast %61 : vector<1x4x64xbf16> to vector<4x64xbf16>
    %63 = vector.shape_cast %60 : vector<4x64xbf16> to vector<1x4x64xbf16>
    tpu.vector_store %arg11[%c6_45, %c1_46, %c0_47], %63 {strides = array<i32>} : memref<10x5x128xbf16, #tpu.memory_space<vmem>>, vector<1x4x64xbf16>,
    %64 = vector.extract_strided_slice %15 {offsets = [48, 0], sizes = [4, 64], strides = [1, 1]} : vector<64x64xbf16> to vector<4x64xbf16>
    %c7 = arith.constant 7 : index
    %c0_48 = arith.constant 0 : index
    %c64_49 = arith.constant 64 : index
    %65 = vector.load %arg11[%c7, %c0_48, %c64_49] : memref<10x5x128xbf16, #tpu.memory_space<vmem>>, vector<1x4x64xbf16>
    %66 = vector.shape_cast %65 : vector<1x4x64xbf16> to vector<4x64xbf16>
    %67 = vector.shape_cast %64 : vector<4x64xbf16> to vector<1x4x64xbf16>
    tpu.vector_store %arg11[%c7, %c0_48, %c64_49], %67 {strides = array<i32>} : memref<10x5x128xbf16, #tpu.memory_space<vmem>>, vector<1x4x64xbf16>,
    %68 = vector.extract_strided_slice %15 {offsets = [52, 0], sizes = [4, 64], strides = [1, 1]} : vector<64x64xbf16> to vector<4x64xbf16>
    %c7_50 = arith.constant 7 : index
    %c1_51 = arith.constant 1 : index
    %c0_52 = arith.constant 0 : index
    %69 = vector.load %arg11[%c7_50, %c1_51, %c0_52] : memref<10x5x128xbf16, #tpu.memory_space<vmem>>, vector<1x4x64xbf16>
    %70 = vector.shape_cast %69 : vector<1x4x64xbf16> to vector<4x64xbf16>
    %71 = vector.shape_cast %68 : vector<4x64xbf16> to vector<1x4x64xbf16>
    tpu.vector_store %arg11[%c7_50, %c1_51, %c0_52], %71 {strides = array<i32>} : memref<10x5x128xbf16, #tpu.memory_space<vmem>>, vector<1x4x64xbf16>,
    %72 = vector.extract_strided_slice %15 {offsets = [56, 0], sizes = [4, 64], strides = [1, 1]} : vector<64x64xbf16> to vector<4x64xbf16>
    %c8 = arith.constant 8 : index
    %c0_53 = arith.constant 0 : index
    %c64_54 = arith.constant 64 : index
    %73 = vector.load %arg11[%c8, %c0_53, %c64_54] : memref<10x5x128xbf16, #tpu.memory_space<vmem>>, vector<1x4x64xbf16>
    %74 = vector.shape_cast %73 : vector<1x4x64xbf16> to vector<4x64xbf16>
    %75 = vector.shape_cast %72 : vector<4x64xbf16> to vector<1x4x64xbf16>
    tpu.vector_store %arg11[%c8, %c0_53, %c64_54], %75 {strides = array<i32>} : memref<10x5x128xbf16, #tpu.memory_space<vmem>>, vector<1x4x64xbf16>,
    %76 = vector.extract_strided_slice %15 {offsets = [60, 0], sizes = [4, 64], strides = [1, 1]} : vector<64x64xbf16> to vector<4x64xbf16>
    %c8_55 = arith.constant 8 : index
    %c1_56 = arith.constant 1 : index
    %c0_57 = arith.constant 0 : index
    %77 = vector.load %arg11[%c8_55, %c1_56, %c0_57] : memref<10x5x128xbf16, #tpu.memory_space<vmem>>, vector<1x4x64xbf16>
    %78 = vector.shape_cast %77 : vector<1x4x64xbf16> to vector<4x64xbf16>
    %79 = vector.shape_cast %76 : vector<4x64xbf16> to vector<1x4x64xbf16>
    tpu.vector_store %arg11[%c8_55, %c1_56, %c0_57], %79 {strides = array<i32>} : memref<10x5x128xbf16, #tpu.memory_space<vmem>>, vector<1x4x64xbf16>,
    %c0_58 = arith.constant 0 : index
    %c0_59 = arith.constant 0 : index
    %c0_60 = arith.constant 0 : index
    %80 = vector.load %arg11[%c0_58, %c0_59, %c0_60] : memref<10x5x128xbf16, #tpu.memory_space<vmem>>, vector<1x4x128xbf16>
    %81 = vector.shape_cast %80 : vector<1x4x128xbf16> to vector<4x128xbf16>
    %c0_61 = arith.constant 0 : index
    %c0_62 = arith.constant 0 : index
    %82 = vector.load %arg14[%c0_61, %c0_62] : memref<16x768xbf16, #tpu.memory_space<vmem>>, vector<4x128xbf16>
    tpu.vector_store %arg14[%c0_61, %c0_62], %81 {strides = array<i32>} : memref<16x768xbf16, #tpu.memory_space<vmem>>, vector<4x128xbf16>,
    %c0_63 = arith.constant 0 : index
    %c1_64 = arith.constant 1 : index
    %c0_65 = arith.constant 0 : index
    %83 = vector.load %arg11[%c0_63, %c1_64, %c0_65] : memref<10x5x128xbf16, #tpu.memory_space<vmem>>, vector<1x4x128xbf16>
    %84 = vector.shape_cast %83 : vector<1x4x128xbf16> to vector<4x128xbf16>
    %c0_66 = arith.constant 0 : index
    %c128 = arith.constant 128 : index
    %85 = vector.load %arg14[%c0_66, %c128] : memref<16x768xbf16, #tpu.memory_space<vmem>>, vector<4x128xbf16>
    tpu.vector_store %arg14[%c0_66, %c128], %84 {strides = array<i32>} : memref<16x768xbf16, #tpu.memory_space<vmem>>, vector<4x128xbf16>,
    %c1_67 = arith.constant 1 : index
    %c0_68 = arith.constant 0 : index
    %c0_69 = arith.constant 0 : index
    %86 = vector.load %arg11[%c1_67, %c0_68, %c0_69] : memref<10x5x128xbf16, #tpu.memory_space<vmem>>, vector<1x4x128xbf16>
    %87 = vector.shape_cast %86 : vector<1x4x128xbf16> to vector<4x128xbf16>
    %c0_70 = arith.constant 0 : index
    %c256 = arith.constant 256 : index
    %88 = vector.load %arg14[%c0_70, %c256] : memref<16x768xbf16, #tpu.memory_space<vmem>>, vector<4x128xbf16>
    tpu.vector_store %arg14[%c0_70, %c256], %87 {strides = array<i32>} : memref<16x768xbf16, #tpu.memory_space<vmem>>, vector<4x128xbf16>,
    %c1_71 = arith.constant 1 : index
    %c1_72 = arith.constant 1 : index
    %c0_73 = arith.constant 0 : index
    %89 = vector.load %arg11[%c1_71, %c1_72, %c0_73] : memref<10x5x128xbf16, #tpu.memory_space<vmem>>, vector<1x4x128xbf16>
    %90 = vector.shape_cast %89 : vector<1x4x128xbf16> to vector<4x128xbf16>
    %c0_74 = arith.constant 0 : index
    %c384 = arith.constant 384 : index
    %91 = vector.load %arg14[%c0_74, %c384] : memref<16x768xbf16, #tpu.memory_space<vmem>>, vector<4x128xbf16>
    tpu.vector_store %arg14[%c0_74, %c384], %90 {strides = array<i32>} : memref<16x768xbf16, #tpu.memory_space<vmem>>, vector<4x128xbf16>,
    %c2_75 = arith.constant 2 : index
    %c0_76 = arith.constant 0 : index
    %c0_77 = arith.constant 0 : index
    %92 = vector.load %arg11[%c2_75, %c0_76, %c0_77] : memref<10x5x128xbf16, #tpu.memory_space<vmem>>, vector<1x4x128xbf16>
    %93 = vector.shape_cast %92 : vector<1x4x128xbf16> to vector<4x128xbf16>
    %c0_78 = arith.constant 0 : index
    %c512 = arith.constant 512 : index
    %94 = vector.load %arg14[%c0_78, %c512] : memref<16x768xbf16, #tpu.memory_space<vmem>>, vector<4x128xbf16>
    tpu.vector_store %arg14[%c0_78, %c512], %93 {strides = array<i32>} : memref<16x768xbf16, #tpu.memory_space<vmem>>, vector<4x128xbf16>,
    %c2_79 = arith.constant 2 : index
    %c1_80 = arith.constant 1 : index
    %c0_81 = arith.constant 0 : index
    %95 = vector.load %arg11[%c2_79, %c1_80, %c0_81] : memref<10x5x128xbf16, #tpu.memory_space<vmem>>, vector<1x4x128xbf16>
    %96 = vector.shape_cast %95 : vector<1x4x128xbf16> to vector<4x128xbf16>
    %c0_82 = arith.constant 0 : index
    %c640 = arith.constant 640 : index
    %97 = vector.load %arg14[%c0_82, %c640] : memref<16x768xbf16, #tpu.memory_space<vmem>>, vector<4x128xbf16>
    tpu.vector_store %arg14[%c0_82, %c640], %96 {strides = array<i32>} : memref<16x768xbf16, #tpu.memory_space<vmem>>, vector<4x128xbf16>,
    %c2_83 = arith.constant 2 : index
    %c0_84 = arith.constant 0 : index
    %c0_85 = arith.constant 0 : index
    %98 = vector.load %arg11[%c2_83, %c0_84, %c0_85] : memref<10x5x128xbf16, #tpu.memory_space<vmem>>, vector<1x4x128xbf16>
    %99 = vector.shape_cast %98 : vector<1x4x128xbf16> to vector<4x128xbf16>
    %c4_86 = arith.constant 4 : index
    %c0_87 = arith.constant 0 : index
    %100 = vector.load %arg14[%c4_86, %c0_87] : memref<16x768xbf16, #tpu.memory_space<vmem>>, vector<4x128xbf16>
    tpu.vector_store %arg14[%c4_86, %c0_87], %99 {strides = array<i32>} : memref<16x768xbf16, #tpu.memory_space<vmem>>, vector<4x128xbf16>,
    %c2_88 = arith.constant 2 : index
    %c1_89 = arith.constant 1 : index
    %c0_90 = arith.constant 0 : index
    %101 = vector.load %arg11[%c2_88, %c1_89, %c0_90] : memref<10x5x128xbf16, #tpu.memory_space<vmem>>, vector<1x4x128xbf16>
    %102 = vector.shape_cast %101 : vector<1x4x128xbf16> to vector<4x128xbf16>
    %c4_91 = arith.constant 4 : index
    %c128_92 = arith.constant 128 : index
    %103 = vector.load %arg14[%c4_91, %c128_92] : memref<16x768xbf16, #tpu.memory_space<vmem>>, vector<4x128xbf16>
    tpu.vector_store %arg14[%c4_91, %c128_92], %102 {strides = array<i32>} : memref<16x768xbf16, #tpu.memory_space<vmem>>, vector<4x128xbf16>,
    %c3_93 = arith.constant 3 : index
    %c0_94 = arith.constant 0 : index
    %c0_95 = arith.constant 0 : index
    %104 = vector.load %arg11[%c3_93, %c0_94, %c0_95] : memref<10x5x128xbf16, #tpu.memory_space<vmem>>, vector<1x4x128xbf16>
    %105 = vector.shape_cast %104 : vector<1x4x128xbf16> to vector<4x128xbf16>
    %c4_96 = arith.constant 4 : index
    %c256_97 = arith.constant 256 : index
    %106 = vector.load %arg14[%c4_96, %c256_97] : memref<16x768xbf16, #tpu.memory_space<vmem>>, vector<4x128xbf16>
    tpu.vector_store %arg14[%c4_96, %c256_97], %105 {strides = array<i32>} : memref<16x768xbf16, #tpu.memory_space<vmem>>, vector<4x128xbf16>,
    %c3_98 = arith.constant 3 : index
    %c1_99 = arith.constant 1 : index
    %c0_100 = arith.constant 0 : index
    %107 = vector.load %arg11[%c3_98, %c1_99, %c0_100] : memref<10x5x128xbf16, #tpu.memory_space<vmem>>, vector<1x4x128xbf16>
    %108 = vector.shape_cast %107 : vector<1x4x128xbf16> to vector<4x128xbf16>
    %c4_101 = arith.constant 4 : index
    %c384_102 = arith.constant 384 : index
    %109 = vector.load %arg14[%c4_101, %c384_102] : memref<16x768xbf16, #tpu.memory_space<vmem>>, vector<4x128xbf16>
    tpu.vector_store %arg14[%c4_101, %c384_102], %108 {strides = array<i32>} : memref<16x768xbf16, #tpu.memory_space<vmem>>, vector<4x128xbf16>,
    %c4_103 = arith.constant 4 : index
    %c0_104 = arith.constant 0 : index
    %c0_105 = arith.constant 0 : index
    %110 = vector.load %arg11[%c4_103, %c0_104, %c0_105] : memref<10x5x128xbf16, #tpu.memory_space<vmem>>, vector<1x4x128xbf16>
    %111 = vector.shape_cast %110 : vector<1x4x128xbf16> to vector<4x128xbf16>
    %c4_106 = arith.constant 4 : index
    %c512_107 = arith.constant 512 : index
    %112 = vector.load %arg14[%c4_106, %c512_107] : memref<16x768xbf16, #tpu.memory_space<vmem>>, vector<4x128xbf16>
    tpu.vector_store %arg14[%c4_106, %c512_107], %111 {strides = array<i32>} : memref<16x768xbf16, #tpu.memory_space<vmem>>, vector<4x128xbf16>,
    %c4_108 = arith.constant 4 : index
    %c1_109 = arith.constant 1 : index
    %c0_110 = arith.constant 0 : index
    %113 = vector.load %arg11[%c4_108, %c1_109, %c0_110] : memref<10x5x128xbf16, #tpu.memory_space<vmem>>, vector<1x4x128xbf16>
    %114 = vector.shape_cast %113 : vector<1x4x128xbf16> to vector<4x128xbf16>
    %c4_111 = arith.constant 4 : index
    %c640_112 = arith.constant 640 : index
    %115 = vector.load %arg14[%c4_111, %c640_112] : memref<16x768xbf16, #tpu.memory_space<vmem>>, vector<4x128xbf16>
    tpu.vector_store %arg14[%c4_111, %c640_112], %114 {strides = array<i32>} : memref<16x768xbf16, #tpu.memory_space<vmem>>, vector<4x128xbf16>,
    %c4_113 = arith.constant 4 : index
    %c0_114 = arith.constant 0 : index
    %c0_115 = arith.constant 0 : index
    %116 = vector.load %arg11[%c4_113, %c0_114, %c0_115] : memref<10x5x128xbf16, #tpu.memory_space<vmem>>, vector<1x4x128xbf16>
    %117 = vector.shape_cast %116 : vector<1x4x128xbf16> to vector<4x128xbf16>
    %c8_116 = arith.constant 8 : index
    %c0_117 = arith.constant 0 : index
    %118 = vector.load %arg14[%c8_116, %c0_117] : memref<16x768xbf16, #tpu.memory_space<vmem>>, vector<4x128xbf16>
    tpu.vector_store %arg14[%c8_116, %c0_117], %117 {strides = array<i32>} : memref<16x768xbf16, #tpu.memory_space<vmem>>, vector<4x128xbf16>,
    %c4_118 = arith.constant 4 : index
    %c1_119 = arith.constant 1 : index
    %c0_120 = arith.constant 0 : index
    %119 = vector.load %arg11[%c4_118, %c1_119, %c0_120] : memref<10x5x128xbf16, #tpu.memory_space<vmem>>, vector<1x4x128xbf16>
    %120 = vector.shape_cast %119 : vector<1x4x128xbf16> to vector<4x128xbf16>
    %c8_121 = arith.constant 8 : index
    %c128_122 = arith.constant 128 : index
    %121 = vector.load %arg14[%c8_121, %c128_122] : memref<16x768xbf16, #tpu.memory_space<vmem>>, vector<4x128xbf16>
    tpu.vector_store %arg14[%c8_121, %c128_122], %120 {strides = array<i32>} : memref<16x768xbf16, #tpu.memory_space<vmem>>, vector<4x128xbf16>,
    %c5_123 = arith.constant 5 : index
    %c0_124 = arith.constant 0 : index
    %c0_125 = arith.constant 0 : index
    %122 = vector.load %arg11[%c5_123, %c0_124, %c0_125] : memref<10x5x128xbf16, #tpu.memory_space<vmem>>, vector<1x4x128xbf16>
    %123 = vector.shape_cast %122 : vector<1x4x128xbf16> to vector<4x128xbf16>
    %c8_126 = arith.constant 8 : index
    %c256_127 = arith.constant 256 : index
    %124 = vector.load %arg14[%c8_126, %c256_127] : memref<16x768xbf16, #tpu.memory_space<vmem>>, vector<4x128xbf16>
    tpu.vector_store %arg14[%c8_126, %c256_127], %123 {strides = array<i32>} : memref<16x768xbf16, #tpu.memory_space<vmem>>, vector<4x128xbf16>,
    %c5_128 = arith.constant 5 : index
    %c1_129 = arith.constant 1 : index
    %c0_130 = arith.constant 0 : index
    %125 = vector.load %arg11[%c5_128, %c1_129, %c0_130] : memref<10x5x128xbf16, #tpu.memory_space<vmem>>, vector<1x4x128xbf16>
    %126 = vector.shape_cast %125 : vector<1x4x128xbf16> to vector<4x128xbf16>
    %c8_131 = arith.constant 8 : index
    %c384_132 = arith.constant 384 : index
    %127 = vector.load %arg14[%c8_131, %c384_132] : memref<16x768xbf16, #tpu.memory_space<vmem>>, vector<4x128xbf16>
    tpu.vector_store %arg14[%c8_131, %c384_132], %126 {strides = array<i32>} : memref<16x768xbf16, #tpu.memory_space<vmem>>, vector<4x128xbf16>,
    %c6_133 = arith.constant 6 : index
    %c0_134 = arith.constant 0 : index
    %c0_135 = arith.constant 0 : index
    %128 = vector.load %arg11[%c6_133, %c0_134, %c0_135] : memref<10x5x128xbf16, #tpu.memory_space<vmem>>, vector<1x4x128xbf16>
    %129 = vector.shape_cast %128 : vector<1x4x128xbf16> to vector<4x128xbf16>
    %c8_136 = arith.constant 8 : index
    %c512_137 = arith.constant 512 : index
    %130 = vector.load %arg14[%c8_136, %c512_137] : memref<16x768xbf16, #tpu.memory_space<vmem>>, vector<4x128xbf16>
    tpu.vector_store %arg14[%c8_136, %c512_137], %129 {strides = array<i32>} : memref<16x768xbf16, #tpu.memory_space<vmem>>, vector<4x128xbf16>,
    %c6_138 = arith.constant 6 : index
    %c1_139 = arith.constant 1 : index
    %c0_140 = arith.constant 0 : index
    %131 = vector.load %arg11[%c6_138, %c1_139, %c0_140] : memref<10x5x128xbf16, #tpu.memory_space<vmem>>, vector<1x4x128xbf16>
    %132 = vector.shape_cast %131 : vector<1x4x128xbf16> to vector<4x128xbf16>
    %c8_141 = arith.constant 8 : index
    %c640_142 = arith.constant 640 : index
    %133 = vector.load %arg14[%c8_141, %c640_142] : memref<16x768xbf16, #tpu.memory_space<vmem>>, vector<4x128xbf16>
    tpu.vector_store %arg14[%c8_141, %c640_142], %132 {strides = array<i32>} : memref<16x768xbf16, #tpu.memory_space<vmem>>, vector<4x128xbf16>,
    %c6_143 = arith.constant 6 : index
    %c0_144 = arith.constant 0 : index
    %c0_145 = arith.constant 0 : index
    %134 = vector.load %arg11[%c6_143, %c0_144, %c0_145] : memref<10x5x128xbf16, #tpu.memory_space<vmem>>, vector<1x4x128xbf16>
    %135 = vector.shape_cast %134 : vector<1x4x128xbf16> to vector<4x128xbf16>
    %c12 = arith.constant 12 : index
    %c0_146 = arith.constant 0 : index
    %136 = vector.load %arg14[%c12, %c0_146] : memref<16x768xbf16, #tpu.memory_space<vmem>>, vector<4x128xbf16>
    tpu.vector_store %arg14[%c12, %c0_146], %135 {strides = array<i32>} : memref<16x768xbf16, #tpu.memory_space<vmem>>, vector<4x128xbf16>,
    %c6_147 = arith.constant 6 : index
    %c1_148 = arith.constant 1 : index
    %c0_149 = arith.constant 0 : index
    %137 = vector.load %arg11[%c6_147, %c1_148, %c0_149] : memref<10x5x128xbf16, #tpu.memory_space<vmem>>, vector<1x4x128xbf16>
    %138 = vector.shape_cast %137 : vector<1x4x128xbf16> to vector<4x128xbf16>
    %c12_150 = arith.constant 12 : index
    %c128_151 = arith.constant 128 : index
    %139 = vector.load %arg14[%c12_150, %c128_151] : memref<16x768xbf16, #tpu.memory_space<vmem>>, vector<4x128xbf16>
    tpu.vector_store %arg14[%c12_150, %c128_151], %138 {strides = array<i32>} : memref<16x768xbf16, #tpu.memory_space<vmem>>, vector<4x128xbf16>,
    %c7_152 = arith.constant 7 : index
    %c0_153 = arith.constant 0 : index
    %c0_154 = arith.constant 0 : index
    %140 = vector.load %arg11[%c7_152, %c0_153, %c0_154] : memref<10x5x128xbf16, #tpu.memory_space<vmem>>, vector<1x4x128xbf16>
    %141 = vector.shape_cast %140 : vector<1x4x128xbf16> to vector<4x128xbf16>
    %c12_155 = arith.constant 12 : index
    %c256_156 = arith.constant 256 : index
    %142 = vector.load %arg14[%c12_155, %c256_156] : memref<16x768xbf16, #tpu.memory_space<vmem>>, vector<4x128xbf16>
    tpu.vector_store %arg14[%c12_155, %c256_156], %141 {strides = array<i32>} : memref<16x768xbf16, #tpu.memory_space<vmem>>, vector<4x128xbf16>,
    %c7_157 = arith.constant 7 : index
    %c1_158 = arith.constant 1 : index
    %c0_159 = arith.constant 0 : index
    %143 = vector.load %arg11[%c7_157, %c1_158, %c0_159] : memref<10x5x128xbf16, #tpu.memory_space<vmem>>, vector<1x4x128xbf16>
    %144 = vector.shape_cast %143 : vector<1x4x128xbf16> to vector<4x128xbf16>
    %c12_160 = arith.constant 12 : index
    %c384_161 = arith.constant 384 : index
    %145 = vector.load %arg14[%c12_160, %c384_161] : memref<16x768xbf16, #tpu.memory_space<vmem>>, vector<4x128xbf16>
    tpu.vector_store %arg14[%c12_160, %c384_161], %144 {strides = array<i32>} : memref<16x768xbf16, #tpu.memory_space<vmem>>, vector<4x128xbf16>,
    %c8_162 = arith.constant 8 : index
    %c0_163 = arith.constant 0 : index
    %c0_164 = arith.constant 0 : index
    %146 = vector.load %arg11[%c8_162, %c0_163, %c0_164] : memref<10x5x128xbf16, #tpu.memory_space<vmem>>, vector<1x4x128xbf16>
    %147 = vector.shape_cast %146 : vector<1x4x128xbf16> to vector<4x128xbf16>
    %c12_165 = arith.constant 12 : index
    %c512_166 = arith.constant 512 : index
    %148 = vector.load %arg14[%c12_165, %c512_166] : memref<16x768xbf16, #tpu.memory_space<vmem>>, vector<4x128xbf16>
    tpu.vector_store %arg14[%c12_165, %c512_166], %147 {strides = array<i32>} : memref<16x768xbf16, #tpu.memory_space<vmem>>, vector<4x128xbf16>,
    %c8_167 = arith.constant 8 : index
    %c1_168 = arith.constant 1 : index
    %c0_169 = arith.constant 0 : index
    %149 = vector.load %arg11[%c8_167, %c1_168, %c0_169] : memref<10x5x128xbf16, #tpu.memory_space<vmem>>, vector<1x4x128xbf16>
    %150 = vector.shape_cast %149 : vector<1x4x128xbf16> to vector<4x128xbf16>
    %c12_170 = arith.constant 12 : index
    %c640_171 = arith.constant 640 : index
    %151 = vector.load %arg14[%c12_170, %c640_171] : memref<16x768xbf16, #tpu.memory_space<vmem>>, vector<4x128xbf16>
    tpu.vector_store %arg14[%c12_170, %c640_171], %150 {strides = array<i32>} : memref<16x768xbf16, #tpu.memory_space<vmem>>, vector<4x128xbf16>,
    %c0_172 = arith.constant 0 : index
    %c0_173 = arith.constant 0 : index
    %152 = vector.load %arg14[%c0_172, %c0_173] : memref<16x768xbf16, #tpu.memory_space<vmem>>, vector<16x768xbf16>
    %c0_174 = arith.constant 0 : index
    %c0_175 = arith.constant 0 : index
    %153 = vector.load %arg4[%c0_174, %c0_175] : memref<768x128xbf16, #tpu.memory_space<vmem>>, vector<768x128xbf16>
    %cst_176 = arith.constant dense<0.000000e+00> : vector<16x128xf32>
    %154 = tpu.matmul %152, %153, %cst_176 {dimension_numbers = #tpu.dot_dimension_numbers<[1], [0], [0], [1], [0, 0, 1, 1], [], []>} : vector<16x768xbf16>, vector<768x128xbf16>, vector<16x128xf32> -> vector<16x128xf32>
    %c0_177 = arith.constant 0 : index
    %c0_178 = arith.constant 0 : index
    %155 = vector.load %arg5[%c0_177, %c0_178] : memref<1x128xf32, #tpu.memory_space<vmem>>, vector<1x128xf32>
    %156 = vector.broadcast %155 : vector<1x128xf32> to vector<16x128xf32>
    %157 = arith.addf %154, %156 : vector<16x128xf32>
    %cst_179 = arith.constant 0.000000e+00 : f32
    %158 = vector.broadcast %cst_179 : f32 to vector<16x128xf32>
    %159 = arith.maximumf %157, %158 : vector<16x128xf32>
    %160 = arith.truncf %159 : vector<16x128xf32> to vector<16x128xbf16>
    %161 = vector.extract_strided_slice %160 {offsets = [0, 0], sizes = [4, 128], strides = [1, 1]} : vector<16x128xbf16> to vector<4x128xbf16>
    %c1_180 = arith.constant 1 : index
    %c1_181 = arith.constant 1 : index
    %c0_182 = arith.constant 0 : index
    %162 = vector.load %arg12[%c1_180, %c1_181, %c0_182] : memref<6x6x128xbf16, #tpu.memory_space<vmem>>, vector<1x4x128xbf16>
    %163 = vector.shape_cast %162 : vector<1x4x128xbf16> to vector<4x128xbf16>
    %164 = vector.shape_cast %161 : vector<4x128xbf16> to vector<1x4x128xbf16>
    tpu.vector_store %arg12[%c1_180, %c1_181, %c0_182], %164 {strides = array<i32>} : memref<6x6x128xbf16, #tpu.memory_space<vmem>>, vector<1x4x128xbf16>,
    %165 = vector.extract_strided_slice %160 {offsets = [4, 0], sizes = [4, 128], strides = [1, 1]} : vector<16x128xbf16> to vector<4x128xbf16>
    %c2_183 = arith.constant 2 : index
    %c1_184 = arith.constant 1 : index
    %c0_185 = arith.constant 0 : index
    %166 = vector.load %arg12[%c2_183, %c1_184, %c0_185] : memref<6x6x128xbf16, #tpu.memory_space<vmem>>, vector<1x4x128xbf16>
    %167 = vector.shape_cast %166 : vector<1x4x128xbf16> to vector<4x128xbf16>
    %168 = vector.shape_cast %165 : vector<4x128xbf16> to vector<1x4x128xbf16>
    tpu.vector_store %arg12[%c2_183, %c1_184, %c0_185], %168 {strides = array<i32>} : memref<6x6x128xbf16, #tpu.memory_space<vmem>>, vector<1x4x128xbf16>,
    %169 = vector.extract_strided_slice %160 {offsets = [8, 0], sizes = [4, 128], strides = [1, 1]} : vector<16x128xbf16> to vector<4x128xbf16>
    %c3_186 = arith.constant 3 : index
    %c1_187 = arith.constant 1 : index
    %c0_188 = arith.constant 0 : index
    %170 = vector.load %arg12[%c3_186, %c1_187, %c0_188] : memref<6x6x128xbf16, #tpu.memory_space<vmem>>, vector<1x4x128xbf16>
    %171 = vector.shape_cast %170 : vector<1x4x128xbf16> to vector<4x128xbf16>
    %172 = vector.shape_cast %169 : vector<4x128xbf16> to vector<1x4x128xbf16>
    tpu.vector_store %arg12[%c3_186, %c1_187, %c0_188], %172 {strides = array<i32>} : memref<6x6x128xbf16, #tpu.memory_space<vmem>>, vector<1x4x128xbf16>,
    %173 = vector.extract_strided_slice %160 {offsets = [12, 0], sizes = [4, 128], strides = [1, 1]} : vector<16x128xbf16> to vector<4x128xbf16>
    %c4_189 = arith.constant 4 : index
    %c1_190 = arith.constant 1 : index
    %c0_191 = arith.constant 0 : index
    %174 = vector.load %arg12[%c4_189, %c1_190, %c0_191] : memref<6x6x128xbf16, #tpu.memory_space<vmem>>, vector<1x4x128xbf16>
    %175 = vector.shape_cast %174 : vector<1x4x128xbf16> to vector<4x128xbf16>
    %176 = vector.shape_cast %173 : vector<4x128xbf16> to vector<1x4x128xbf16>
    tpu.vector_store %arg12[%c4_189, %c1_190, %c0_191], %176 {strides = array<i32>} : memref<6x6x128xbf16, #tpu.memory_space<vmem>>, vector<1x4x128xbf16>,
    %c0_192 = arith.constant 0 : index
    %c0_193 = arith.constant 0 : index
    %c0_194 = arith.constant 0 : index
    %177 = vector.load %arg12[%c0_192, %c0_193, %c0_194] : memref<6x6x128xbf16, #tpu.memory_space<vmem>>, vector<1x4x128xbf16>
    %178 = vector.shape_cast %177 : vector<1x4x128xbf16> to vector<4x128xbf16>
    %c0_195 = arith.constant 0 : index
    %c0_196 = arith.constant 0 : index
    %179 = vector.load %arg15[%c0_195, %c0_196] : memref<8x1152xbf16, #tpu.memory_space<vmem>>, vector<4x128xbf16>
    tpu.vector_store %arg15[%c0_195, %c0_196], %178 {strides = array<i32>} : memref<8x1152xbf16, #tpu.memory_space<vmem>>, vector<4x128xbf16>,
    %c0_197 = arith.constant 0 : index
    %c1_198 = arith.constant 1 : index
    %c0_199 = arith.constant 0 : index
    %180 = vector.load %arg12[%c0_197, %c1_198, %c0_199] : memref<6x6x128xbf16, #tpu.memory_space<vmem>>, vector<1x4x128xbf16>
    %181 = vector.shape_cast %180 : vector<1x4x128xbf16> to vector<4x128xbf16>
    %c0_200 = arith.constant 0 : index
    %c128_201 = arith.constant 128 : index
    %182 = vector.load %arg15[%c0_200, %c128_201] : memref<8x1152xbf16, #tpu.memory_space<vmem>>, vector<4x128xbf16>
    tpu.vector_store %arg15[%c0_200, %c128_201], %181 {strides = array<i32>} : memref<8x1152xbf16, #tpu.memory_space<vmem>>, vector<4x128xbf16>,
    %c0_202 = arith.constant 0 : index
    %c2_203 = arith.constant 2 : index
    %c0_204 = arith.constant 0 : index
    %183 = vector.load %arg12[%c0_202, %c2_203, %c0_204] : memref<6x6x128xbf16, #tpu.memory_space<vmem>>, vector<1x4x128xbf16>
    %184 = vector.shape_cast %183 : vector<1x4x128xbf16> to vector<4x128xbf16>
    %c0_205 = arith.constant 0 : index
    %c256_206 = arith.constant 256 : index
    %185 = vector.load %arg15[%c0_205, %c256_206] : memref<8x1152xbf16, #tpu.memory_space<vmem>>, vector<4x128xbf16>
    tpu.vector_store %arg15[%c0_205, %c256_206], %184 {strides = array<i32>} : memref<8x1152xbf16, #tpu.memory_space<vmem>>, vector<4x128xbf16>,
    %c1_207 = arith.constant 1 : index
    %c0_208 = arith.constant 0 : index
    %c0_209 = arith.constant 0 : index
    %186 = vector.load %arg12[%c1_207, %c0_208, %c0_209] : memref<6x6x128xbf16, #tpu.memory_space<vmem>>, vector<1x4x128xbf16>
    %187 = vector.shape_cast %186 : vector<1x4x128xbf16> to vector<4x128xbf16>
    %c0_210 = arith.constant 0 : index
    %c384_211 = arith.constant 384 : index
    %188 = vector.load %arg15[%c0_210, %c384_211] : memref<8x1152xbf16, #tpu.memory_space<vmem>>, vector<4x128xbf16>
    tpu.vector_store %arg15[%c0_210, %c384_211], %187 {strides = array<i32>} : memref<8x1152xbf16, #tpu.memory_space<vmem>>, vector<4x128xbf16>,
    %c1_212 = arith.constant 1 : index
    %c1_213 = arith.constant 1 : index
    %c0_214 = arith.constant 0 : index
    %189 = vector.load %arg12[%c1_212, %c1_213, %c0_214] : memref<6x6x128xbf16, #tpu.memory_space<vmem>>, vector<1x4x128xbf16>
    %190 = vector.shape_cast %189 : vector<1x4x128xbf16> to vector<4x128xbf16>
    %c0_215 = arith.constant 0 : index
    %c512_216 = arith.constant 512 : index
    %191 = vector.load %arg15[%c0_215, %c512_216] : memref<8x1152xbf16, #tpu.memory_space<vmem>>, vector<4x128xbf16>
    tpu.vector_store %arg15[%c0_215, %c512_216], %190 {strides = array<i32>} : memref<8x1152xbf16, #tpu.memory_space<vmem>>, vector<4x128xbf16>,
    %c1_217 = arith.constant 1 : index
    %c2_218 = arith.constant 2 : index
    %c0_219 = arith.constant 0 : index
    %192 = vector.load %arg12[%c1_217, %c2_218, %c0_219] : memref<6x6x128xbf16, #tpu.memory_space<vmem>>, vector<1x4x128xbf16>
    %193 = vector.shape_cast %192 : vector<1x4x128xbf16> to vector<4x128xbf16>
    %c0_220 = arith.constant 0 : index
    %c640_221 = arith.constant 640 : index
    %194 = vector.load %arg15[%c0_220, %c640_221] : memref<8x1152xbf16, #tpu.memory_space<vmem>>, vector<4x128xbf16>
    tpu.vector_store %arg15[%c0_220, %c640_221], %193 {strides = array<i32>} : memref<8x1152xbf16, #tpu.memory_space<vmem>>, vector<4x128xbf16>,
    %c2_222 = arith.constant 2 : index
    %c0_223 = arith.constant 0 : index
    %c0_224 = arith.constant 0 : index
    %195 = vector.load %arg12[%c2_222, %c0_223, %c0_224] : memref<6x6x128xbf16, #tpu.memory_space<vmem>>, vector<1x4x128xbf16>
    %196 = vector.shape_cast %195 : vector<1x4x128xbf16> to vector<4x128xbf16>
    %c0_225 = arith.constant 0 : index
    %c768 = arith.constant 768 : index
    %197 = vector.load %arg15[%c0_225, %c768] : memref<8x1152xbf16, #tpu.memory_space<vmem>>, vector<4x128xbf16>
    tpu.vector_store %arg15[%c0_225, %c768], %196 {strides = array<i32>} : memref<8x1152xbf16, #tpu.memory_space<vmem>>, vector<4x128xbf16>,
    %c2_226 = arith.constant 2 : index
    %c1_227 = arith.constant 1 : index
    %c0_228 = arith.constant 0 : index
    %198 = vector.load %arg12[%c2_226, %c1_227, %c0_228] : memref<6x6x128xbf16, #tpu.memory_space<vmem>>, vector<1x4x128xbf16>
    %199 = vector.shape_cast %198 : vector<1x4x128xbf16> to vector<4x128xbf16>
    %c0_229 = arith.constant 0 : index
    %c896 = arith.constant 896 : index
    %200 = vector.load %arg15[%c0_229, %c896] : memref<8x1152xbf16, #tpu.memory_space<vmem>>, vector<4x128xbf16>
    tpu.vector_store %arg15[%c0_229, %c896], %199 {strides = array<i32>} : memref<8x1152xbf16, #tpu.memory_space<vmem>>, vector<4x128xbf16>,
    %c2_230 = arith.constant 2 : index
    %c2_231 = arith.constant 2 : index
    %c0_232 = arith.constant 0 : index
    %201 = vector.load %arg12[%c2_230, %c2_231, %c0_232] : memref<6x6x128xbf16, #tpu.memory_space<vmem>>, vector<1x4x128xbf16>
    %202 = vector.shape_cast %201 : vector<1x4x128xbf16> to vector<4x128xbf16>
    %c0_233 = arith.constant 0 : index
    %c1024 = arith.constant 1024 : index
    %203 = vector.load %arg15[%c0_233, %c1024] : memref<8x1152xbf16, #tpu.memory_space<vmem>>, vector<4x128xbf16>
    tpu.vector_store %arg15[%c0_233, %c1024], %202 {strides = array<i32>} : memref<8x1152xbf16, #tpu.memory_space<vmem>>, vector<4x128xbf16>,
    %c2_234 = arith.constant 2 : index
    %c0_235 = arith.constant 0 : index
    %c0_236 = arith.constant 0 : index
    %204 = vector.load %arg12[%c2_234, %c0_235, %c0_236] : memref<6x6x128xbf16, #tpu.memory_space<vmem>>, vector<1x4x128xbf16>
    %205 = vector.shape_cast %204 : vector<1x4x128xbf16> to vector<4x128xbf16>
    %c4_237 = arith.constant 4 : index
    %c0_238 = arith.constant 0 : index
    %206 = vector.load %arg15[%c4_237, %c0_238] : memref<8x1152xbf16, #tpu.memory_space<vmem>>, vector<4x128xbf16>
    tpu.vector_store %arg15[%c4_237, %c0_238], %205 {strides = array<i32>} : memref<8x1152xbf16, #tpu.memory_space<vmem>>, vector<4x128xbf16>,
    %c2_239 = arith.constant 2 : index
    %c1_240 = arith.constant 1 : index
    %c0_241 = arith.constant 0 : index
    %207 = vector.load %arg12[%c2_239, %c1_240, %c0_241] : memref<6x6x128xbf16, #tpu.memory_space<vmem>>, vector<1x4x128xbf16>
    %208 = vector.shape_cast %207 : vector<1x4x128xbf16> to vector<4x128xbf16>
    %c4_242 = arith.constant 4 : index
    %c128_243 = arith.constant 128 : index
    %209 = vector.load %arg15[%c4_242, %c128_243] : memref<8x1152xbf16, #tpu.memory_space<vmem>>, vector<4x128xbf16>
    tpu.vector_store %arg15[%c4_242, %c128_243], %208 {strides = array<i32>} : memref<8x1152xbf16, #tpu.memory_space<vmem>>, vector<4x128xbf16>,
    %c2_244 = arith.constant 2 : index
    %c2_245 = arith.constant 2 : index
    %c0_246 = arith.constant 0 : index
    %210 = vector.load %arg12[%c2_244, %c2_245, %c0_246] : memref<6x6x128xbf16, #tpu.memory_space<vmem>>, vector<1x4x128xbf16>
    %211 = vector.shape_cast %210 : vector<1x4x128xbf16> to vector<4x128xbf16>
    %c4_247 = arith.constant 4 : index
    %c256_248 = arith.constant 256 : index
    %212 = vector.load %arg15[%c4_247, %c256_248] : memref<8x1152xbf16, #tpu.memory_space<vmem>>, vector<4x128xbf16>
    tpu.vector_store %arg15[%c4_247, %c256_248], %211 {strides = array<i32>} : memref<8x1152xbf16, #tpu.memory_space<vmem>>, vector<4x128xbf16>,
    %c3_249 = arith.constant 3 : index
    %c0_250 = arith.constant 0 : index
    %c0_251 = arith.constant 0 : index
    %213 = vector.load %arg12[%c3_249, %c0_250, %c0_251] : memref<6x6x128xbf16, #tpu.memory_space<vmem>>, vector<1x4x128xbf16>
    %214 = vector.shape_cast %213 : vector<1x4x128xbf16> to vector<4x128xbf16>
    %c4_252 = arith.constant 4 : index
    %c384_253 = arith.constant 384 : index
    %215 = vector.load %arg15[%c4_252, %c384_253] : memref<8x1152xbf16, #tpu.memory_space<vmem>>, vector<4x128xbf16>
    tpu.vector_store %arg15[%c4_252, %c384_253], %214 {strides = array<i32>} : memref<8x1152xbf16, #tpu.memory_space<vmem>>, vector<4x128xbf16>,
    %c3_254 = arith.constant 3 : index
    %c1_255 = arith.constant 1 : index
    %c0_256 = arith.constant 0 : index
    %216 = vector.load %arg12[%c3_254, %c1_255, %c0_256] : memref<6x6x128xbf16, #tpu.memory_space<vmem>>, vector<1x4x128xbf16>
    %217 = vector.shape_cast %216 : vector<1x4x128xbf16> to vector<4x128xbf16>
    %c4_257 = arith.constant 4 : index
    %c512_258 = arith.constant 512 : index
    %218 = vector.load %arg15[%c4_257, %c512_258] : memref<8x1152xbf16, #tpu.memory_space<vmem>>, vector<4x128xbf16>
    tpu.vector_store %arg15[%c4_257, %c512_258], %217 {strides = array<i32>} : memref<8x1152xbf16, #tpu.memory_space<vmem>>, vector<4x128xbf16>,
    %c3_259 = arith.constant 3 : index
    %c2_260 = arith.constant 2 : index
    %c0_261 = arith.constant 0 : index
    %219 = vector.load %arg12[%c3_259, %c2_260, %c0_261] : memref<6x6x128xbf16, #tpu.memory_space<vmem>>, vector<1x4x128xbf16>
    %220 = vector.shape_cast %219 : vector<1x4x128xbf16> to vector<4x128xbf16>
    %c4_262 = arith.constant 4 : index
    %c640_263 = arith.constant 640 : index
    %221 = vector.load %arg15[%c4_262, %c640_263] : memref<8x1152xbf16, #tpu.memory_space<vmem>>, vector<4x128xbf16>
    tpu.vector_store %arg15[%c4_262, %c640_263], %220 {strides = array<i32>} : memref<8x1152xbf16, #tpu.memory_space<vmem>>, vector<4x128xbf16>,
    %c4_264 = arith.constant 4 : index
    %c0_265 = arith.constant 0 : index
    %c0_266 = arith.constant 0 : index
    %222 = vector.load %arg12[%c4_264, %c0_265, %c0_266] : memref<6x6x128xbf16, #tpu.memory_space<vmem>>, vector<1x4x128xbf16>
    %223 = vector.shape_cast %222 : vector<1x4x128xbf16> to vector<4x128xbf16>
    %c4_267 = arith.constant 4 : index
    %c768_268 = arith.constant 768 : index
    %224 = vector.load %arg15[%c4_267, %c768_268] : memref<8x1152xbf16, #tpu.memory_space<vmem>>, vector<4x128xbf16>
    tpu.vector_store %arg15[%c4_267, %c768_268], %223 {strides = array<i32>} : memref<8x1152xbf16, #tpu.memory_space<vmem>>, vector<4x128xbf16>,
    %c4_269 = arith.constant 4 : index
    %c1_270 = arith.constant 1 : index
    %c0_271 = arith.constant 0 : index
    %225 = vector.load %arg12[%c4_269, %c1_270, %c0_271] : memref<6x6x128xbf16, #tpu.memory_space<vmem>>, vector<1x4x128xbf16>
    %226 = vector.shape_cast %225 : vector<1x4x128xbf16> to vector<4x128xbf16>
    %c4_272 = arith.constant 4 : index
    %c896_273 = arith.constant 896 : index
    %227 = vector.load %arg15[%c4_272, %c896_273] : memref<8x1152xbf16, #tpu.memory_space<vmem>>, vector<4x128xbf16>
    tpu.vector_store %arg15[%c4_272, %c896_273], %226 {strides = array<i32>} : memref<8x1152xbf16, #tpu.memory_space<vmem>>, vector<4x128xbf16>,
    %c4_274 = arith.constant 4 : index
    %c2_275 = arith.constant 2 : index
    %c0_276 = arith.constant 0 : index
    %228 = vector.load %arg12[%c4_274, %c2_275, %c0_276] : memref<6x6x128xbf16, #tpu.memory_space<vmem>>, vector<1x4x128xbf16>
    %229 = vector.shape_cast %228 : vector<1x4x128xbf16> to vector<4x128xbf16>
    %c4_277 = arith.constant 4 : index
    %c1024_278 = arith.constant 1024 : index
    %230 = vector.load %arg15[%c4_277, %c1024_278] : memref<8x1152xbf16, #tpu.memory_space<vmem>>, vector<4x128xbf16>
    tpu.vector_store %arg15[%c4_277, %c1024_278], %229 {strides = array<i32>} : memref<8x1152xbf16, #tpu.memory_space<vmem>>, vector<4x128xbf16>,
    %c0_279 = arith.constant 0 : index
    %c0_280 = arith.constant 0 : index
    %231 = vector.load %arg15[%c0_279, %c0_280] : memref<8x1152xbf16, #tpu.memory_space<vmem>>, vector<8x1152xbf16>
    %c0_281 = arith.constant 0 : index
    %c0_282 = arith.constant 0 : index
    %232 = vector.load %arg6[%c0_281, %c0_282] : memref<1152x256xbf16, #tpu.memory_space<vmem>>, vector<1152x256xbf16>
    %cst_283 = arith.constant dense<0.000000e+00> : vector<8x256xf32>
    %233 = tpu.matmul %231, %232, %cst_283 {dimension_numbers = #tpu.dot_dimension_numbers<[1], [0], [0], [1], [0, 0, 1, 1], [], []>} : vector<8x1152xbf16>, vector<1152x256xbf16>, vector<8x256xf32> -> vector<8x256xf32>
    %c0_284 = arith.constant 0 : index
    %c0_285 = arith.constant 0 : index
    %234 = vector.load %arg7[%c0_284, %c0_285] : memref<1x256xf32, #tpu.memory_space<vmem>>, vector<1x256xf32>
    %235 = vector.broadcast %234 : vector<1x256xf32> to vector<8x256xf32>
    %236 = arith.addf %233, %235 : vector<8x256xf32>
    %cst_286 = arith.constant 0.000000e+00 : f32
    %237 = vector.broadcast %cst_286 : f32 to vector<8x256xf32>
    %238 = arith.maximumf %236, %237 : vector<8x256xf32>
    %239 = arith.truncf %238 : vector<8x256xf32> to vector<8x256xbf16>
    %240 = vector.extract_strided_slice %239 {offsets = [0, 0], sizes = [4, 256], strides = [1, 1]} : vector<8x256xbf16> to vector<4x256xbf16>
    %c1_287 = arith.constant 1 : index
    %c1_288 = arith.constant 1 : index
    %c0_289 = arith.constant 0 : index
    %241 = vector.load %arg13[%c1_287, %c1_288, %c0_289] : memref<4x6x256xbf16, #tpu.memory_space<vmem>>, vector<1x4x256xbf16>
    %242 = vector.shape_cast %241 : vector<1x4x256xbf16> to vector<4x256xbf16>
    %243 = vector.shape_cast %240 : vector<4x256xbf16> to vector<1x4x256xbf16>
    tpu.vector_store %arg13[%c1_287, %c1_288, %c0_289], %243 {strides = array<i32>} : memref<4x6x256xbf16, #tpu.memory_space<vmem>>, vector<1x4x256xbf16>,
    %244 = vector.extract_strided_slice %239 {offsets = [4, 0], sizes = [4, 256], strides = [1, 1]} : vector<8x256xbf16> to vector<4x256xbf16>
    %c2_290 = arith.constant 2 : index
    %c1_291 = arith.constant 1 : index
    %c0_292 = arith.constant 0 : index
    %245 = vector.load %arg13[%c2_290, %c1_291, %c0_292] : memref<4x6x256xbf16, #tpu.memory_space<vmem>>, vector<1x4x256xbf16>
    %246 = vector.shape_cast %245 : vector<1x4x256xbf16> to vector<4x256xbf16>
    %247 = vector.shape_cast %244 : vector<4x256xbf16> to vector<1x4x256xbf16>
    tpu.vector_store %arg13[%c2_290, %c1_291, %c0_292], %247 {strides = array<i32>} : memref<4x6x256xbf16, #tpu.memory_space<vmem>>, vector<1x4x256xbf16>,
    %c0_293 = arith.constant 0 : index
    %c0_294 = arith.constant 0 : index
    %c0_295 = arith.constant 0 : index
    %248 = vector.load %arg13[%c0_293, %c0_294, %c0_295] : memref<4x6x256xbf16, #tpu.memory_space<vmem>>, vector<1x4x256xbf16>
    %249 = vector.shape_cast %248 : vector<1x4x256xbf16> to vector<4x256xbf16>
    %c0_296 = arith.constant 0 : index
    %c0_297 = arith.constant 0 : index
    %250 = vector.load %arg16[%c0_296, %c0_297] : memref<4x2304xbf16, #tpu.memory_space<vmem>>, vector<4x256xbf16>
    tpu.vector_store %arg16[%c0_296, %c0_297], %249 {strides = array<i32>} : memref<4x2304xbf16, #tpu.memory_space<vmem>>, vector<4x256xbf16>,
    %c0_298 = arith.constant 0 : index
    %c1_299 = arith.constant 1 : index
    %c0_300 = arith.constant 0 : index
    %251 = vector.load %arg13[%c0_298, %c1_299, %c0_300] : memref<4x6x256xbf16, #tpu.memory_space<vmem>>, vector<1x4x256xbf16>
    %252 = vector.shape_cast %251 : vector<1x4x256xbf16> to vector<4x256xbf16>
    %c0_301 = arith.constant 0 : index
    %c256_302 = arith.constant 256 : index
    %253 = vector.load %arg16[%c0_301, %c256_302] : memref<4x2304xbf16, #tpu.memory_space<vmem>>, vector<4x256xbf16>
    tpu.vector_store %arg16[%c0_301, %c256_302], %252 {strides = array<i32>} : memref<4x2304xbf16, #tpu.memory_space<vmem>>, vector<4x256xbf16>,
    %c0_303 = arith.constant 0 : index
    %c2_304 = arith.constant 2 : index
    %c0_305 = arith.constant 0 : index
    %254 = vector.load %arg13[%c0_303, %c2_304, %c0_305] : memref<4x6x256xbf16, #tpu.memory_space<vmem>>, vector<1x4x256xbf16>
    %255 = vector.shape_cast %254 : vector<1x4x256xbf16> to vector<4x256xbf16>
    %c0_306 = arith.constant 0 : index
    %c512_307 = arith.constant 512 : index
    %256 = vector.load %arg16[%c0_306, %c512_307] : memref<4x2304xbf16, #tpu.memory_space<vmem>>, vector<4x256xbf16>
    tpu.vector_store %arg16[%c0_306, %c512_307], %255 {strides = array<i32>} : memref<4x2304xbf16, #tpu.memory_space<vmem>>, vector<4x256xbf16>,
    %c1_308 = arith.constant 1 : index
    %c0_309 = arith.constant 0 : index
    %c0_310 = arith.constant 0 : index
    %257 = vector.load %arg13[%c1_308, %c0_309, %c0_310] : memref<4x6x256xbf16, #tpu.memory_space<vmem>>, vector<1x4x256xbf16>
    %258 = vector.shape_cast %257 : vector<1x4x256xbf16> to vector<4x256xbf16>
    %c0_311 = arith.constant 0 : index
    %c768_312 = arith.constant 768 : index
    %259 = vector.load %arg16[%c0_311, %c768_312] : memref<4x2304xbf16, #tpu.memory_space<vmem>>, vector<4x256xbf16>
    tpu.vector_store %arg16[%c0_311, %c768_312], %258 {strides = array<i32>} : memref<4x2304xbf16, #tpu.memory_space<vmem>>, vector<4x256xbf16>,
    %c1_313 = arith.constant 1 : index
    %c1_314 = arith.constant 1 : index
    %c0_315 = arith.constant 0 : index
    %260 = vector.load %arg13[%c1_313, %c1_314, %c0_315] : memref<4x6x256xbf16, #tpu.memory_space<vmem>>, vector<1x4x256xbf16>
    %261 = vector.shape_cast %260 : vector<1x4x256xbf16> to vector<4x256xbf16>
    %c0_316 = arith.constant 0 : index
    %c1024_317 = arith.constant 1024 : index
    %262 = vector.load %arg16[%c0_316, %c1024_317] : memref<4x2304xbf16, #tpu.memory_space<vmem>>, vector<4x256xbf16>
    tpu.vector_store %arg16[%c0_316, %c1024_317], %261 {strides = array<i32>} : memref<4x2304xbf16, #tpu.memory_space<vmem>>, vector<4x256xbf16>,
    %c1_318 = arith.constant 1 : index
    %c2_319 = arith.constant 2 : index
    %c0_320 = arith.constant 0 : index
    %263 = vector.load %arg13[%c1_318, %c2_319, %c0_320] : memref<4x6x256xbf16, #tpu.memory_space<vmem>>, vector<1x4x256xbf16>
    %264 = vector.shape_cast %263 : vector<1x4x256xbf16> to vector<4x256xbf16>
    %c0_321 = arith.constant 0 : index
    %c1280 = arith.constant 1280 : index
    %265 = vector.load %arg16[%c0_321, %c1280] : memref<4x2304xbf16, #tpu.memory_space<vmem>>, vector<4x256xbf16>
    tpu.vector_store %arg16[%c0_321, %c1280], %264 {strides = array<i32>} : memref<4x2304xbf16, #tpu.memory_space<vmem>>, vector<4x256xbf16>,
    %c2_322 = arith.constant 2 : index
    %c0_323 = arith.constant 0 : index
    %c0_324 = arith.constant 0 : index
    %266 = vector.load %arg13[%c2_322, %c0_323, %c0_324] : memref<4x6x256xbf16, #tpu.memory_space<vmem>>, vector<1x4x256xbf16>
    %267 = vector.shape_cast %266 : vector<1x4x256xbf16> to vector<4x256xbf16>
    %c0_325 = arith.constant 0 : index
    %c1536 = arith.constant 1536 : index
    %268 = vector.load %arg16[%c0_325, %c1536] : memref<4x2304xbf16, #tpu.memory_space<vmem>>, vector<4x256xbf16>
    tpu.vector_store %arg16[%c0_325, %c1536], %267 {strides = array<i32>} : memref<4x2304xbf16, #tpu.memory_space<vmem>>, vector<4x256xbf16>,
    %c2_326 = arith.constant 2 : index
    %c1_327 = arith.constant 1 : index
    %c0_328 = arith.constant 0 : index
    %269 = vector.load %arg13[%c2_326, %c1_327, %c0_328] : memref<4x6x256xbf16, #tpu.memory_space<vmem>>, vector<1x4x256xbf16>
    %270 = vector.shape_cast %269 : vector<1x4x256xbf16> to vector<4x256xbf16>
    %c0_329 = arith.constant 0 : index
    %c1792 = arith.constant 1792 : index
    %271 = vector.load %arg16[%c0_329, %c1792] : memref<4x2304xbf16, #tpu.memory_space<vmem>>, vector<4x256xbf16>
    tpu.vector_store %arg16[%c0_329, %c1792], %270 {strides = array<i32>} : memref<4x2304xbf16, #tpu.memory_space<vmem>>, vector<4x256xbf16>,
    %c2_330 = arith.constant 2 : index
    %c2_331 = arith.constant 2 : index
    %c0_332 = arith.constant 0 : index
    %272 = vector.load %arg13[%c2_330, %c2_331, %c0_332] : memref<4x6x256xbf16, #tpu.memory_space<vmem>>, vector<1x4x256xbf16>
    %273 = vector.shape_cast %272 : vector<1x4x256xbf16> to vector<4x256xbf16>
    %c0_333 = arith.constant 0 : index
    %c2048 = arith.constant 2048 : index
    %274 = vector.load %arg16[%c0_333, %c2048] : memref<4x2304xbf16, #tpu.memory_space<vmem>>, vector<4x256xbf16>
    tpu.vector_store %arg16[%c0_333, %c2048], %273 {strides = array<i32>} : memref<4x2304xbf16, #tpu.memory_space<vmem>>, vector<4x256xbf16>,
    %c0_334 = arith.constant 0 : index
    %c0_335 = arith.constant 0 : index
    %275 = vector.load %arg16[%c0_334, %c0_335] : memref<4x2304xbf16, #tpu.memory_space<vmem>>, vector<4x2304xbf16>
    %c0_336 = arith.constant 0 : index
    %c0_337 = arith.constant 0 : index
    %276 = vector.load %arg8[%c0_336, %c0_337] : memref<2304x256xbf16, #tpu.memory_space<vmem>>, vector<2304x256xbf16>
    %cst_338 = arith.constant dense<0.000000e+00> : vector<4x256xf32>
    %277 = tpu.matmul %275, %276, %cst_338 {dimension_numbers = #tpu.dot_dimension_numbers<[1], [0], [0], [1], [0, 0, 1, 1], [], []>} : vector<4x2304xbf16>, vector<2304x256xbf16>, vector<4x256xf32> -> vector<4x256xf32>
    %c0_339 = arith.constant 0 : index
    %c0_340 = arith.constant 0 : index
    %278 = vector.load %arg9[%c0_339, %c0_340] : memref<1x256xf32, #tpu.memory_space<vmem>>, vector<1x256xf32>
    %279 = vector.broadcast %278 : vector<1x256xf32> to vector<4x256xf32>
    %280 = arith.addf %277, %279 : vector<4x256xf32>
    %cst_341 = arith.constant 0.000000e+00 : f32
    %281 = vector.broadcast %cst_341 : f32 to vector<4x256xf32>
    %282 = arith.maximumf %280, %281 : vector<4x256xf32>
    %cst_342 = arith.constant 1.000000e+00 : f32
    %283 = vector.broadcast %cst_342 : f32 to vector<4x256xf32>
    %284 = arith.mulf %282, %283 : vector<4x256xf32>
    %c0_343 = arith.constant 0 : index
    %c0_344 = arith.constant 0 : index
    %c0_345 = arith.constant 0 : index
    %285 = vector.load %arg10[%c0_343, %c0_344, %c0_345] : memref<1x4x256xf32, #tpu.memory_space<vmem>>, vector<1x4x256xf32>
    %286 = vector.shape_cast %285 : vector<1x4x256xf32> to vector<4x256xf32>
    %287 = vector.shape_cast %284 : vector<4x256xf32> to vector<1x4x256xf32>
    tpu.vector_store %arg10[%c0_343, %c0_344, %c0_345], %287 {strides = array<i32>} : memref<1x4x256xf32, #tpu.memory_space<vmem>>, vector<1x4x256xf32>,
    return
  }
  func.func @transform_0(%arg0: i32) -> (i32, i32, i32) {
    %c0_i32 = arith.constant 0 : i32
    %c0_i32_0 = arith.constant 0 : i32
    %c0_i32_1 = arith.constant 0 : i32
    return %arg0, %c0_i32, %c0_i32_0 : i32, i32, i32
  }
  func.func @transform_1(%arg0: i32) -> (i32, i32) {
    %c0_i32 = arith.constant 0 : i32
    %c0_i32_0 = arith.constant 0 : i32
    %c0_i32_1 = arith.constant 0 : i32
    return %c0_i32, %c0_i32_0 : i32, i32
  }
  func.func @transform_2(%arg0: i32) -> (i32, i32) {
    %c0_i32 = arith.constant 0 : i32
    %c0_i32_0 = arith.constant 0 : i32
    %c0_i32_1 = arith.constant 0 : i32
    return %c0_i32, %c0_i32_0 : i32, i32
  }
  func.func @transform_3(%arg0: i32) -> (i32, i32) {
    %c0_i32 = arith.constant 0 : i32
    %c0_i32_0 = arith.constant 0 : i32
    %c0_i32_1 = arith.constant 0 : i32
    return %c0_i32, %c0_i32_0 : i32, i32
  }
  func.func @transform_4(%arg0: i32) -> (i32, i32) {
    %c0_i32 = arith.constant 0 : i32
    %c0_i32_0 = arith.constant 0 : i32
    %c0_i32_1 = arith.constant 0 : i32
    return %c0_i32, %c0_i32_0 : i32, i32
  }
  func.func @transform_5(%arg0: i32) -> (i32, i32) {
    %c0_i32 = arith.constant 0 : i32
    %c0_i32_0 = arith.constant 0 : i32
    %c0_i32_1 = arith.constant 0 : i32
    return %c0_i32, %c0_i32_0 : i32, i32
  }
  func.func @transform_6(%arg0: i32) -> (i32, i32) {
    %c0_i32 = arith.constant 0 : i32
    %c0_i32_0 = arith.constant 0 : i32
    %c0_i32_1 = arith.constant 0 : i32
    return %c0_i32, %c0_i32_0 : i32, i32
  }
  func.func @transform_7(%arg0: i32) -> (i32, i32) {
    %c0_i32 = arith.constant 0 : i32
    %c0_i32_0 = arith.constant 0 : i32
    %c0_i32_1 = arith.constant 0 : i32
    return %c0_i32, %c0_i32_0 : i32, i32
  }
  func.func @transform_8(%arg0: i32) -> (i32, i32) {
    %c0_i32 = arith.constant 0 : i32
    %c0_i32_0 = arith.constant 0 : i32
    %c0_i32_1 = arith.constant 0 : i32
    return %c0_i32, %c0_i32_0 : i32, i32
  }
  func.func @transform_9(%arg0: i32) -> (i32, i32, i32) {
    %c0_i32 = arith.constant 0 : i32
    %c0_i32_0 = arith.constant 0 : i32
    %c0_i32_1 = arith.constant 0 : i32
    return %arg0, %c0_i32, %c0_i32_0 : i32, i32, i32
  }
}

</mosaic_0001>

<bundles_post_ra>
// kernel: cnn_feature_extractor.1
= control target key start
LH: loop header
LB: loop body
LE: loop exit
PB: predicated region body
PF: predicated region fallthrough
CT: control target
= control target key end

     0   :  { %14 = vsyncpa [#allocation9], 0  ;;  %s8687_s0 = inlined_call_operand.vmem [shape: bf16[2,64,72], index: 0, kind: input, shape index: {}]   ;;  %s8688_s1 = inlined_call_operand.vmem [shape: bf16[72,64], index: 1, kind: input, shape index: {}]   ;;  %s8689_s2 = inlined_call_operand.vmem [shape: f32[1,64], index: 2, kind: input, shape index: {}]   ;;  %s8690_s3 = inlined_call_operand.vmem [shape: bf16[768,128], index: 3, kind: input, shape index: {}]   ;;  %s8691_s4 = inlined_call_operand.vmem [shape: f32[1,128], index: 4, kind: input, shape index: {}]   ;;  %s8692_s5 = inlined_call_operand.vmem [shape: bf16[1152,256], index: 5, kind: input, shape index: {}]   ;;  %s8693_s6 = inlined_call_operand.vmem [shape: f32[1,256], index: 6, kind: input, shape index: {}]   ;;  %s8694_s7 = inlined_call_operand.vmem [shape: bf16[2304,256], index: 7, kind: input, shape index: {}]   ;;  %s8695_s8 = inlined_call_operand.vmem [shape: f32[1,256], index: 8, kind: input, shape index: {}]   ;;  %s8696_s9 = inlined_call_operand.hbm [shape: f32[2,4,256], index: 9, kind: output, shape index: {}]  }
   0x1   :  { %16 = vsyncpa [#allocation9 + $0x1], 0  ;;  %s6872_s30 = smov 0   ;;  %s6874_s10 = smov 0  }
   0x2   :  { %s6876_s11 = smov 0   ;;  %s6878_s12 = smov 0  }
   0x3 LB: > { %s6893_s13 = sadd.s32 4294967295, %s6816_s12   ;;  %s5252_s14 = sadd.s32 4294967294, %s6816_s12   ;;  %s6816_s12 = sphi %s6878_s12, %s8712_s12   ;;  %s6812_s11 = sphi %s6876_s11, %s8711_s11   ;;  %s6808_s10 = sphi %s6874_s10, %s8710_s10   ;;  %s6804_s30 = sphi %s6872_s30, %s8709_s30  }
   0x4   : > { %s6897_s15 = sadd.s32 1, %s6816_s12   ;;  %s223_s16 = sadd.s32 1, %s6812_s11 }
   0x5   : > { %s220_s17 = ssub.s32 %s6816_s12, %s6897_s15  ;;  %p233_p0 = scmp.ne.s32.totalorder %s6812_s11, %s6808_s10 }
   0x6   : > { %p221_p1 = scmp.eq.s32.totalorder %s220_s17, 0  ;;  %p234_p2 = scmp.eq.s32.totalorder %s6893_s13, 1 }
   0x7   : > { %p239_p3 = scmp.ne.s32.totalorder %s6808_s10, %s6804_s30  ;;  %p240_p4 = scmp.eq.s32.totalorder %s5252_s14, 1 }
   0x8   : > { %s6908_s18 = scalar_select %p221_p1, %s6812_s11, %s223_s16  }
   0x9   : > { %p6910_p5 = por %p234_p2, %p233_p0  ;;  %p6914_p6 = por %p240_p4, %p239_p3 }
   0xa   : > { %p5255_p7 = scmp.ge.s32.totalorder %s6816_s12, 1  ;;  %p290_p8 = scmp.lt.s32.totalorder %s6816_s12, 3 }
   0xc   : > { %p291_p9 = pnand %p5255_p7, %p290_p8 }
   0xd   : > { %v6015_v0 = vld [vmem:[%s8688_s1] sm:$0xff] (!%p291_p9)   ;;  %v6016_v1 = vld [vmem:[%s8688_s1 + $0x8] sm:$0xff] (!%p291_p9)   ;;  %p326_p10 = scmp.lt.s32.totalorder (!%p291_p9), %s6893_s13, 1  ;;  %v6017_v2 = vld [vmem:[%s8688_s1 + $0x10] sm:$0xff] (!%p291_p9)   ;;  %vm446_vm0 = vcmask (!%p291_p9), 588800   ;;  %vm459_vm1 = vcmask (!%p291_p9), 1043456  }
   0xe   : > { %294 = sbr.rel (%p291_p9) target bundleno = 1793 (0x701), region = 56  ;;  %5904 = vmatprep.subr.bf16.mxu0 (!%p291_p9), %v6015_v0  ;;  %v6019_v3 = vld [vmem:[%s8688_s1 + $0x20] ss:$0 sps:$4 sm:$0xff] (!%p291_p9)   ;;  %v6018_v5 = vld [vmem:[%s8688_s1 + $0x18] sm:$0xff] (!%p291_p9)   ;;  %vm332_vm2 = vcmask (!%p291_p9), 1042432   ;;  %v6026_v38 = vld [vmem:[%s8690_s3 + $0x48] sm:$0xff] (!%p291_p9)  }
   0xf   : > { %5905 = vmatpush3.bf16.msra.mxu0 (!%p291_p9), %v6015_v0  ;;  %v461_v6 = vsel (!%p291_p9), %vm459_vm1, %v6019_v3, 0  ;;  %vm333_vm3 = vsmask.f32 (!%p291_p9), 2304  ;;  %v335_v10 = vld [vmem:[#allocation2] sm:$0x7] (!%p291_p9)  ;;  %s6818_s17 = smov (!%p291_p9), 64  }
  0x10   : > { %5906 = vmatprep.subr.bf16.mxu0 (!%p291_p9), %v6016_v1  ;;  %vm6945_vm4 = vmand (!%p291_p9), %vm332_vm2, %vm333_vm3  ;;  %v341_v12 = vld [vmem:[#allocation2 + $0x8] sm:$0x7] (!%p291_p9)  ;;  %v362_v13 = vld [vmem:[#allocation2 + $0x24] sm:$0x7] (!%p291_p9)  ;;  %vm547_vm5 = vcmask (!%p291_p9), 1041920   ;;  %vm559_vm6 = vcmask (!%p291_p9), 518144  }
  0x11   : > { %v336_v14 = vsel (!%p291_p9), %vm6945_vm4, 0, %v335_v10  ;;  %v342_v15 = vsel (!%p291_p9), %vm6945_vm4, 0, %v341_v12  ;;  %v363_v16 = vsel (!%p291_p9), %vm6945_vm4, 0, %v362_v13  ;;  %v347_v18 = vld [vmem:[#allocation2 + $0x10] sm:$0x7] (!%p291_p9)  ;;  %v6024_v30 = vld [vmem:[%s8690_s3 + $0x40] sm:$0xff] (!%p291_p9)  }
  0x12   : > { %337 = vst [vmem:[#allocation2] sm:$0x7] (!%p291_p9), %v336_v14  ;;  %343 = vst [vmem:[#allocation2 + $0x8] sm:$0x7] (!%p291_p9), %v342_v15  ;;  %v348_v20 = vsel (!%p291_p9), %vm6945_vm4, 0, %v347_v18  ;;  %v6025_v32 = vld [vmem:[%s8690_s3] sm:$0xff] (!%p291_p9)  }
  0x13   : > { %5907 = vmatpush3.bf16.msra.mxu0 (!%p291_p9), %v6016_v1  ;;  %364 = vst [vmem:[#allocation2 + $0x24] sm:$0x7] (!%p291_p9), %v363_v16  ;;  %349 = vst [vmem:[#allocation2 + $0x10] sm:$0x7] (!%p291_p9), %v348_v20  ;;  %v6960_v22 = vld [vmem:[%s8689_s2] ss:$0 sm:$0xff] (!%p291_p9) }
  0x14   : > { %5908 = vmatprep.subr.bf16.mxu0 (!%p291_p9), %v6017_v2  ;;  %v353_v26 = vld [vmem:[#allocation2 + $0x18] sm:$0x7] (!%p291_p9)  ;;  %v344_v27 = vld [vmem:[#allocation2 + $0xc] sm:$0x7] (!%p291_p9)  ;;  %v356_v45 = vld [vmem:[#allocation2 + $0x1c] sm:$0x7] (!%p291_p9) }
  0x15   : > { %s327_s27 = scalar_select %p326_p10, %s6893_s13, 1  ;;  %v354_v28 = vsel %vm6945_vm4, 0, %v353_v26  ;;  %v345_v29 = vsel %vm6945_vm4, 0, %v344_v27  ;;  %v6027_v40 = vld [vmem:[%s8690_s3 + $0x8] sm:$0xff]   ;;  %v338_v46 = vld [vmem:[#allocation2 + $0x4] sm:$0x7] }
  0x16   : > { %355 = vst [vmem:[#allocation2 + $0x18] sm:$0x7] %v354_v28  ;;  %346 = vst [vmem:[#allocation2 + $0xc] sm:$0x7] %v345_v29  ;;  %v6028_v47 = vld [vmem:[%s8690_s3 + $0x50] sm:$0xff]   ;;  %v357_v52 = vsel %vm6945_vm4, 0, %v356_v45 }
  0x17   : > { %s5816_s14 = sshll.u32 %s327_s27, 5  ;;  %5909 = vmatpush3.bf16.msra.mxu0 %v6017_v2  ;;  %v350_v50 = vld [vmem:[#allocation2 + $0x14] sm:$0x7]  ;;  %358 = vst [vmem:[#allocation2 + $0x1c] sm:$0x7] %v357_v52  ;;  %v339_v56 = vsel %vm6945_vm4, 0, %v338_v46 }
  0x18   : > { %s330_s21 = scalar_lea.vmem %s8687_s0, %s5816_s14  ;;  %5910 = vmatprep.subr.bf16.mxu0 %v6018_v5  ;;  %v6029_v51 = vld [vmem:[%s8690_s3 + $0x10] sm:$0xff]   ;;  %v359_v57 = vld [vmem:[#allocation2 + $0x20] sm:$0x7]  ;;  %340 = vst [vmem:[#allocation2 + $0x4] sm:$0x7] %v339_v56  ;;  %v351_v58 = vsel %vm6945_vm4, 0, %v350_v50 }
  0x19   : > { %v6020_v4 = vld [vmem:[%s330_s21] sm:$0xff]   ;;  %v6021_v7 = vld [vmem:[%s330_s21 + $0x8] sm:$0xff]   ;;  %v6022_v8 = vld [vmem:[%s330_s21 + $0x10] sm:$0xff]   ;;  %352 = vst [vmem:[#allocation2 + $0x14] sm:$0x7] %v351_v58  ;;  %v360_v63 = vsel %vm6945_vm4, 0, %v359_v57 }
  0x1a   : > { %5914 = vmatprep.mubr.msk.bf16.mxu0 %vm446_vm0, %v6020_v4  ;;  %v6023_v9 = vld [vmem:[%s330_s21 + $0x18] sm:$0xff]   ;;  %v6032_v1 = vld [vmem:[%s8690_s3 + $0x140] sm:$0xff]   ;;  %361 = vst [vmem:[#allocation2 + $0x20] sm:$0x7] %v360_v63  ;;  %v6037_v10 = vld [vmem:[%s8690_s3 + $0x108] sm:$0xff]   ;;  %vm2839_vm10 = vcmask 1040384  }
  0x1b   : > { %5911 = vmatpush3.bf16.msra.mxu0 %v6018_v5  ;;  %v6030_v59 = vld [vmem:[%s8690_s3 + $0x58] sm:$0xff]   ;;  %v6033_v2 = vld [vmem:[%s8690_s3 + $0x100] sm:$0xff]   ;;  %5882 = vmatprep.subr.bf16.mxu1 %v6032_v1  ;;  %v6038_v12 = vld [vmem:[%s8690_s3 + $0x68] sm:$0xff]   ;;  %vm560_vm7 = vsmask.f32 2306  ;;  %vm2840_vm11 = vcmask 1042434  }
  0x1c   : > { %5972 = vmatprep.subr.msk.bf16.mxu0 %vm459_vm1, %v6019_v3  ;;  %v6031_v0 = vld [vmem:[%s8690_s3 + $0x18] sm:$0xff]   ;;  %v6034_v4 = vld [vmem:[%s8690_s3 + $0x60] sm:$0xff]   ;;  %5883 = vmatpush3.bf16.msra.mxu1 %v6033_v2  ;;  %v6039_v16 = vld [vmem:[%s8690_s3 + $0x28] sm:$0xff]   ;;  %vm2842_vm13 = vcmask 1044484   ;;  %vm2844_vm14 = vcmask 1046534   ;;  %vm2769_vm1 = vcmask 1046532  }
  0x1d   : > { %v6050_v11 = vld [vmem:[#allocation2] ss:$0 sps:$4 sm:$0x77]   ;;  %v6045_v28 = vld [vmem:[%s8690_s3 + $0x118] sm:$0xff]   ;;  %vm7127_vm8 = vmand %vm559_vm6, %vm560_vm7  ;;  %vm2807_vm6 = vsmask.f32 3336 }
  0x1e   : > { %v717_v13 = vshll.u32 %v6050_v11, 16  ;;  %v708_v18 = vld [vmem:[#allocation2] sm:$0x3]  ;;  %v715_v20 = vshrl.u32 %v6050_v11, 16  ;;  %vm7316_vm9 = vmand %vm332_vm2, %vm560_vm7  ;;  %vm2770_vm2 = vsmask.f32 6418 }
  0x1f   : > { %5913 = vmatpush3.bf16.msra.mxu0 %v461_v6  ;;  %709 = vst [vmem:[#allocation5] sm:$0x3] %v708_v18  ;;  %v6048_v29 = vld [vmem:[%s8690_s3 + $0x160] sm:$0xff]   ;;  %vm2841_vm12 = vmor %vm2839_vm10, %vm2840_vm11  ;;  %s5828_s26 = sshll.u32 %s6893_s13, 7  ;;  %s6821_s13 = smov [#allocation8]  }
  0x20   : > { %5838 = vmatprep.subr.bf16.mxu0 %v6024_v30  ;;  %v6047_v30 = vld [vmem:[%s8690_s3 + $0x38] sm:$0xff]   ;;  %vm2843_vm15 = vmor %vm2841_vm12, %vm2842_vm13  ;;  %s8645_s16 = scalar_lea.hbm %s8696_s9, %s5828_s26  ;;  %s6758_s23 = sshll.u32 %s6821_s13, 4  ;;  %s6759_s23 = int_to_ptr.vmem [resolvable:$false] %s6758_s23 }
  0x21   : > { %vm2771_vm3 = vmand %vm2769_vm1, %vm2770_vm2  ;;  %s6760_s24 = scalar_lea.vmem %s6759_s23, 256 }
  0x22   : > { %5915 = vmatmul.mubr.msk.bf16.vlgmr.msra.gmra.mrb[0].mxu0 %vm446_vm0, %v6021_v7  ;;  %vm2772_vm4 = vmor %vm2771_vm3, %vm7316_vm9 }
  0x23   : > { %5918 = vmatprep.mubr.msk.bf16.mxu0 %vm446_vm0, %v6022_v8  ;;  %5839 = vmatpush3.bf16.msra.mxu0 %v6025_v32  ;;  %v6035_v8 = vld [vmem:[%s8690_s3 + $0x20] sm:$0xff]  }
  0x24   : > { %5840 = vmatprep.subr.bf16.mxu0 %v6026_v38  ;;  %v6054_v32 = vld [vmem:[%s8690_s3 + $0xc0] sm:$0xff]   ;;  %v6071_v38 = vld [vmem:[%s8690_s3 + $0x178] sm:$0xff]  }
  0x27   : > { %5841 = vmatpush3.bf16.msra.mxu0 %v6027_v40 }
  0x28   : > { %5842 = vmatprep.subr.bf16.mxu0 %v6028_v47 }
  0x2a   : > { %5919 = vmatmul.mubr.msk.bf16.gmra.mrb[4].mxu0 %vm446_vm0, %v6023_v9  ;;  %v6036_v9 = vld [vmem:[%s8690_s3 + $0x148] sm:$0xff]   ;;  %vm7755_vm0 = vmor %vm2843_vm15, %vm2844_vm14 }
  0x2b   : > { %5843 = vmatpush3.bf16.msra.mxu0 %v6029_v51  ;;  %5884 = vmatprep.subr.bf16.mxu1 %v6036_v9 }
  0x2c   : > { %5844 = vmatprep.subr.bf16.mxu0 %v6030_v59  ;;  %5885 = vmatpush3.bf16.msra.mxu1 %v6037_v10 }
  0x2f   : > { %5845 = vmatpush3.bf16.msra.mxu0 %v6031_v0 }
  0x30   : > { %5846 = vmatprep.subr.bf16.mxu0 %v6034_v4 }
  0x33   : > { %5847 = vmatpush3.bf16.msra.mxu0 %v6035_v8 }
  0x34   : > { %5848 = vmatprep.subr.bf16.mxu0 %v6038_v12 }
  0x37   : > { %5849 = vmatpush3.bf16.msra.mxu0 %v6039_v16 }
  0xf5   : > { %v5916_v17 = vpop.f32.mrb[0].mxu0 }
  0xf6   : > { %v497_v19 = vpop.f32.mrb[1].mxu0  ;;  %v506_v33 = vadd.f32 %v5916_v17, %v6960_v22  ;;  %v6040_v17 = vld [vmem:[%s8690_s3 + $0x150] sm:$0xff]  }
  0xf7   : > { %v5917_v21 = vpop.f32.mrb[2].mxu0  ;;  %v498_v48 = vadd.f32 %v6960_v22, %v497_v19  ;;  %v6041_v19 = vld [vmem:[%s8690_s3 + $0x110] sm:$0xff]   ;;  %5886 = vmatprep.subr.bf16.mxu1 %v6040_v17 }
  0xf8   : > { %v500_v23 = vpop.f32.mrb[3].mxu0  ;;  %v509_v24 = vadd.f32 %v5917_v21, %v6960_v22  ;;  %v530_v42 = vmax.f32 %v506_v33, 0.0  ;;  %v719_v21 = vrot.slane %v717_v13, 1  ;;  %5887 = vmatpush3.bf16.msra.mxu1 %v6041_v19  ;;  %v6059_v33 = vld [vmem:[%s8690_s3 + $0x168] sm:$0xff]  }
  0xf9   : > { %v501_v25 = vadd.f32 %v6960_v22, %v500_v23  ;;  %v528_v60 = vmax.f32 %v498_v48, 0.0  ;;  %v6043_v23 = vld [vmem:[%s8690_s3 + $0x30] sm:$0xff]  }
  0xfa   : > { %v531_v34 = vmax.f32 %v509_v24, 0.0  ;;  %v7000_v53 = vpack.c.bf16 %v530_v42, %v530_v42  ;;  %v6044_v24 = vld [vmem:[%s8690_s3 + $0x158] sm:$0xff]   ;;  %v720_v26 = vor.u32 %v719_v21, %v715_v20 }
  0xfb   : > { %v529_v31 = vmax.f32 %v501_v25, 0.0  ;;  %v7032_v5 = vpack.c.bf16 %v528_v60, %v528_v60  ;;  %v6046_v25 = vld [vmem:[%s8690_s3 + $0x78] sm:$0xff]   ;;  %5888 = vmatprep.subr.bf16.mxu1 %v6044_v24 }
  0xfc   : > { %v6985_v43 = vpack.c.bf16 %v531_v34, %v531_v34  ;;  %722 = vst [vmem:[#allocation5 + $0x8] sm:$0x3] %v720_v26  ;;  %5889 = vmatpush3.bf16.msra.mxu1 %v6045_v28  ;;  %v6060_v34 = vld [vmem:[%s8690_s3 + $0x128] sm:$0xff]   ;;  %v594_v48 = vshrl.u32 %v7000_v53, 16 }
  0xfd   : > { %v6975_v35 = vpack.c.bf16 %v529_v31, %v529_v31  ;;  %v5920_v36 = vpop.f32.mrb[4].mxu0  ;;  %v6049_v31 = vld [vmem:[%s8690_s3 + $0x120] sm:$0xff]   ;;  %5890 = vmatprep.subr.bf16.mxu1 %v6048_v29  ;;  %v550_v50 = vshrl.u32 %v7032_v5, 16  ;;  %v553_v51 = vshll.u32 %v7032_v5, 16 }
  0xfe   : > { %v513_v37 = vpop.f32.mrb[5].mxu0  ;;  %v522_v44 = vadd.f32 %v5920_v36, %v6960_v22  ;;  %v6063_v36 = vld [vmem:[%s8690_s3 + $0x170] sm:$0xff]   ;;  %v614_v42 = vshrl.u32 %v6985_v43, 16  ;;  %v596_v57 = vrot.slane %v594_v48, 5 }
  0xff   : > { %v5921_v39 = vpop.f32.mrb[6].mxu0  ;;  %567 = vrot.lane.b32.xlu0 %v6975_v35, %s6818_s17  ;;  %v514_v61 = vadd.f32 %v6960_v22, %v513_v37  ;;  %v6064_v37 = vld [vmem:[%s8690_s3 + $0x130] sm:$0xff]   ;;  %v573_v40 = vshrl.u32 %v6975_v35, 16  ;;  %v552_v59 = vrot.slane %v550_v50, 5  ;;  %v555_v60 = vrot.slane %v553_v51, 6 }
 0x100   : > { %v516_v41 = vpop.f32.mrb[7].mxu0  ;;  %v534_v54 = vmax.f32 %v522_v44, 0.0  ;;  %v525_v7 = vadd.f32 %v5921_v39, %v6960_v22  ;;  %5891 = vmatpush3.bf16.msra.mxu1 %v6049_v31  ;;  %v6072_v39 = vld [vmem:[%s8690_s3 + $0x138] sm:$0xff]   ;;  %v617_v44 = vshll.u32 %v6985_v43, 16 }
 0x101   : > { %v517_v49 = vadd.f32 %v6960_v22, %v516_v41  ;;  %v532_v6 = vmax.f32 %v514_v61, 0.0  ;;  %v6042_v22 = vld [vmem:[%s8690_s3 + $0x70] sm:$0xff]   ;;  %5892 = vmatprep.subr.bf16.mxu1 %v6059_v33  ;;  %v576_v41 = vshll.u32 %v6975_v35, 16  ;;  %v575_v45 = vrot.slane %v573_v40, 5 }
 0x102   : > { %v7025_v3 = vpack.c.bf16 %v534_v54, %v534_v54  ;;  %v535_v15 = vmax.f32 %v525_v7, 0.0  ;;  %5850 = vmatprep.subr.bf16.mxu0 %v6042_v22  ;;  %v616_v35 = vrot.slane %v614_v42, 5  ;;  %v619_v52 = vrot.slane %v617_v44, 6 }
 0x103   : > { %608 = vrot.lane.b32.xlu0 %v6985_v43, %s6818_s17  ;;  %v533_v55 = vmax.f32 %v517_v49, 0.0  ;;  %v7051_v14 = vpack.c.bf16 %v532_v6, %v532_v6  ;;  %5851 = vmatpush3.bf16.msra.mxu0 %v6043_v23  ;;  %v578_v46 = vrot.slane %v576_v41, 6  ;;  %v597_v49 = vshll.u32 %v7000_v53, 16 }
 0x104   : > { %v7076_v27 = vpack.c.bf16 %v535_v15, %v535_v15  ;;  %5852 = vmatprep.subr.bf16.mxu0 %v6046_v25  ;;  %5893 = vmatpush3.bf16.msra.mxu1 %v6060_v34  ;;  %v620_v61 = vor.u32 %v619_v52, %v616_v35  ;;  %v676_v0 = vshrl.u32 %v7025_v3, 16  ;;  %v679_v1 = vshll.u32 %v7025_v3, 16 }
 0x105   : > { %v7010_v62 = vpack.c.bf16 %v533_v55, %v533_v55  ;;  %5894 = vmatprep.subr.bf16.mxu1 %v6063_v36  ;;  %v579_v54 = vor.u32 %v578_v46, %v575_v45  ;;  %v599_v58 = vrot.slane %v597_v49, 6  ;;  %v638_v2 = vshll.u32 %v7051_v14, 16 }
 0x106   : > { %v556_v11 = vor.u32 %v555_v60, %v552_v59  ;;  %v621_v12 = vrot.slane %v620_v61, 4  ;;  %v678_v13 = vrot.slane %v676_v0, 5  ;;  %v696_v16 = vshrl.u32 %v7076_v27, 16 }
 0x107   : > { %588 = vrot.lane.b32.xlu0 %v7000_v53, %s6818_s17  ;;  %649 = vrot.lane.b32.xlu1 %v7010_v62, %s6818_s17  ;;  %v655_v43 = vshrl.u32 %v7010_v62, 16  ;;  %v658_v56 = vshll.u32 %v7010_v62, 16  ;;  %v580_v63 = vrot.slane %v579_v54, 4  ;;  %v635_v62 = vshrl.u32 %v7051_v14, 16 }
 0x108   : > { %5853 = vmatpush3.bf16.msra.mxu0 %v6047_v30  ;;  %5895 = vmatpush3.bf16.msra.mxu1 %v6064_v37  ;;  %v600_v9 = vor.u32 %v599_v58, %v596_v57  ;;  %v699_v17 = vshll.u32 %v7076_v27, 16  ;;  %v557_v25 = vrot.slane %v556_v11, 4  ;;  %v698_v28 = vrot.slane %v696_v16, 5 }
 0x109   : > { %5860 = vmatprep.subr.bf16.mxu0 %v6054_v32  ;;  %5896 = vmatprep.subr.bf16.mxu1 %v6071_v38  ;;  %v657_v6 = vrot.slane %v655_v43, 5  ;;  %v660_v7 = vrot.slane %v658_v56, 6  ;;  %v637_v15 = vrot.slane %v635_v62, 5 }
 0x10a   : > { %v601_v23 = vrot.slane %v600_v9, 4  ;;  %v701_v29 = vrot.slane %v699_v17, 6 }
 0x10b   : > { %670 = vrot.lane.b32.xlu0 %v7025_v3, %s6818_s17  ;;  %543 = vrot.lane.b32.xlu1 %v7032_v5, %s6818_s17  ;;  %v681_v3 = vrot.slane %v679_v1, 6  ;;  %v661_v20 = vor.u32 %v660_v7, %v657_v6 }
 0x10c   : > { %5897 = vmatpush3.bf16.msra.mxu1 %v6072_v39  ;;  %v702_v59 = vor.u32 %v701_v29, %v698_v28 }
 0x10d   : > { %v682_v24 = vor.u32 %v681_v3, %v678_v13 }
 0x10e   : > { %v703_v9 = vrot.slane %v702_v59, 4 }
 0x10f   : > { %629 = vrot.lane.b32.xlu1 %v7051_v14, %s6818_s17  ;;  %v640_v14 = vrot.slane %v638_v2, 6  ;;  %v683_v36 = vrot.slane %v682_v24, 4 }
 0x111   : > { %v641_v26 = vor.u32 %v640_v14, %v637_v15 }
 0x113   : > { %690 = vrot.lane.b32.xlu1 %v7076_v27, %s6818_s17  ;;  %v662_v27 = vrot.slane %v661_v20, 4  ;;  %v642_v41 = vrot.slane %v641_v26, 4  ;;  %s323_s17 = sand.u32 1, %s6808_s10  }
 0x114   : > { %s5256_s25 = sshll.u32 %s323_s17, 3  ;;  %s5179_s21 = scalar_lea.sflag [#allocation9], %s323_s17 }
 0x115   : > { %s325_s27 = scalar_lea.vmem [#allocation8], %s5256_s25 }
 0x116   : > { %s5193_s28 = sshll.u32 %s325_s27, 4  ;;  %s8647_s28 = int_to_ptr.vmem [resolvable:$true] %s5193_s28 }
 0x117   : > { %s6754_s22 = scalar_lea.vmem %s8647_s28, 128  ;;  %p6761_p0 = scmp.lt.s32.totalorder %s8647_s28, %s6759_s23 }
 0x118   : > { %p6755_p11 = scmp.ne.s32.totalorder %s8647_s28, %s6754_s22  ;;  %p6762_p1 = scmp.lt.s32.totalorder %s6760_s24, %s6754_s22 }
 0x11a   : > { %p6756_p12 = pnand %p6755_p11, %p6910_p5  ;;  %p6763_p2 = por %p6762_p1, %p6761_p0 }
 0x11c   : > { %p6757_p13 = pneg %p6756_p12 }
 0x11e   : > { %p6764_p3 = pnand %p6763_p2, %p6757_p13 }
 0x171   : > { %v568_v47 = vpop.permute.xlu0 %567 }
 0x172   : > { %571 = vst.msk [vmem:[#allocation2 + $0x8] sm:$0x3] %vm547_vm5, %v568_v47 }
 0x175   : > { %v609_v55 = vpop.permute.xlu0 %608 }
 0x176   : > { %612 = vst.msk [vmem:[#allocation2 + $0x10] sm:$0x3] %vm547_vm5, %v609_v55 }
 0x179   : > { %v582_v4 = vld [vmem:[#allocation2 + $0x8] sm:$0x7]  ;;  %v589_v5 = vpop.permute.xlu0 %588  ;;  %v650_v10 = vpop.permute.xlu1 %649 }
 0x17a   : > { %v583_v8 = vsel %vm7127_vm8, %v580_v63, %v582_v4  ;;  %592 = vst.msk [vmem:[#allocation2 + $0xc] sm:$0x3] %vm547_vm5, %v589_v5  ;;  %653 = vst.msk [vmem:[#allocation2 + $0x18] sm:$0x3] %vm547_vm5, %v650_v10 }
 0x17b   : > { %584 = vst [vmem:[#allocation2 + $0x8] sm:$0x7] %v583_v8 }
 0x17d   : > { %v623_v18 = vld [vmem:[#allocation2 + $0x10] sm:$0x7]  ;;  %v671_v19 = vpop.permute.xlu0 %670  ;;  %v544_v22 = vpop.permute.xlu1 %543 }
 0x17e   : > { %v624_v21 = vsel %vm7127_vm8, %v621_v12, %v623_v18  ;;  %674 = vst.msk [vmem:[#allocation2 + $0x1c] sm:$0x3] %vm547_vm5, %v671_v19  ;;  %548 = vst.msk [vmem:[#allocation2 + $0x4] sm:$0x3] %vm547_vm5, %v544_v22 }
 0x17f   : > { %625 = vst [vmem:[#allocation2 + $0x10] sm:$0x7] %v624_v21 }
 0x181   : > { %v603_v30 = vld [vmem:[#allocation2 + $0xc] sm:$0x7]  ;;  %v664_v33 = vld [vmem:[#allocation2 + $0x18] sm:$0x7]  ;;  %v630_v34 = vpop.permute.xlu1 %629 }
 0x182   : > { %v604_v31 = vsel %vm7127_vm8, %v601_v23, %v603_v30  ;;  %v6051_v32 = vld [vmem:[#allocation2 + $0x8] ss:$0 sps:$4 sm:$0x77]   ;;  %v665_v37 = vsel %vm7127_vm8, %v662_v27, %v664_v33  ;;  %633 = vst.msk [vmem:[#allocation2 + $0x14] sm:$0x3] %vm547_vm5, %v630_v34 }
 0x183   : > { %605 = vst [vmem:[#allocation2 + $0xc] sm:$0x7] %v604_v31  ;;  %v765_v38 = vshrl.u32 %v6051_v32, 16  ;;  %v768_v39 = vshll.u32 %v6051_v32, 16  ;;  %666 = vst [vmem:[#allocation2 + $0x18] sm:$0x7] %v665_v37 }
 0x184   : > { %v6055_v40 = vld [vmem:[#allocation2 + $0x8] ss:$0 sps:$4 sm:$0x33]  }
 0x185   : > { %v685_v42 = vld [vmem:[#allocation2 + $0x1c] sm:$0x7]  ;;  %v6074_v44 = vld [vmem:[#allocation2 + $0x8] ss:$0 sps:$4 sm:$0x77]   ;;  %v767_v46 = vrot.slane %v765_v38, 6  ;;  %v691_v50 = vpop.permute.xlu1 %690 }
 0x186   : > { %v686_v45 = vsel %vm7127_vm8, %v683_v36, %v685_v42  ;;  %v770_v47 = vrot.slane %v768_v39, 7  ;;  %v757_v48 = vrot.slane %v6055_v40, 6  ;;  %v562_v49 = vld [vmem:[#allocation2 + $0x4] sm:$0x7]  ;;  %v745_v35 = vshrl.u32 %v6074_v44, 16 }
 0x187   : > { %687 = vst [vmem:[#allocation2 + $0x1c] sm:$0x7] %v686_v45  ;;  %v6052_v51 = vld [vmem:[#allocation2 + $0x10] ss:$0 sps:$4 sm:$0x77]   ;;  %v563_v52 = vsel %vm7127_vm8, %v557_v25, %v562_v49  ;;  %v747_v43 = vshll.u32 %v6074_v44, 16 }
 0x188   : > { %694 = vst.msk [vmem:[#allocation2 + $0x20] sm:$0x3] %vm547_vm5, %v691_v50  ;;  %v771_v54 = vor.u32 %v770_v47, %v767_v46  ;;  %759 = vst [vmem:[#allocation5] sm:$0xc] %v757_v48  ;;  %v827_v56 = vshrl.u32 %v6052_v51, 16  ;;  %v830_v57 = vshll.u32 %v6052_v51, 16 }
 0x189   : > { %v6056_v55 = vld [vmem:[#allocation2 + $0x10] ss:$0 sps:$4 sm:$0x33]   ;;  %564 = vst [vmem:[#allocation2 + $0x4] sm:$0x7] %v563_v52  ;;  %v749_v61 = vrot.slane %v747_v43, 1 }
 0x18a   : > { %v738_v58 = vld [vmem:[#allocation2 + $0x8] sm:$0x3]  ;;  %773 = vst [vmem:[#allocation5 + $0x8] sm:$0xc] %v771_v54  ;;  %821 = vst [vmem:[#allocation5] sm:$0x30] %v6056_v55 }
 0x18b   : > { %v6067_v60 = vld [vmem:[#allocation2 + $0xc] ss:$0 sps:$4 sm:$0x77]   ;;  %739 = vst [vmem:[#allocation5 + $0x20] sm:$0x3] %v738_v58  ;;  %v829_v0 = vrot.slane %v827_v56, 4  ;;  %v750_v5 = vor.u32 %v749_v61, %v745_v35 }
 0x18c   : > { %v644_v63 = vld [vmem:[#allocation2 + $0x14] sm:$0x7]  ;;  %v832_v1 = vrot.slane %v830_v57, 5  ;;  %v6053_v2 = vld [vmem:[#allocation2 + $0x18] ss:$0 sps:$4 sm:$0x77]  }
 0x18d   : > { %v645_v62 = vsel %vm7127_vm8, %v642_v41, %v644_v63  ;;  %v786_v4 = vshrl.u32 %v6067_v60, 16  ;;  %v6057_v7 = vld [vmem:[#allocation2 + $0x18] ss:$0 sps:$4 sm:$0x33]   ;;  %v789_v8 = vshll.u32 %v6067_v60, 16  ;;  %v888_v10 = vshrl.u32 %v6053_v2, 16 }
 0x18e   : > { %646 = vst [vmem:[#allocation2 + $0x14] sm:$0x7] %v645_v62  ;;  %v833_v6 = vor.u32 %v832_v1, %v829_v0  ;;  %v891_v11 = vshll.u32 %v6053_v2, 16  ;;  %752 = vst [vmem:[#allocation5 + $0x28] sm:$0x3] %v750_v5  ;;  %v880_v3 = vrot.slane %v6057_v7, 2 }
 0x18f   : > { %v788_v12 = vrot.slane %v786_v4, 6  ;;  %v705_v13 = vld [vmem:[#allocation2 + $0x20] sm:$0x7]  ;;  %v791_v15 = vrot.slane %v789_v8, 7  ;;  %v890_v16 = vrot.slane %v888_v10, 2  ;;  %v6061_v49 = vld [vmem:[%s8690_s3 + $0xc8] sm:$0xff]  }
 0x190   : > { %835 = vst [vmem:[#allocation5 + $0x8] sm:$0x30] %v833_v6  ;;  %v706_v14 = vsel %vm7127_vm8, %v703_v9, %v705_v13  ;;  %v893_v17 = vrot.slane %v891_v11, 3  ;;  %882 = vst [vmem:[#allocation5] sm:$0xc0] %v880_v3  ;;  %v6058_v45 = vld [vmem:[%s8690_s3 + $0x80] sm:$0xff]  }
 0x191   : > { %707 = vst [vmem:[#allocation2 + $0x20] sm:$0x7] %v706_v14  ;;  %v6066_v18 = vld [vmem:[#allocation2 + $0x4] ss:$0 sps:$4 sm:$0x77]   ;;  %v792_v19 = vor.u32 %v791_v15, %v788_v12  ;;  %v6062_v2 = vld [vmem:[%s8690_s3 + $0x88] sm:$0xff]  }
 0x192   : > { %v6069_v20 = vld [vmem:[#allocation2 + $0x1c] ss:$0 sps:$4 sm:$0x77]   ;;  %v894_v21 = vor.u32 %v893_v17, %v890_v16  ;;  %v6075_v22 = vld [vmem:[#allocation2 + $0x10] ss:$0 sps:$4 sm:$0x77]  }
 0x193   : > { %v6076_v23 = vld [vmem:[#allocation2 + $0x18] ss:$0 sps:$4 sm:$0x77]   ;;  %v730_v24 = vshrl.u32 %v6066_v18, 16  ;;  %v732_v25 = vshll.u32 %v6066_v18, 16  ;;  %v909_v26 = vshrl.u32 %v6069_v20, 16 }
 0x194   : > { %794 = vst [vmem:[#allocation5 + $0x18] sm:$0xc] %v792_v19  ;;  %v912_v28 = vshll.u32 %v6069_v20, 16  ;;  %v723_v29 = vld [vmem:[#allocation2 + $0x4] sm:$0x3]  ;;  %v807_v53 = vshrl.u32 %v6075_v22, 16 }
 0x195   : > { %896 = vst [vmem:[#allocation5 + $0x8] sm:$0xc0] %v894_v21  ;;  %v6068_v30 = vld [vmem:[#allocation2 + $0x14] ss:$0 sps:$4 sm:$0x77]   ;;  %v734_v27 = vrot.slane %v732_v25, 1 }
 0x196   : > { %724 = vst [vmem:[#allocation5 + $0x10] sm:$0x3] %v723_v29  ;;  %v911_v31 = vrot.slane %v909_v26, 2  ;;  %v914_v32 = vrot.slane %v912_v28, 3  ;;  %v810_v33 = vshll.u32 %v6075_v22, 16  ;;  %v847_v34 = vshrl.u32 %v6068_v30, 16 }
 0x197   : > { %v850_v36 = vshll.u32 %v6068_v30, 16  ;;  %v809_v37 = vrot.slane %v807_v53, 6  ;;  %v867_v38 = vshrl.u32 %v6076_v23, 16  ;;  %v735_v39 = vor.u32 %v734_v27, %v730_v24  ;;  %v6079_v44 = vld [vmem:[#allocation2 + $0x10] ss:$0 sps:$4 sm:$0x33]  }
 0x198   : > { %v915_v40 = vor.u32 %v914_v32, %v911_v31  ;;  %v812_v41 = vrot.slane %v810_v33, 7  ;;  %v870_v42 = vshll.u32 %v6076_v23, 16  ;;  %v849_v46 = vrot.slane %v847_v34, 4  ;;  %v6077_v35 = vld [vmem:[#allocation2 + $0x20] ss:$0 sps:$4 sm:$0x77]  }
 0x199   : > { %v852_v47 = vrot.slane %v850_v36, 5  ;;  %v869_v48 = vrot.slane %v867_v38, 4  ;;  %737 = vst [vmem:[#allocation5 + $0x18] sm:$0x3] %v735_v39  ;;  %v799_v52 = vrot.slane %v6079_v44, 6  ;;  %v939_v54 = vld [vmem:[#allocation5] sm:$0xff] }
 0x19a   : > { %917 = vst [vmem:[#allocation5 + $0x18] sm:$0xc0] %v915_v40  ;;  %v813_v50 = vor.u32 %v812_v41, %v809_v37  ;;  %v872_v51 = vrot.slane %v870_v42, 5  ;;  %v6080_v43 = vld [vmem:[#allocation2 + $0x18] ss:$0 sps:$4 sm:$0x33]  }
 0x19b   : > { %v853_v55 = vor.u32 %v852_v47, %v849_v46  ;;  %v930_v58 = vshrl.u32 %v6077_v35, 16  ;;  %v933_v59 = vshll.u32 %v6077_v35, 16  ;;  %801 = vst [vmem:[#allocation5 + $0x20] sm:$0xc] %v799_v52  ;;  %861 = vst [vmem:[#allocation5 + $0x20] sm:$0x30] %v6080_v43 }
 0x19c   : > { %v940_v56 = vld [vmem:[#allocation5 + $0x8] sm:$0xff]  ;;  %815 = vst [vmem:[#allocation5 + $0x28] sm:$0xc] %v813_v50  ;;  %v873_v57 = vor.u32 %v872_v51, %v869_v48  ;;  %v6081_v60 = vld [vmem:[#allocation2 + $0x20] ss:$0 sps:$4 sm:$0x33]  }
 0x19d   : > { %1368 = vmatprep.mubr.bf16.mxu0 %v940_v56  ;;  %855 = vst [vmem:[#allocation5 + $0x18] sm:$0x30] %v853_v55  ;;  %v6090_v61 = vld [vmem:[#allocation2 + $0xc] ss:$0 sps:$4 sm:$0x33]   ;;  %v932_v0 = vrot.slane %v930_v58, 2 }
 0x19e   : > { %v6091_v63 = vld [vmem:[#allocation2 + $0x14] ss:$0 sps:$4 sm:$0x33]   ;;  %1369 = vmatmul.mubr.bf16.vlgmr.msra.gmra.mrb[8].mxu0 %v939_v54  ;;  %875 = vst [vmem:[#allocation5 + $0x28] sm:$0x30] %v873_v57  ;;  %v935_v1 = vrot.slane %v933_v59, 3 }
 0x19f   : > { %v922_v62 = vrot.slane %v6081_v60, 2  ;;  %5861 = vmatpush3.bf16.msra.mxu0 %v6058_v45  ;;  %v778_v4 = vrot.slane %v6090_v61, 6  ;;  %841 = vst [vmem:[#allocation5 + $0x10] sm:$0x30] %v6091_v63  ;;  %v6065_v6 = vld [vmem:[%s8690_s3 + $0xd0] sm:$0xff]   ;;  %v6073_v11 = vld [vmem:[%s8690_s3 + $0xd8] sm:$0xff]  }
 0x1a0   : > { %v6092_v5 = vld [vmem:[#allocation2 + $0x1c] ss:$0 sps:$4 sm:$0x33]   ;;  %5862 = vmatprep.subr.bf16.mxu0 %v6061_v49  ;;  %v936_v7 = vor.u32 %v935_v1, %v932_v0  ;;  %v6070_v9 = vld [vmem:[%s8690_s3 + $0x90] sm:$0xff]   ;;  %v6082_v13 = vld [vmem:[%s8690_s3 + $0xe0] sm:$0xff]   ;;  %v6819_v32 = vmov 0  }
 0x1a1   : > { %924 = vst [vmem:[#allocation5 + $0x20] sm:$0xc0] %v922_v62  ;;  %780 = vst [vmem:[#allocation5 + $0x10] sm:$0xc] %v778_v4  ;;  %v901_v8 = vrot.slane %v6092_v5, 2  ;;  %v6078_v12 = vld [vmem:[%s8690_s3 + $0x98] sm:$0xff]  }
 0x1a2   : > { %938 = vst [vmem:[#allocation5 + $0x28] sm:$0xc0] %v936_v7  ;;  %v6083_v14 = vld [vmem:[%s8690_s3 + $0xa0] sm:$0xff]   ;;  %v6084_v16 = vld [vmem:[%s8690_s3 + $0xe8] sm:$0xff]   ;;  %v6086_v18 = vld [vmem:[%s8690_s3 + $0xf0] sm:$0xff]  }
 0x1a3   : > { %5863 = vmatpush3.bf16.msra.mxu0 %v6062_v2  ;;  %903 = vst [vmem:[#allocation5 + $0x10] sm:$0xc0] %v901_v8  ;;  %v6085_v17 = vld [vmem:[%s8690_s3 + $0xa8] sm:$0xff]   ;;  %v6087_v19 = vld [vmem:[%s8690_s3 + $0xb0] sm:$0xff]   ;;  %v6088_v20 = vld [vmem:[%s8690_s3 + $0xf8] sm:$0xff]  }
 0x1a4   : > { %5864 = vmatprep.subr.bf16.mxu0 %v6065_v6  ;;  %v942_v10 = vld [vmem:[#allocation5 + $0x18] sm:$0xff]  ;;  %v6093_v23 = vld [vmem:[%s8692_s5] ss:$8 sps:$4 sm:$0xff]   ;;  %v6095_v24 = vld [vmem:[%s8692_s5 + $0x4] ss:$8 sps:$4 sm:$0xff]  }
 0x1a5   : > { %1409 = vmatprep.mubr.bf16.mxu0 %v942_v10  ;;  %v6089_v21 = vld [vmem:[%s8690_s3 + $0xb8] sm:$0xff]   ;;  %v6101_v28 = vld [vmem:[%s8692_s5 + $0x24] ss:$8 sps:$4 sm:$0xff]   ;;  %v6099_v29 = vld [vmem:[%s8692_s5 + $0x20] ss:$8 sps:$4 sm:$0xff]  }
 0x1a6   : > { %v6096_v25 = vld [vmem:[%s8692_s5 + $0x10] ss:$8 sps:$4 sm:$0xff]   ;;  %v6098_v26 = vld [vmem:[%s8692_s5 + $0x14] ss:$8 sps:$4 sm:$0xff]   ;;  %v6107_v27 = vld [vmem:[%s8692_s5 + $0x44] ss:$8 sps:$4 sm:$0xff]  }
 0x1a7   : > { %5865 = vmatpush3.bf16.msra.mxu0 %v6070_v9  ;;  %v6104_v30 = vld [vmem:[%s8692_s5 + $0x34] ss:$8 sps:$4 sm:$0xff]   ;;  %v6102_v53 = vld [vmem:[%s8692_s5 + $0x30] ss:$8 sps:$4 sm:$0xff]   ;;  %v6105_v31 = vld [vmem:[%s8692_s5 + $0x40] ss:$8 sps:$4 sm:$0xff]  }
 0x1a8   : > { %5866 = vmatprep.subr.bf16.mxu0 %v6073_v11  ;;  %v943_v15 = vld [vmem:[#allocation5 + $0x20] sm:$0xff]  ;;  %366 = vst [vmem:[#allocation3 + $0x4] sm:$0x7] %v6819_v32  ;;  %367 = vst [vmem:[#allocation3 + $0x8] sm:$0x7] %v6819_v32 }
 0x1a9   : > { %v944_v3 = vld [vmem:[#allocation5 + $0x28] sm:$0xff]  ;;  %365 = vst [vmem:[#allocation3] sm:$0x7] %v6819_v32  ;;  %368 = vst [vmem:[#allocation3 + $0xc] sm:$0x7] %v6819_v32 }
 0x1aa   : > { %1450 = vmatprep.mubr.bf16.mxu1 %v944_v3  ;;  %v941_v22 = vld [vmem:[#allocation5 + $0x10] sm:$0xff]  ;;  %369 = vst [vmem:[#allocation3 + $0x10] sm:$0x7] %v6819_v32  ;;  %371 = vst [vmem:[#allocation4] sm:$0x77] %v6819_v32 }
 0x1ab   : > { %5867 = vmatpush3.bf16.msra.mxu0 %v6078_v12  ;;  %1451 = vmatmul.mubr.bf16.vlgmr.msra.gmra.mrb[0].mxu1 %v943_v15  ;;  %372 = vst [vmem:[#allocation4 + $0x8] sm:$0x77] %v6819_v32  ;;  %373 = vst [vmem:[#allocation4 + $0x10] sm:$0x77] %v6819_v32  ;;  %v6110_v33 = vld [vmem:[%s8692_s5 + $0x54] ss:$8 sps:$4 sm:$0xff]  }
 0x1ac   : > { %5868 = vmatprep.subr.bf16.mxu0 %v6082_v13  ;;  %v6108_v34 = vld [vmem:[%s8692_s5 + $0x50] ss:$8 sps:$4 sm:$0xff]   ;;  %v6113_v36 = vld [vmem:[%s8692_s5 + $0x64] ss:$8 sps:$4 sm:$0xff]   ;;  %v6111_v37 = vld [vmem:[%s8692_s5 + $0x60] ss:$8 sps:$4 sm:$0xff]  }
 0x1ad   : > { %v6116_v38 = vld [vmem:[%s8692_s5 + $0x74] ss:$8 sps:$4 sm:$0xff]   ;;  %v6114_v39 = vld [vmem:[%s8692_s5 + $0x70] ss:$8 sps:$4 sm:$0xff]   ;;  %v6119_v40 = vld [vmem:[%s8692_s5 + $0x84] ss:$8 sps:$4 sm:$0xff]  }
 0x1ae   : > { %v6117_v41 = vld [vmem:[%s8692_s5 + $0x80] ss:$8 sps:$4 sm:$0xff]   ;;  %v6122_v42 = vld [vmem:[%s8692_s5 + $0x94] ss:$8 sps:$4 sm:$0xff]   ;;  %v6120_v44 = vld [vmem:[%s8692_s5 + $0x90] ss:$8 sps:$4 sm:$0xff]  }
 0x1af   : > { %5869 = vmatpush3.bf16.msra.mxu0 %v6083_v14  ;;  %v6125_v47 = vld [vmem:[%s8692_s5 + $0xa4] ss:$8 sps:$4 sm:$0xff]   ;;  %v6123_v35 = vld [vmem:[%s8692_s5 + $0xa0] ss:$8 sps:$4 sm:$0xff]   ;;  %v6128_v52 = vld [vmem:[%s8692_s5 + $0xb4] ss:$8 sps:$4 sm:$0xff]  }
 0x1b0   : > { %5870 = vmatprep.subr.bf16.mxu0 %v6084_v16  ;;  %v1510_v45 = vld [vmem:[#allocation3] sm:$0x3]  ;;  %v6126_v43 = vld [vmem:[%s8692_s5 + $0xb0] ss:$8 sps:$4 sm:$0xff]   ;;  %v6131_v56 = vld [vmem:[%s8692_s5 + $0xc4] ss:$8 sps:$4 sm:$0xff]  }
 0x1b1   : > { %v1512_v46 = vld [vmem:[#allocation3] sm:$0x7]  ;;  %1511 = vst [vmem:[#allocation6] sm:$0x3] %v1510_v45  ;;  %v6134_v58 = vld [vmem:[%s8692_s5 + $0xd4] ss:$8 sps:$4 sm:$0xff]  }
 0x1b2   : > { %v1514_v48 = vshrl.u32 %v1512_v46, 16  ;;  %v1517_v49 = vshll.u32 %v1512_v46, 16  ;;  %v6129_v57 = vld [vmem:[%s8692_s5 + $0xc0] ss:$8 sps:$4 sm:$0xff]   ;;  %v6132_v61 = vld [vmem:[%s8692_s5 + $0xd0] ss:$8 sps:$4 sm:$0xff]  }
 0x1b3   : > { %5871 = vmatpush3.bf16.msra.mxu0 %v6085_v17  ;;  %v1524_v59 = vld [vmem:[#allocation3] sm:$0x6]  ;;  %v6137_v63 = vld [vmem:[%s8692_s5 + $0xe4] ss:$8 sps:$4 sm:$0xff]   ;;  %v6140_v1 = vld [vmem:[%s8692_s5 + $0xf4] ss:$8 sps:$4 sm:$0xff]  }
 0x1b4   : > { %5872 = vmatprep.subr.bf16.mxu0 %v6086_v18  ;;  %v1516_v50 = vrot.slane %v1514_v48, 4  ;;  %v1519_v51 = vrot.slane %v1517_v49, 5  ;;  %v5353_v60 = vrot.slane %v1524_v59, 9  ;;  %v6135_v0 = vld [vmem:[%s8692_s5 + $0xe0] ss:$8 sps:$4 sm:$0xff]  }
 0x1b5   : > { %v6138_v62 = vld [vmem:[%s8692_s5 + $0xf0] ss:$8 sps:$4 sm:$0xff]   ;;  %v6145_v2 = vld [vmem:[%s8692_s5 + $0x104] ss:$8 sps:$4 sm:$0xff]   ;;  %v5302_v14 = vld [vmem:[%s8691_s4] ss:$0 sm:$0xff] }
 0x1b6   : > { %v1520_v54 = vor.u32 %v1519_v51, %v1516_v50  ;;  %1529 = vst [vmem:[#allocation6 + $0x8] sm:$0x3] %v5353_v60  ;;  %v1498_v48 = vld [vmem:[#allocation3 + $0xc] sm:$0x7]  ;;  %vm2806_vm5 = vsmask.f32 1280 }
 0x1b7   : > { %5873 = vmatpush3.bf16.msra.mxu0 %v6087_v19  ;;  %vm2808_vm7 = vmor %vm2806_vm5, %vm2807_vm6  ;;  %vm2809_vm8 = vsmask.f32 5392 }
 0x1b8   : > { %5874 = vmatprep.subr.bf16.mxu0 %v6088_v20  ;;  %v1521_v55 = vrot.slane %v1520_v54, 4  ;;  %vm2810_vm10 = vmor %vm2808_vm7, %vm2809_vm8 }
 0x1ba   : > { %1523 = vst [vmem:[#allocation6 + $0x4] sm:$0x3] %v1521_v55 }
 0x1bb   : > { %5875 = vmatpush3.bf16.msra.mxu0 %v6089_v21 }
 0x1bc   : > { %2546 = vmatprep.subr.bf16.mxu0 %v6095_v24 }
 0x1be   : > { %1410 = vmatmul.mubr.bf16.vlgmr.msra.gmra.mrb[12].mxu0 %v941_v22 }
 0x1bf   : > { %2547 = vmatpush1.bf16.msra.mxu0 %v6093_v23 }
 0x1c0   : > { %2548 = vmatprep.subr.bf16.mxu0 %v6098_v26 }
 0x1c3   : > { %2549 = vmatpush1.bf16.msra.mxu0 %v6096_v25 }
 0x1c4   : > { %2550 = vmatprep.subr.bf16.mxu0 %v6101_v28 }
 0x1c7   : > { %2551 = vmatpush1.bf16.msra.mxu0 %v6099_v29 }
 0x1c8   : > { %2552 = vmatprep.subr.bf16.mxu0 %v6104_v30 }
 0x1cb   : > { %2553 = vmatpush1.bf16.msra.mxu0 %v6102_v53 }
 0x1cc   : > { %2554 = vmatprep.subr.bf16.mxu0 %v6107_v27 }
 0x1cf   : > { %2555 = vmatpush1.bf16.msra.mxu0 %v6105_v31 }
 0x1d0   : > { %2556 = vmatprep.subr.bf16.mxu0 %v6110_v33 }
 0x1d3   : > { %2557 = vmatpush1.bf16.msra.mxu0 %v6108_v34 }
 0x1d4   : > { %2558 = vmatprep.subr.bf16.mxu0 %v6113_v36 }
 0x1d7   : > { %2559 = vmatpush1.bf16.msra.mxu0 %v6111_v37 }
 0x1d8   : > { %2560 = vmatprep.subr.bf16.mxu0 %v6116_v38 }
 0x1db   : > { %2561 = vmatpush1.bf16.msra.mxu0 %v6114_v39 }
 0x1dc   : > { %2562 = vmatprep.subr.bf16.mxu0 %v6119_v40  ;;  %v1475_v40 = vld [vmem:[#allocation3 + $0x4] sm:$0x7] }
 0x1df   : > { %2563 = vmatpush1.bf16.msra.mxu0 %v6117_v41 }
 0x1e0   : > { %2564 = vmatprep.subr.bf16.mxu0 %v6122_v42 }
 0x1e3   : > { %2565 = vmatpush1.bf16.msra.mxu0 %v6120_v44 }
 0x1e4   : > { %2566 = vmatprep.subr.bf16.mxu0 %v6125_v47  ;;  %v1484_v47 = vld [vmem:[#allocation3 + $0x8] sm:$0x7] }
 0x1e7   : > { %2567 = vmatpush1.bf16.msra.mxu0 %v6123_v35 }
 0x1e8   : > { %2568 = vmatprep.subr.bf16.mxu0 %v6128_v52 }
 0x1eb   : > { %2569 = vmatpush1.bf16.msra.mxu0 %v6126_v43  ;;  %v1507_v43 = vld [vmem:[#allocation3 + $0x10] sm:$0x7] }
 0x1ec   : > { %2570 = vmatprep.subr.bf16.mxu0 %v6131_v56 }
 0x1ef   : > { %2571 = vmatpush1.bf16.msra.mxu0 %v6129_v57 }
 0x1f0   : > { %2572 = vmatprep.subr.bf16.mxu0 %v6134_v58 }
 0x1f3   : > { %2573 = vmatpush1.bf16.msra.mxu0 %v6132_v61 }
 0x1f4   : > { %2574 = vmatprep.subr.bf16.mxu0 %v6137_v63 }
 0x1f7   : > { %2575 = vmatpush1.bf16.msra.mxu0 %v6135_v0 }
 0x1f8   : > { %2576 = vmatprep.subr.bf16.mxu0 %v6140_v1 }
 0x1fb   : > { %2577 = vmatpush1.bf16.msra.mxu0 %v6138_v62 }
 0x1fc   : > { %2587 = vmatprep.subr.bf16.mxu0 %v6145_v2 }
 0x271   : > { %v5854_v4 = vpop.f32.mrb[8].mxu0 }
 0x272   : > { %v5855_v5 = vpop.f32.mrb[9].mxu0 }
 0x273   : > { %v5856_v6 = vadd.f32 %v5855_v5, %v5854_v4  ;;  %v5857_v7 = vpop.f32.mrb[10].mxu0 }
 0x274   : > { %v5858_v8 = vpop.f32.mrb[11].mxu0 }
 0x275   : > { %v5859_v9 = vadd.f32 %v5858_v8, %v5857_v7  ;;  %v1371_v18 = vadd.f32 %v5856_v6, %v5302_v14 }
 0x277   : > { %v1374_v22 = vadd.f32 %v5859_v9, %v5302_v14 }
 0x27e   : > { %v5898_v10 = vpop.f32.mrb[0].mxu1 }
 0x27f   : > { %v5899_v11 = vpop.f32.mrb[1].mxu1 }
 0x280   : > { %v5900_v12 = vadd.f32 %v5899_v11, %v5898_v10  ;;  %v5901_v13 = vpop.f32.mrb[2].mxu1 }
 0x281   : > { %v5902_v3 = vpop.f32.mrb[3].mxu1 }
 0x282   : > { %v5903_v15 = vadd.f32 %v5902_v3, %v5901_v13 }
 0x291   : > { %v5876_v16 = vpop.f32.mrb[12].mxu0 }
 0x292   : > { %v5877_v17 = vpop.f32.mrb[13].mxu0 }
 0x293   : > { %v5878_v19 = vadd.f32 %v5877_v17, %v5876_v16  ;;  %v5879_v20 = vpop.f32.mrb[14].mxu0 }
 0x294   : > { %v5880_v21 = vpop.f32.mrb[15].mxu0 }
 0x295   : > { %v1412_v23 = vadd.f32 %v5878_v19, %v1371_v18  ;;  %v5881_v24 = vadd.f32 %v5880_v21, %v5879_v20 }
 0x297   : > { %v1453_v25 = vadd.f32 %v5900_v12, %v1412_v23  ;;  %v1415_v26 = vadd.f32 %v5881_v24, %v1374_v22 }
 0x299   : > { %v1459_v28 = vmax.f32 %v1453_v25, 0.0  ;;  %v1456_v29 = vadd.f32 %v5903_v15, %v1415_v26 }
 0x29b   : > { %v5825_v30 = vpack.c.bf16 %v1459_v28, %v1459_v28  ;;  %v1460_v53 = vmax.f32 %v1456_v29, 0.0 }
 0x29d   : > { %v1466_v27 = vshrl.u32 %v5825_v30, 16  ;;  %v1469_v31 = vshll.u32 %v5825_v30, 16  ;;  %v5826_v33 = vpack.c.bf16 %v1460_v53, %v1460_v53 }
 0x29f   : > { %v1468_v34 = vrot.slane %v1466_v27, 7  ;;  %v1478_v36 = vrot.slane %v1466_v27, 5  ;;  %v1479_v37 = vrot.slane %v1469_v31, 6  ;;  %v1490_v38 = vshrl.u32 %v5826_v33, 16 }
 0x2a0   : > { %v1493_v41 = vshll.u32 %v5826_v33, 16 }
 0x2a1   : > { %v1471_v42 = vor.u32 %v1469_v31, %v1468_v34  ;;  %v1480_v44 = vor.u32 %v1479_v37, %v1478_v36  ;;  %v1492_v45 = vrot.slane %v1490_v38, 7  ;;  %v1501_v46 = vrot.slane %v1490_v38, 5 }
 0x2a2   : > { %v1502_v49 = vrot.slane %v1493_v41, 6 }
 0x2a3   : > { %v1476_v50 = vsel %vm7316_vm9, %v1471_v42, %v1475_v40  ;;  %v1481_v51 = vrot.slane %v1480_v44, 4  ;;  %v1495_v35 = vor.u32 %v1493_v41, %v1492_v45 }
 0x2a4   : > { %1477 = vst [vmem:[#allocation3 + $0x4] sm:$0x7] %v1476_v50  ;;  %v1503_v52 = vor.u32 %v1502_v49, %v1501_v46  ;;  %v6143_v49 = vld [vmem:[%s8692_s5 + $0x100] ss:$8 sps:$4 sm:$0xff]   ;;  %v6150_v50 = vld [vmem:[%s8692_s5 + $0x114] ss:$8 sps:$4 sm:$0xff]  }
 0x2a5   : > { %v1485_v54 = vsel %vm7316_vm9, %v1481_v51, %v1484_v47  ;;  %v1499_v55 = vsel %vm7316_vm9, %v1495_v35, %v1498_v48  ;;  %v6148_v35 = vld [vmem:[%s8692_s5 + $0x110] ss:$8 sps:$4 sm:$0xff]  }
 0x2a6   : > { %1486 = vst [vmem:[#allocation3 + $0x8] sm:$0x7] %v1485_v54  ;;  %1500 = vst [vmem:[#allocation3 + $0xc] sm:$0x7] %v1499_v55  ;;  %v1504_v56 = vrot.slane %v1503_v52, 4 }
 0x2a7   : > { %v6153_v52 = vld [vmem:[%s8692_s5 + $0x124] ss:$8 sps:$4 sm:$0xff]   ;;  %v6151_v54 = vld [vmem:[%s8692_s5 + $0x120] ss:$8 sps:$4 sm:$0xff]   ;;  %v6156_v55 = vld [vmem:[%s8692_s5 + $0x134] ss:$8 sps:$4 sm:$0xff]  }
 0x2a8   : > { %v1508_v57 = vsel %vm7316_vm9, %v1504_v56, %v1507_v43  ;;  %v6154_v43 = vld [vmem:[%s8692_s5 + $0x130] ss:$8 sps:$4 sm:$0xff]   ;;  %v6159_v56 = vld [vmem:[%s8692_s5 + $0x144] ss:$8 sps:$4 sm:$0xff]   ;;  %vm2811_vm9 = vsmask.f32 7448 }
 0x2a9   : > { %1509 = vst [vmem:[#allocation3 + $0x10] sm:$0x7] %v1508_v57  ;;  %v6157_v57 = vld [vmem:[%s8692_s5 + $0x140] ss:$8 sps:$4 sm:$0xff]   ;;  %vm7801_vm11 = vmor %vm2810_vm10, %vm2811_vm9 }
 0x2ab   : > { %v1530_v58 = vld [vmem:[#allocation3 + $0x4] sm:$0x3] }
 0x2ac   : > { %v1532_v59 = vld [vmem:[#allocation3 + $0x4] sm:$0x7]  ;;  %1531 = vst [vmem:[#allocation6 + $0xc] sm:$0x3] %v1530_v58  ;;  %v6162_v58 = vld [vmem:[%s8692_s5 + $0x154] ss:$8 sps:$4 sm:$0xff]  }
 0x2ad   : > { %v1544_v60 = vld [vmem:[#allocation3 + $0x4] sm:$0x6]  ;;  %v1534_v61 = vshrl.u32 %v1532_v59, 16  ;;  %v1537_v63 = vshll.u32 %v1532_v59, 16  ;;  %v1570_v1 = vld [vmem:[#allocation3 + $0x8] sm:$0x3] }
 0x2ae   : > { %v5354_v0 = vrot.slane %v1544_v60, 9  ;;  %v1575_v62 = vld [vmem:[#allocation3 + $0x8] sm:$0x7]  ;;  %v1572_v4 = vrot.slane %v1570_v1, 6  ;;  %v1591_v8 = vld [vmem:[#allocation3 + $0xc] sm:$0x3] }
 0x2af   : > { %v1586_v2 = vld [vmem:[#allocation3 + $0x8] sm:$0x6]  ;;  %v1577_v5 = vshrl.u32 %v1575_v62, 16  ;;  %v1580_v6 = vshll.u32 %v1575_v62, 16  ;;  %v1593_v9 = vrot.slane %v1591_v8, 6  ;;  %v1536_v10 = vrot.slane %v1534_v61, 4 }
 0x2b0   : > { %v1588_v7 = vrot.slane %v1586_v2, 7  ;;  %1549 = vst [vmem:[#allocation6 + $0x14] sm:$0x3] %v5354_v0  ;;  %v1539_v11 = vrot.slane %v1537_v63, 5  ;;  %v1596_v12 = vld [vmem:[#allocation3 + $0xc] sm:$0x7] }
 0x2b1   : > { %1574 = vst [vmem:[#allocation6] sm:$0xc] %v1572_v4  ;;  %v1579_v13 = vrot.slane %v1577_v5, 6  ;;  %v1582_v3 = vrot.slane %v1580_v6, 7  ;;  %v1598_v15 = vshrl.u32 %v1596_v12, 16  ;;  %v1601_v14 = vshll.u32 %v1596_v12, 16 }
 0x2b2   : > { %1590 = vst [vmem:[#allocation6 + $0x8] sm:$0xc] %v1588_v7  ;;  %v1607_v16 = vld [vmem:[#allocation3 + $0xc] sm:$0x6]  ;;  %1595 = vst [vmem:[#allocation6 + $0xc] sm:$0xc] %v1593_v9  ;;  %v1540_v17 = vor.u32 %v1539_v11, %v1536_v10 }
 0x2b3   : > { %v1609_v18 = vrot.slane %v1607_v16, 7  ;;  %v1583_v19 = vor.u32 %v1582_v3, %v1579_v13  ;;  %v1600_v20 = vrot.slane %v1598_v15, 6  ;;  %v1603_v21 = vrot.slane %v1601_v14, 7  ;;  %v1550_v22 = vld [vmem:[#allocation3 + $0x8] sm:$0x3] }
 0x2b4   : > { %v1541_v23 = vrot.slane %v1540_v17, 4  ;;  %1551 = vst [vmem:[#allocation6 + $0x18] sm:$0x3] %v1550_v22  ;;  %v1552_v24 = vld [vmem:[#allocation3 + $0x8] sm:$0x7] }
 0x2b5   : > { %1611 = vst [vmem:[#allocation6 + $0x14] sm:$0xc] %v1609_v18  ;;  %v1612_v25 = vld [vmem:[#allocation3 + $0x10] sm:$0x3]  ;;  %1585 = vst [vmem:[#allocation6 + $0x4] sm:$0xc] %v1583_v19  ;;  %v1604_v26 = vor.u32 %v1603_v21, %v1600_v20 }
 0x2b6   : > { %v1554_v28 = vshrl.u32 %v1552_v24, 16  ;;  %v1557_v29 = vshll.u32 %v1552_v24, 16  ;;  %1543 = vst [vmem:[#allocation6 + $0x10] sm:$0x3] %v1541_v23  ;;  %v1614_v30 = vrot.slane %v1612_v25, 6 }
 0x2b7   : > { %v1617_v53 = vld [vmem:[#allocation3 + $0x10] sm:$0x7]  ;;  %v1564_v27 = vld [vmem:[#allocation3 + $0x8] sm:$0x6]  ;;  %1606 = vst [vmem:[#allocation6 + $0x10] sm:$0xc] %v1604_v26 }
 0x2b8   : > { %v1556_v31 = vrot.slane %v1554_v28, 4  ;;  %v1559_v33 = vrot.slane %v1557_v29, 5  ;;  %v1619_v34 = vshrl.u32 %v1617_v53, 16  ;;  %v1622_v36 = vshll.u32 %v1617_v53, 16  ;;  %1616 = vst [vmem:[#allocation6 + $0x18] sm:$0xc] %v1614_v30 }
 0x2b9   : > { %v5355_v37 = vrot.slane %v1564_v27, 9  ;;  %v7328_v45 = vld [vmem:[#allocation6 + $0x8] sm:$0xff]  ;;  %v6165_v60 = vld [vmem:[%s8692_s5 + $0x164] ss:$8 sps:$4 sm:$0xff]   ;;  %v6163_v61 = vld [vmem:[%s8692_s5 + $0x160] ss:$8 sps:$4 sm:$0xff]  }
 0x2ba   : > { %v1560_v38 = vor.u32 %v1559_v33, %v1556_v31  ;;  %v1621_v40 = vrot.slane %v1619_v34, 6  ;;  %v1624_v41 = vrot.slane %v1622_v36, 7  ;;  %v5359_v51 = vcombine.high %v7328_v45, %v7328_v45  ;;  %v6160_v59 = vld [vmem:[%s8692_s5 + $0x150] ss:$8 sps:$4 sm:$0xff]   ;;  %v6168_v63 = vld [vmem:[%s8692_s5 + $0x174] ss:$8 sps:$4 sm:$0xff]  }
 0x2bb   : > { %1569 = vst [vmem:[#allocation6 + $0x20] sm:$0x3] %v5355_v37  ;;  %v6166_v0 = vld [vmem:[%s8692_s5 + $0x170] ss:$8 sps:$4 sm:$0xff]   ;;  %v6171_v1 = vld [vmem:[%s8692_s5 + $0x184] ss:$8 sps:$4 sm:$0xff]   ;;  %v5358_v19 = vcombine.low %v7328_v45, %v7328_v45 }
 0x2bc   : > { %v1561_v42 = vrot.slane %v1560_v38, 4  ;;  %v1633_v44 = vld [vmem:[#allocation6] sm:$0xff]  ;;  %v1625_v46 = vor.u32 %v1624_v41, %v1621_v40  ;;  %v6169_v62 = vld [vmem:[%s8692_s5 + $0x180] ss:$8 sps:$4 sm:$0xff]   ;;  %v6177_v5 = vld [vmem:[%s8692_s5 + $0x1a4] ss:$8 sps:$4 sm:$0xff]  }
 0x2bd   : > { %v5356_v47 = vcombine.low %v1633_v44, %v1633_v44  ;;  %v5357_v48 = vcombine.high %v1633_v44, %v1633_v44  ;;  %v6174_v2 = vld [vmem:[%s8692_s5 + $0x194] ss:$8 sps:$4 sm:$0xff]   ;;  %v6172_v4 = vld [vmem:[%s8692_s5 + $0x190] ss:$8 sps:$4 sm:$0xff]   ;;  %v6175_v6 = vld [vmem:[%s8692_s5 + $0x1a0] ss:$8 sps:$4 sm:$0xff]  }
 0x2be   : > { %1563 = vst [vmem:[#allocation6 + $0x1c] sm:$0x3] %v1561_v42  ;;  %1627 = vst [vmem:[#allocation6 + $0x1c] sm:$0xc] %v1625_v46  ;;  %v6180_v7 = vld [vmem:[%s8692_s5 + $0x1b4] ss:$8 sps:$4 sm:$0xff]  }
 0x2bf   : > { %2578 = vmatprep.mubr.bf16.mxu0 %v5357_v48  ;;  %v6178_v8 = vld [vmem:[%s8692_s5 + $0x1b0] ss:$8 sps:$4 sm:$0xff]   ;;  %v6183_v9 = vld [vmem:[%s8692_s5 + $0x1c4] ss:$8 sps:$4 sm:$0xff]   ;;  %v6181_v10 = vld [vmem:[%s8692_s5 + $0x1c0] ss:$8 sps:$4 sm:$0xff]  }
 0x2c0   : > { %2579 = vmatmul.mubr.bf16.vlgmr.msra.gmra.mrb[16].mxu0 %v5356_v47  ;;  %v6186_v11 = vld [vmem:[%s8692_s5 + $0x1d4] ss:$8 sps:$4 sm:$0xff]   ;;  %v6184_v12 = vld [vmem:[%s8692_s5 + $0x1d0] ss:$8 sps:$4 sm:$0xff]   ;;  %v6189_v13 = vld [vmem:[%s8692_s5 + $0x1e4] ss:$8 sps:$4 sm:$0xff]  }
 0x2c1   : > { %2588 = vmatpush1.bf16.msra.mxu0 %v6143_v49  ;;  %2619 = vmatprep.mubr.bf16.mxu0 %v5359_v51  ;;  %v6187_v3 = vld [vmem:[%s8692_s5 + $0x1e0] ss:$8 sps:$4 sm:$0xff]   ;;  %v6192_v15 = vld [vmem:[%s8692_s5 + $0x1f4] ss:$8 sps:$4 sm:$0xff]   ;;  %v6190_v14 = vld [vmem:[%s8692_s5 + $0x1f0] ss:$8 sps:$4 sm:$0xff]  }
 0x2c2   : > { %2589 = vmatprep.subr.bf16.mxu0 %v6150_v50  ;;  %v6195_v16 = vld [vmem:[%s8692_s5 + $0x204] ss:$8 sps:$4 sm:$0xff]   ;;  %v6193_v18 = vld [vmem:[%s8692_s5 + $0x200] ss:$8 sps:$4 sm:$0xff]   ;;  %v6200_v20 = vld [vmem:[%s8692_s5 + $0x214] ss:$8 sps:$4 sm:$0xff]  }
 0x2c3   : > { %v7428_v17 = vld [vmem:[#allocation6 + $0x10] sm:$0xff]  ;;  %v6198_v22 = vld [vmem:[%s8692_s5 + $0x210] ss:$8 sps:$4 sm:$0xff]   ;;  %v6206_v25 = vld [vmem:[%s8692_s5 + $0x234] ss:$8 sps:$4 sm:$0xff]  }
 0x2c4   : > { %v5361_v21 = vcombine.high %v7428_v17, %v7428_v17  ;;  %v6203_v23 = vld [vmem:[%s8692_s5 + $0x224] ss:$8 sps:$4 sm:$0xff]   ;;  %v6201_v24 = vld [vmem:[%s8692_s5 + $0x220] ss:$8 sps:$4 sm:$0xff]   ;;  %v6204_v26 = vld [vmem:[%s8692_s5 + $0x230] ss:$8 sps:$4 sm:$0xff]  }
 0x2c5   : > { %2590 = vmatpush1.bf16.msra.mxu0 %v6148_v35  ;;  %v6209_v28 = vld [vmem:[%s8692_s5 + $0x244] ss:$8 sps:$4 sm:$0xff]   ;;  %v6207_v29 = vld [vmem:[%s8692_s5 + $0x240] ss:$8 sps:$4 sm:$0xff]   ;;  %v6212_v30 = vld [vmem:[%s8692_s5 + $0x254] ss:$8 sps:$4 sm:$0xff]  }
 0x2c6   : > { %2591 = vmatprep.subr.bf16.mxu0 %v6153_v52  ;;  %v6210_v53 = vld [vmem:[%s8692_s5 + $0x250] ss:$8 sps:$4 sm:$0xff]   ;;  %v6215_v27 = vld [vmem:[%s8692_s5 + $0x264] ss:$8 sps:$4 sm:$0xff]   ;;  %v6213_v31 = vld [vmem:[%s8692_s5 + $0x260] ss:$8 sps:$4 sm:$0xff]  }
 0x2c7   : > { %v6218_v33 = vld [vmem:[%s8692_s5 + $0x274] ss:$8 sps:$4 sm:$0xff]   ;;  %v6216_v34 = vld [vmem:[%s8692_s5 + $0x270] ss:$8 sps:$4 sm:$0xff]   ;;  %v6221_v36 = vld [vmem:[%s8692_s5 + $0x284] ss:$8 sps:$4 sm:$0xff]  }
 0x2c8   : > { %v6219_v37 = vld [vmem:[%s8692_s5 + $0x280] ss:$8 sps:$4 sm:$0xff]   ;;  %v6224_v38 = vld [vmem:[%s8692_s5 + $0x294] ss:$8 sps:$4 sm:$0xff]   ;;  %v6320_v41 = vld [vmem:[%s8694_s7 + $0x204] ss:$8 sps:$4 sm:$0xff]  }
 0x2c9   : > { %2592 = vmatpush1.bf16.msra.mxu0 %v6151_v54  ;;  %v6318_v40 = vld [vmem:[%s8694_s7 + $0x200] ss:$8 sps:$4 sm:$0xff]   ;;  %v6222_v42 = vld [vmem:[%s8692_s5 + $0x290] ss:$8 sps:$4 sm:$0xff]   ;;  %v6323_v44 = vld [vmem:[%s8694_s7 + $0x214] ss:$8 sps:$4 sm:$0xff]   ;;  %4884 = vmatprep.subr.bf16.mxu1 %v6320_v41 }
 0x2ca   : > { %2593 = vmatprep.subr.bf16.mxu0 %v6156_v55  ;;  %v6227_v45 = vld [vmem:[%s8692_s5 + $0x2a4] ss:$8 sps:$4 sm:$0xff]   ;;  %4885 = vmatpush1.bf16.msra.mxu1 %v6318_v40  ;;  %v6321_v46 = vld [vmem:[%s8694_s7 + $0x210] ss:$8 sps:$4 sm:$0xff]   ;;  %v6225_v48 = vld [vmem:[%s8692_s5 + $0x2a0] ss:$8 sps:$4 sm:$0xff]  }
 0x2cb   : > { %4886 = vmatprep.subr.bf16.mxu1 %v6323_v44  ;;  %v6326_v47 = vld [vmem:[%s8694_s7 + $0x224] ss:$8 sps:$4 sm:$0xff]   ;;  %v6230_v49 = vld [vmem:[%s8692_s5 + $0x2b4] ss:$8 sps:$4 sm:$0xff]   ;;  %v6324_v50 = vld [vmem:[%s8694_s7 + $0x220] ss:$8 sps:$4 sm:$0xff]  }
 0x2cc   : > { %v6329_v51 = vld [vmem:[%s8694_s7 + $0x234] ss:$8 sps:$4 sm:$0xff]   ;;  %v6228_v35 = vld [vmem:[%s8692_s5 + $0x2b0] ss:$8 sps:$4 sm:$0xff]   ;;  %v6233_v52 = vld [vmem:[%s8692_s5 + $0x2c4] ss:$8 sps:$4 sm:$0xff]  }
 0x2cd   : > { %2594 = vmatpush1.bf16.msra.mxu0 %v6154_v43  ;;  %v6327_v54 = vld [vmem:[%s8694_s7 + $0x230] ss:$8 sps:$4 sm:$0xff]   ;;  %v6332_v55 = vld [vmem:[%s8694_s7 + $0x244] ss:$8 sps:$4 sm:$0xff]   ;;  %v6231_v43 = vld [vmem:[%s8692_s5 + $0x2c0] ss:$8 sps:$4 sm:$0xff]  }
 0x2ce   : > { %2595 = vmatprep.subr.bf16.mxu0 %v6159_v56  ;;  %4887 = vmatpush1.bf16.msra.mxu1 %v6321_v46  ;;  %v6236_v56 = vld [vmem:[%s8692_s5 + $0x2d4] ss:$8 sps:$4 sm:$0xff]   ;;  %v6290_v41 = vld [vmem:[%s8692_s5 + $0x3f0] ss:$8 sps:$4 sm:$0xff]   ;;  %v6293_v44 = vld [vmem:[%s8692_s5 + $0x400] ss:$8 sps:$4 sm:$0xff]  }
 0x2cf   : > { %4888 = vmatprep.subr.bf16.mxu1 %v6326_v47  ;;  %v6292_v40 = vld [vmem:[%s8692_s5 + $0x3f4] ss:$8 sps:$4 sm:$0xff]   ;;  %v6296_v47 = vld [vmem:[%s8692_s5 + $0x410] ss:$8 sps:$4 sm:$0xff]  }
 0x2d0   : > { %v6298_v46 = vld [vmem:[%s8692_s5 + $0x414] ss:$8 sps:$4 sm:$0xff]  }
 0x2d1   : > { %2596 = vmatpush1.bf16.msra.mxu0 %v6157_v57  ;;  %v6330_v57 = vld [vmem:[%s8694_s7 + $0x240] ss:$8 sps:$4 sm:$0xff]  }
 0x2d2   : > { %2597 = vmatprep.subr.bf16.mxu0 %v6162_v58  ;;  %4889 = vmatpush1.bf16.msra.mxu1 %v6324_v50  ;;  %v6335_v58 = vld [vmem:[%s8694_s7 + $0x254] ss:$8 sps:$4 sm:$0xff]  }
 0x2d3   : > { %4890 = vmatprep.subr.bf16.mxu1 %v6329_v51  ;;  %v6304_v50 = vld [vmem:[%s8692_s5 + $0x434] ss:$8 sps:$4 sm:$0xff]   ;;  %v6307_v51 = vld [vmem:[%s8692_s5 + $0x444] ss:$8 sps:$4 sm:$0xff]  }
 0x2d5   : > { %2598 = vmatpush1.bf16.msra.mxu0 %v6160_v59  ;;  %v6234_v59 = vld [vmem:[%s8692_s5 + $0x2d0] ss:$8 sps:$4 sm:$0xff]  }
 0x2d6   : > { %2599 = vmatprep.subr.bf16.mxu0 %v6165_v60  ;;  %4891 = vmatpush1.bf16.msra.mxu1 %v6327_v54  ;;  %v6239_v60 = vld [vmem:[%s8692_s5 + $0x2e4] ss:$8 sps:$4 sm:$0xff]   ;;  %v6308_v54 = vld [vmem:[%s8692_s5 + $0x450] ss:$8 sps:$4 sm:$0xff]  }
 0x2d7   : > { %4892 = vmatprep.subr.bf16.mxu1 %v6332_v55  ;;  %v6313_v55 = vld [vmem:[%s8692_s5 + $0x464] ss:$8 sps:$4 sm:$0xff]  }
 0x2d9   : > { %2600 = vmatpush1.bf16.msra.mxu0 %v6163_v61  ;;  %v6333_v61 = vld [vmem:[%s8694_s7 + $0x250] ss:$8 sps:$4 sm:$0xff]  }
 0x2da   : > { %2601 = vmatprep.subr.bf16.mxu0 %v6168_v63  ;;  %4893 = vmatpush1.bf16.msra.mxu1 %v6330_v57  ;;  %v6338_v63 = vld [vmem:[%s8694_s7 + $0x264] ss:$8 sps:$4 sm:$0xff]   ;;  %v6314_v57 = vld [vmem:[%s8692_s5 + $0x470] ss:$8 sps:$4 sm:$0xff]  }
 0x2db   : > { %4894 = vmatprep.subr.bf16.mxu1 %v6335_v58  ;;  %v6317_v58 = vld [vmem:[#allocation6 + $0x20] ss:$0 sps:$4 sm:$0xff]  }
 0x2dd   : > { %2602 = vmatpush1.bf16.msra.mxu0 %v6166_v0  ;;  %v6237_v0 = vld [vmem:[%s8692_s5 + $0x2e0] ss:$8 sps:$4 sm:$0xff]  }
 0x2de   : > { %2603 = vmatprep.subr.bf16.mxu0 %v6171_v1  ;;  %v6242_v1 = vld [vmem:[%s8692_s5 + $0x2f4] ss:$8 sps:$4 sm:$0xff]   ;;  %4895 = vmatpush1.bf16.msra.mxu1 %v6333_v61 }
 0x2df   : > { %4896 = vmatprep.subr.bf16.mxu1 %v6338_v63  ;;  %v6347_v61 = vld [vmem:[%s8694_s7 + $0x294] ss:$8 sps:$4 sm:$0xff]   ;;  %v6345_v63 = vld [vmem:[%s8694_s7 + $0x290] ss:$8 sps:$4 sm:$0xff]  }
 0x2e1   : > { %2604 = vmatpush1.bf16.msra.mxu0 %v6169_v62  ;;  %v6336_v62 = vld [vmem:[%s8694_s7 + $0x260] ss:$8 sps:$4 sm:$0xff]  }
 0x2e2   : > { %2605 = vmatprep.subr.bf16.mxu0 %v6174_v2  ;;  %v6341_v2 = vld [vmem:[%s8694_s7 + $0x274] ss:$8 sps:$4 sm:$0xff]   ;;  %4897 = vmatpush1.bf16.msra.mxu1 %v6336_v62 }
 0x2e3   : > { %4898 = vmatprep.subr.bf16.mxu1 %v6341_v2  ;;  %v6353_v62 = vld [vmem:[%s8694_s7 + $0x2b4] ss:$8 sps:$4 sm:$0xff]   ;;  %v6351_v2 = vld [vmem:[%s8694_s7 + $0x2b0] ss:$8 sps:$4 sm:$0xff]  }
 0x2e5   : > { %2606 = vmatpush1.bf16.msra.mxu0 %v6172_v4  ;;  %v6240_v4 = vld [vmem:[%s8692_s5 + $0x2f0] ss:$8 sps:$4 sm:$0xff]  }
 0x2e6   : > { %2607 = vmatprep.subr.bf16.mxu0 %v6177_v5  ;;  %v6245_v5 = vld [vmem:[%s8692_s5 + $0x304] ss:$8 sps:$4 sm:$0xff]  }
 0x2e9   : > { %2608 = vmatpush1.bf16.msra.mxu0 %v6175_v6  ;;  %v6339_v6 = vld [vmem:[%s8694_s7 + $0x270] ss:$8 sps:$4 sm:$0xff]  }
 0x2ea   : > { %2609 = vmatprep.subr.bf16.mxu0 %v6180_v7  ;;  %v7578_v7 = vld [vmem:[#allocation6 + $0x18] sm:$0xff]  ;;  %4899 = vmatpush1.bf16.msra.mxu1 %v6339_v6 }
 0x2ed   : > { %2610 = vmatpush1.bf16.msra.mxu0 %v6178_v8  ;;  %v6243_v8 = vld [vmem:[%s8692_s5 + $0x300] ss:$8 sps:$4 sm:$0xff]  }
 0x2ee   : > { %2611 = vmatprep.subr.bf16.mxu0 %v6183_v9  ;;  %v5360_v9 = vcombine.low %v7428_v17, %v7428_v17  ;;  %v6257_v17 = vld [vmem:[%s8692_s5 + $0x340] ss:$8 sps:$4 sm:$0xff]  }
 0x2f1   : > { %2612 = vmatpush1.bf16.msra.mxu0 %v6181_v10  ;;  %v6250_v10 = vld [vmem:[%s8692_s5 + $0x314] ss:$8 sps:$4 sm:$0xff]  }
 0x2f2   : > { %2613 = vmatprep.subr.bf16.mxu0 %v6186_v11  ;;  %v5363_v11 = vcombine.high %v7578_v7, %v7578_v7 }
 0x2f5   : > { %2614 = vmatpush1.bf16.msra.mxu0 %v6184_v12  ;;  %v6248_v12 = vld [vmem:[%s8692_s5 + $0x310] ss:$8 sps:$4 sm:$0xff]  }
 0x2f6   : > { %2615 = vmatprep.subr.bf16.mxu0 %v6189_v13  ;;  %v6253_v13 = vld [vmem:[%s8692_s5 + $0x324] ss:$8 sps:$4 sm:$0xff]  }
 0x2f9   : > { %2616 = vmatpush1.bf16.msra.mxu0 %v6187_v3  ;;  %v6251_v3 = vld [vmem:[%s8692_s5 + $0x320] ss:$8 sps:$4 sm:$0xff]  }
 0x2fa   : > { %2617 = vmatprep.subr.bf16.mxu0 %v6192_v15  ;;  %v6256_v15 = vld [vmem:[%s8692_s5 + $0x334] ss:$8 sps:$4 sm:$0xff]  }
 0x2fd   : > { %2618 = vmatpush1.bf16.msra.mxu0 %v6190_v14  ;;  %v6254_v14 = vld [vmem:[%s8692_s5 + $0x330] ss:$8 sps:$4 sm:$0xff]  }
 0x2fe   : > { %2628 = vmatprep.subr.bf16.mxu0 %v6195_v16  ;;  %v6259_v16 = vld [vmem:[%s8692_s5 + $0x344] ss:$8 sps:$4 sm:$0xff]  }
 0x300   : > { %2620 = vmatmul.mubr.bf16.vlgmr.msra.gmra.mrb[16].mxu0 %v5358_v19  ;;  %v6260_v19 = vld [vmem:[%s8692_s5 + $0x350] ss:$8 sps:$4 sm:$0xff]  }
 0x301   : > { %2629 = vmatpush1.bf16.msra.mxu0 %v6193_v18  ;;  %2660 = vmatprep.mubr.bf16.mxu0 %v5361_v21  ;;  %v6262_v18 = vld [vmem:[%s8692_s5 + $0x354] ss:$8 sps:$4 sm:$0xff]   ;;  %v6263_v21 = vld [vmem:[%s8692_s5 + $0x360] ss:$8 sps:$4 sm:$0xff]  }
 0x302   : > { %2630 = vmatprep.subr.bf16.mxu0 %v6200_v20  ;;  %v6265_v20 = vld [vmem:[%s8692_s5 + $0x364] ss:$8 sps:$4 sm:$0xff]  }
 0x305   : > { %2631 = vmatpush1.bf16.msra.mxu0 %v6198_v22  ;;  %v6268_v22 = vld [vmem:[%s8692_s5 + $0x374] ss:$8 sps:$4 sm:$0xff]  }
 0x306   : > { %2632 = vmatprep.subr.bf16.mxu0 %v6203_v23  ;;  %v6266_v23 = vld [vmem:[%s8692_s5 + $0x370] ss:$8 sps:$4 sm:$0xff]  }
 0x309   : > { %2633 = vmatpush1.bf16.msra.mxu0 %v6201_v24  ;;  %v6271_v24 = vld [vmem:[%s8692_s5 + $0x384] ss:$8 sps:$4 sm:$0xff]  }
 0x30a   : > { %2634 = vmatprep.subr.bf16.mxu0 %v6206_v25  ;;  %v6269_v25 = vld [vmem:[%s8692_s5 + $0x380] ss:$8 sps:$4 sm:$0xff]  }
 0x30d   : > { %2635 = vmatpush1.bf16.msra.mxu0 %v6204_v26  ;;  %v6274_v26 = vld [vmem:[%s8692_s5 + $0x394] ss:$8 sps:$4 sm:$0xff]  }
 0x30e   : > { %2636 = vmatprep.subr.bf16.mxu0 %v6209_v28  ;;  %v6272_v28 = vld [vmem:[%s8692_s5 + $0x390] ss:$8 sps:$4 sm:$0xff]  }
 0x311   : > { %2637 = vmatpush1.bf16.msra.mxu0 %v6207_v29  ;;  %v6277_v29 = vld [vmem:[%s8692_s5 + $0x3a4] ss:$8 sps:$4 sm:$0xff]  }
 0x312   : > { %2638 = vmatprep.subr.bf16.mxu0 %v6212_v30  ;;  %v6275_v30 = vld [vmem:[%s8692_s5 + $0x3a0] ss:$8 sps:$4 sm:$0xff]  }
 0x315   : > { %2639 = vmatpush1.bf16.msra.mxu0 %v6210_v53  ;;  %v6280_v53 = vld [vmem:[%s8692_s5 + $0x3b4] ss:$8 sps:$4 sm:$0xff]  }
 0x316   : > { %2640 = vmatprep.subr.bf16.mxu0 %v6215_v27  ;;  %v6278_v27 = vld [vmem:[%s8692_s5 + $0x3b0] ss:$8 sps:$4 sm:$0xff]  }
 0x319   : > { %2641 = vmatpush1.bf16.msra.mxu0 %v6213_v31  ;;  %v6283_v31 = vld [vmem:[%s8692_s5 + $0x3c4] ss:$8 sps:$4 sm:$0xff]  }
 0x31a   : > { %2642 = vmatprep.subr.bf16.mxu0 %v6218_v33  ;;  %v6281_v33 = vld [vmem:[%s8692_s5 + $0x3c0] ss:$8 sps:$4 sm:$0xff]  }
 0x31d   : > { %2643 = vmatpush1.bf16.msra.mxu0 %v6216_v34  ;;  %v6286_v34 = vld [vmem:[%s8692_s5 + $0x3d4] ss:$8 sps:$4 sm:$0xff]  }
 0x31e   : > { %2644 = vmatprep.subr.bf16.mxu0 %v6221_v36  ;;  %v6284_v36 = vld [vmem:[%s8692_s5 + $0x3d0] ss:$8 sps:$4 sm:$0xff]  }
 0x321   : > { %2645 = vmatpush1.bf16.msra.mxu0 %v6219_v37  ;;  %v6289_v37 = vld [vmem:[%s8692_s5 + $0x3e4] ss:$8 sps:$4 sm:$0xff]  }
 0x322   : > { %2646 = vmatprep.subr.bf16.mxu0 %v6224_v38  ;;  %v6287_v38 = vld [vmem:[%s8692_s5 + $0x3e0] ss:$8 sps:$4 sm:$0xff]  }
 0x325   : > { %2647 = vmatpush1.bf16.msra.mxu0 %v6222_v42  ;;  %v6295_v42 = vld [vmem:[%s8692_s5 + $0x404] ss:$8 sps:$4 sm:$0xff]  }
 0x326   : > { %2648 = vmatprep.subr.bf16.mxu0 %v6227_v45  ;;  %v5362_v45 = vcombine.low %v7578_v7, %v7578_v7 }
 0x329   : > { %2649 = vmatpush1.bf16.msra.mxu0 %v6225_v48  ;;  %v6301_v48 = vld [vmem:[%s8692_s5 + $0x424] ss:$8 sps:$4 sm:$0xff]  }
 0x32a   : > { %2650 = vmatprep.subr.bf16.mxu0 %v6230_v49  ;;  %v6299_v49 = vld [vmem:[%s8692_s5 + $0x420] ss:$8 sps:$4 sm:$0xff]  }
 0x32d   : > { %2651 = vmatpush1.bf16.msra.mxu0 %v6228_v35  ;;  %v6305_v35 = vld [vmem:[%s8692_s5 + $0x440] ss:$8 sps:$4 sm:$0xff]  }
 0x32e   : > { %2652 = vmatprep.subr.bf16.mxu0 %v6233_v52  ;;  %v6310_v52 = vld [vmem:[%s8692_s5 + $0x454] ss:$8 sps:$4 sm:$0xff]  }
 0x331   : > { %2653 = vmatpush1.bf16.msra.mxu0 %v6231_v43  ;;  %v6311_v43 = vld [vmem:[%s8692_s5 + $0x460] ss:$8 sps:$4 sm:$0xff]  }
 0x332   : > { %2654 = vmatprep.subr.bf16.mxu0 %v6236_v56  ;;  %v6316_v56 = vld [vmem:[%s8692_s5 + $0x474] ss:$8 sps:$4 sm:$0xff]  }
 0x335   : > { %2655 = vmatpush1.bf16.msra.mxu0 %v6234_v59  ;;  %v6344_v59 = vld [vmem:[%s8694_s7 + $0x284] ss:$8 sps:$4 sm:$0xff]  }
 0x336   : > { %2656 = vmatprep.subr.bf16.mxu0 %v6239_v60  ;;  %v6342_v60 = vld [vmem:[%s8694_s7 + $0x280] ss:$8 sps:$4 sm:$0xff]   ;;  %4900 = vmatprep.subr.bf16.mxu1 %v6344_v59 }
 0x337   : > { %4901 = vmatpush1.bf16.msra.mxu1 %v6342_v60 }
 0x338   : > { %4902 = vmatprep.subr.bf16.mxu1 %v6347_v61 }
 0x339   : > { %2657 = vmatpush1.bf16.msra.mxu0 %v6237_v0  ;;  %v6348_v0 = vld [vmem:[%s8694_s7 + $0x2a0] ss:$8 sps:$4 sm:$0xff]  }
 0x33a   : > { %2658 = vmatprep.subr.bf16.mxu0 %v6242_v1  ;;  %v6350_v1 = vld [vmem:[%s8694_s7 + $0x2a4] ss:$8 sps:$4 sm:$0xff]  }
 0x33b   : > { %4903 = vmatpush1.bf16.msra.mxu1 %v6345_v63 }
 0x33c   : > { %4904 = vmatprep.subr.bf16.mxu1 %v6350_v1  ;;  %v6467_v1 = vld [vmem:[%s8694_s7 + $0x510] ss:$8 sps:$4 sm:$0xff]  }
 0x33d   : > { %2659 = vmatpush1.bf16.msra.mxu0 %v6240_v4  ;;  %v5512_v4 = vld.sshfl [vmem:[#allocation4] sm:$0x5a pattern:$0x76325410] }
 0x33e   : > { %2669 = vmatprep.subr.bf16.mxu0 %v6245_v5  ;;  %v6356_v5 = vld [vmem:[%s8694_s7 + $0x2c4] ss:$8 sps:$4 sm:$0xff]   ;;  %v2838_v6 = vcombine.high %v5512_v4, %v5512_v4  ;;  %v5513_v7 = vrot.slane %v5512_v4, 9 }
 0x33f   : > { %4905 = vmatpush1.bf16.msra.mxu1 %v6348_v0 }
 0x340   : > { %2661 = vmatmul.mubr.bf16.vlgmr.msra.gmra.mrb[16].mxu0 %v5360_v9  ;;  %4906 = vmatprep.subr.bf16.mxu1 %v6353_v62  ;;  %v2848_v9 = vrot.slane %v2838_v6, 7 }
 0x341   : > { %2670 = vmatpush1.bf16.msra.mxu0 %v6243_v8  ;;  %2701 = vmatprep.mubr.bf16.mxu0 %v5363_v11  ;;  %v6359_v11 = vld [vmem:[%s8694_s7 + $0x2d4] ss:$8 sps:$4 sm:$0xff]  }
 0x342   : > { %2671 = vmatprep.subr.bf16.mxu0 %v6250_v10  ;;  %v6354_v10 = vld [vmem:[%s8694_s7 + $0x2c0] ss:$8 sps:$4 sm:$0xff]  }
 0x343   : > { %4907 = vmatpush1.bf16.msra.mxu1 %v6351_v2 }
 0x344   : > { %4908 = vmatprep.subr.bf16.mxu1 %v6356_v5 }
 0x345   : > { %2672 = vmatpush1.bf16.msra.mxu0 %v6248_v12  ;;  %v2849_v12 = vsel %vm7755_vm0, %v5513_v7, %v2848_v9 }
 0x346   : > { %2673 = vmatprep.subr.bf16.mxu0 %v6253_v13  ;;  %2851 = vst [vmem:[#allocation7 + $0x8] sm:$0xf] %v2849_v12  ;;  %v6357_v13 = vld [vmem:[%s8694_s7 + $0x2d0] ss:$8 sps:$4 sm:$0xff]  }
 0x347   : > { %4909 = vmatpush1.bf16.msra.mxu1 %v6354_v10 }
 0x348   : > { %4910 = vmatprep.subr.bf16.mxu1 %v6359_v11 }
 0x349   : > { %2674 = vmatpush1.bf16.msra.mxu0 %v6251_v3  ;;  %v6362_v3 = vld [vmem:[%s8694_s7 + $0x2e4] ss:$8 sps:$4 sm:$0xff]  }
 0x34a   : > { %2675 = vmatprep.subr.bf16.mxu0 %v6256_v15  ;;  %v6360_v15 = vld [vmem:[%s8694_s7 + $0x2e0] ss:$8 sps:$4 sm:$0xff]  }
 0x34b   : > { %4911 = vmatpush1.bf16.msra.mxu1 %v6357_v13 }
 0x34c   : > { %4912 = vmatprep.subr.bf16.mxu1 %v6362_v3 }
 0x34d   : > { %2676 = vmatpush1.bf16.msra.mxu0 %v6254_v14  ;;  %v6365_v14 = vld [vmem:[%s8694_s7 + $0x2f4] ss:$8 sps:$4 sm:$0xff]  }
 0x34e   : > { %2677 = vmatprep.subr.bf16.mxu0 %v6259_v16  ;;  %v6363_v16 = vld [vmem:[%s8694_s7 + $0x2f0] ss:$8 sps:$4 sm:$0xff]  }
 0x34f   : > { %4913 = vmatpush1.bf16.msra.mxu1 %v6360_v15 }
 0x350   : > { %4914 = vmatprep.subr.bf16.mxu1 %v6365_v14 }
 0x351   : > { %2678 = vmatpush1.bf16.msra.mxu0 %v6257_v17  ;;  %v6368_v17 = vld [vmem:[%s8694_s7 + $0x304] ss:$8 sps:$4 sm:$0xff]  }
 0x352   : > { %2679 = vmatprep.subr.bf16.mxu0 %v6262_v18  ;;  %v1784_v18 = vlaneseq }
 0x353   : > { %4915 = vmatpush1.bf16.msra.mxu1 %v6363_v16 }
 0x354   : > { %4925 = vmatprep.subr.bf16.mxu1 %v6368_v17 }
 0x355   : > { %2680 = vmatpush1.bf16.msra.mxu0 %v6260_v19  ;;  %v7785_v19 = vshrl.u32 %v1784_v18, 7 }
 0x356   : > { %2681 = vmatprep.subr.bf16.mxu0 %v6265_v20 }
 0x357   : > { %v1786_v20 = vsub.s32 0, %v7785_v19 }
 0x359   : > { %2682 = vmatpush1.bf16.msra.mxu0 %v6263_v21  ;;  %v1782_v21 = vld [vmem:[%s8693_s6] sm:$0x3] }
 0x35a   : > { %2683 = vmatprep.subr.bf16.mxu0 %v6268_v22  ;;  %v1790_v22 = vsub.s32 1, %v7785_v19 }
 0x35d   : > { %2684 = vmatpush1.bf16.msra.mxu0 %v6266_v23  ;;  %v1787_v23 = vrot.slane %v1782_v21, %v1786_v20 }
 0x35e   : > { %2685 = vmatprep.subr.bf16.mxu0 %v6271_v24  ;;  %v1791_v24 = vrot.slane %v1782_v21, %v1790_v22 }
 0x361   : > { %2686 = vmatpush1.bf16.msra.mxu0 %v6269_v25 }
 0x362   : > { %2687 = vmatprep.subr.bf16.mxu0 %v6274_v26 }
 0x365   : > { %2688 = vmatpush1.bf16.msra.mxu0 %v6272_v28 }
 0x366   : > { %2689 = vmatprep.subr.bf16.mxu0 %v6277_v29 }
 0x369   : > { %2690 = vmatpush1.bf16.msra.mxu0 %v6275_v30 }
 0x36a   : > { %2691 = vmatprep.subr.bf16.mxu0 %v6280_v53 }
 0x36d   : > { %2692 = vmatpush1.bf16.msra.mxu0 %v6278_v27 }
 0x36e   : > { %2693 = vmatprep.subr.bf16.mxu0 %v6283_v31 }
 0x371   : > { %2694 = vmatpush1.bf16.msra.mxu0 %v6281_v33 }
 0x372   : > { %2695 = vmatprep.subr.bf16.mxu0 %v6286_v34 }
 0x375   : > { %2696 = vmatpush1.bf16.msra.mxu0 %v6284_v36 }
 0x376   : > { %2697 = vmatprep.subr.bf16.mxu0 %v6289_v37 }
 0x379   : > { %2698 = vmatpush1.bf16.msra.mxu0 %v6287_v38 }
 0x37a   : > { %2699 = vmatprep.subr.bf16.mxu0 %v6292_v40 }
 0x37d   : > { %2700 = vmatpush1.bf16.msra.mxu0 %v6290_v41  ;;  %v2773_v41 = vld [vmem:[#allocation4 + $0x8] sm:$0x77] }
 0x37e   : > { %2710 = vmatprep.subr.bf16.mxu0 %v6295_v42 }
 0x380   : > { %2702 = vmatmul.mubr.bf16.vlgmr.msra.gmra.mrb[16].mxu0 %v5362_v45  ;;  %v2782_v45 = vld [vmem:[#allocation4 + $0x10] sm:$0x77] }
 0x381   : > { %2711 = vmatpush1.bf16.msra.mxu0 %v6293_v44  ;;  %2742 = vmatprep.mubr.bf16.mxu0 %v6819_v32  ;;  %v6302_v32 = vld [vmem:[%s8692_s5 + $0x430] ss:$8 sps:$4 sm:$0xff]  }
 0x382   : > { %2712 = vmatprep.subr.bf16.mxu0 %v6298_v46 }
 0x385   : > { %2713 = vmatpush1.bf16.msra.mxu0 %v6296_v47 }
 0x386   : > { %2714 = vmatprep.subr.bf16.mxu0 %v6301_v48 }
 0x389   : > { %2715 = vmatpush1.bf16.msra.mxu0 %v6299_v49  ;;  %v6820_v49 = vmov 1983009808  }
 0x38a   : > { %2716 = vmatprep.subr.bf16.mxu0 %v6304_v50  ;;  %v3270_v50 = vunpack.c.l.s4 %v6820_v49  ;;  %v6391_v49 = vld [vmem:[%s8694_s7 + $0x380] ss:$8 sps:$4 sm:$0xff]  }
 0x38d   : > { %2717 = vmatpush1.bf16.msra.mxu0 %v6302_v32 }
 0x38e   : > { %2718 = vmatprep.subr.bf16.mxu0 %v6307_v51 }
 0x391   : > { %2719 = vmatpush1.bf16.msra.mxu0 %v6305_v35 }
 0x392   : > { %2720 = vmatprep.subr.bf16.mxu0 %v6310_v52 }
 0x395   : > { %2721 = vmatpush1.bf16.msra.mxu0 %v6308_v54  ;;  %v3271_v54 = vunpack.c.0.s8 %v3270_v50  ;;  %v6396_v50 = vld [vmem:[%s8694_s7 + $0x394] ss:$8 sps:$4 sm:$0xff]  }
 0x396   : > { %2722 = vmatprep.subr.bf16.mxu0 %v6313_v55 }
 0x397   : > { %v7799_v0 = vsub.s32 %v3271_v54, %v7785_v19  ;;  %v6405_v54 = vld [vmem:[%s8694_s7 + $0x3c4] ss:$8 sps:$4 sm:$0xff]  }
 0x399   : > { %2723 = vmatpush1.bf16.msra.mxu0 %v6311_v43 }
 0x39a   : > { %2724 = vmatprep.subr.bf16.mxu0 %v6316_v56 }
 0x39d   : > { %2725 = vmatpush1.bf16.msra.mxu0 %v6314_v57 }
 0x3a0   : > { %2743 = vmatmul.mubr.bf16.vlgmr.msra.gmra.mrb[16].mxu0 %v6317_v58 }
 0x473   : > { %v2744_v25 = vpop.f32.mrb[16].mxu0 }
 0x474   : > { %v5922_v26 = vadd.f32 %v2744_v25, %v1787_v23  ;;  %v2746_v28 = vpop.f32.mrb[17].mxu0 }
 0x475   : > { %v5923_v29 = vadd.f32 %v2746_v28, %v1791_v24  ;;  %v2748_v30 = vpop.f32.mrb[18].mxu0  ;;  %v6366_v24 = vld [vmem:[%s8694_s7 + $0x300] ss:$8 sps:$4 sm:$0xff]  }
 0x476   : > { %v2751_v53 = vmax.f32 %v5922_v26, 0.0  ;;  %v2749_v27 = vpop.f32.mrb[19].mxu0 }
 0x477   : > { %v2752_v31 = vmax.f32 %v5923_v29, 0.0  ;;  %v6372_v29 = vld [vmem:[%s8694_s7 + $0x314] ss:$8 sps:$4 sm:$0xff]  }
 0x479   : > { %v5827_v33 = vpack.c.bf16 %v2752_v31, %v2751_v53  ;;  %v6370_v31 = vld [vmem:[%s8694_s7 + $0x310] ss:$8 sps:$4 sm:$0xff]  }
 0x47b   : > { %v2761_v34 = vshrl.u32 %v5827_v33, 16  ;;  %v2764_v36 = vshll.u32 %v5827_v33, 16  ;;  %v6375_v33 = vld [vmem:[%s8694_s7 + $0x324] ss:$8 sps:$4 sm:$0xff]  }
 0x47d   : > { %v2763_v37 = vrot.slane %v2761_v34, 7  ;;  %v2776_v38 = vrot.slane %v2761_v34, 5  ;;  %v2777_v40 = vrot.slane %v2764_v36, 6  ;;  %v6373_v34 = vld [vmem:[%s8694_s7 + $0x320] ss:$8 sps:$4 sm:$0xff]  }
 0x47f   : > { %v2766_v42 = vor.u32 %v2764_v36, %v2763_v37  ;;  %v2778_v44 = vor.u32 %v2777_v40, %v2776_v38  ;;  %v6378_v36 = vld [vmem:[%s8694_s7 + $0x334] ss:$8 sps:$4 sm:$0xff]   ;;  %v6376_v37 = vld [vmem:[%s8694_s7 + $0x330] ss:$8 sps:$4 sm:$0xff]   ;;  %v6381_v38 = vld [vmem:[%s8694_s7 + $0x344] ss:$8 sps:$4 sm:$0xff]  }
 0x480   : > { %v6379_v40 = vld [vmem:[%s8694_s7 + $0x340] ss:$8 sps:$4 sm:$0xff]  }
 0x481   : > { %v2774_v46 = vsel %vm2772_vm4, %v2766_v42, %v2773_v41  ;;  %v2779_v47 = vrot.slane %v2778_v44, 4  ;;  %v6384_v41 = vld [vmem:[%s8694_s7 + $0x354] ss:$8 sps:$4 sm:$0xff]   ;;  %v6382_v42 = vld [vmem:[%s8694_s7 + $0x350] ss:$8 sps:$4 sm:$0xff]  }
 0x482   : > { %2775 = vst [vmem:[#allocation4 + $0x8] sm:$0x77] %v2774_v46  ;;  %v6387_v44 = vld [vmem:[%s8694_s7 + $0x364] ss:$8 sps:$4 sm:$0xff]   ;;  %v6390_v46 = vld [vmem:[%s8694_s7 + $0x374] ss:$8 sps:$4 sm:$0xff]  }
 0x483   : > { %v2783_v48 = vsel %vm2772_vm4, %v2779_v47, %v2782_v45  ;;  %v6385_v45 = vld [vmem:[%s8694_s7 + $0x360] ss:$8 sps:$4 sm:$0xff]   ;;  %v6388_v47 = vld [vmem:[%s8694_s7 + $0x370] ss:$8 sps:$4 sm:$0xff]  }
 0x484   : > { %2784 = vst [vmem:[#allocation4 + $0x10] sm:$0x77] %v2783_v48  ;;  %v6393_v48 = vld [vmem:[%s8694_s7 + $0x384] ss:$8 sps:$4 sm:$0xff]  }
 0x489   : > { %v5515_v32 = vld.sshfl [vmem:[#allocation4 + $0x8] sm:$0x5f pattern:$0x76325410] }
 0x48a   : > { %v5514_v51 = vld.sshfl [vmem:[#allocation4 + $0x8] sm:$0xf pattern:$0x76325410]  ;;  %v2872_v35 = vcombine.high %v5515_v32, %v5515_v32  ;;  %v2874_v39 = vshrl.u32 %v5515_v32, 16  ;;  %v2877_v52 = vshll.u32 %v5515_v32, 16 }
 0x48b   : > { %2862 = vst [vmem:[#allocation7 + $0xc] sm:$0xf] %v5514_v51  ;;  %v5516_v55 = vld.sshfl [vmem:[#allocation4 + $0x8] sm:$0x5a pattern:$0x76325410] }
 0x48c   : > { %v2876_v43 = vrot.slane %v2874_v39, 6  ;;  %v2879_v56 = vrot.slane %v2877_v52, 7  ;;  %v2883_v57 = vshll.u32 %v2872_v35, 16  ;;  %v2898_v58 = vcombine.high %v5516_v55, %v5516_v55  ;;  %v6394_v32 = vld [vmem:[%s8694_s7 + $0x390] ss:$8 sps:$4 sm:$0xff]  }
 0x48d   : > { %v5517_v60 = vrot.slane %v5516_v55, 9  ;;  %v5518_v63 = vld.sshfl [vmem:[#allocation4 + $0x10] sm:$0xf pattern:$0x76325410] }
 0x48e   : > { %v2880_v59 = vor.u32 %v2879_v56, %v2876_v43  ;;  %v2901_v61 = vrot.slane %v2898_v58, 7  ;;  %v2885_v62 = vrot.slane %v2883_v57, 7  ;;  %2915 = vst [vmem:[#allocation7 + $0x18] sm:$0xf] %v5518_v63  ;;  %v6399_v51 = vld [vmem:[%s8694_s7 + $0x3a4] ss:$8 sps:$4 sm:$0xff]  }
 0x48f   : > { %v5519_v2 = vld.sshfl [vmem:[#allocation4 + $0x10] sm:$0x5f pattern:$0x76325410]  ;;  %v6397_v35 = vld [vmem:[%s8694_s7 + $0x3a0] ss:$8 sps:$4 sm:$0xff]  }
 0x490   : > { %v2881_v4 = vrot.slane %v2880_v59, 2  ;;  %v2902_v5 = vsel %vm7755_vm0, %v5517_v60, %v2901_v61  ;;  %v2925_v6 = vcombine.high %v5519_v2, %v5519_v2  ;;  %v2927_v7 = vshrl.u32 %v5519_v2, 16  ;;  %v5520_v9 = vld.sshfl [vmem:[#allocation4 + $0x10] sm:$0x5a pattern:$0x76325410] }
 0x491   : > { %2904 = vst [vmem:[#allocation7 + $0x14] sm:$0xf] %v2902_v5  ;;  %v2930_v10 = vshll.u32 %v5519_v2, 16  ;;  %v2951_v11 = vcombine.high %v5520_v9, %v5520_v9  ;;  %v5521_v14 = vrot.slane %v5520_v9, 9  ;;  %v6402_v39 = vld [vmem:[%s8694_s7 + $0x3b4] ss:$8 sps:$4 sm:$0xff]  }
 0x492   : > { %v2959_v12 = vld [vmem:[#allocation7 + $0x8] sm:$0xff]  ;;  %v2886_v13 = vsel %vm7801_vm11, %v2881_v4, %v2885_v62  ;;  %v2929_v3 = vrot.slane %v2927_v7, 6  ;;  %v2936_v15 = vshll.u32 %v2925_v6, 16  ;;  %v6400_v52 = vld [vmem:[%s8694_s7 + $0x3b0] ss:$8 sps:$4 sm:$0xff]  }
 0x493   : > { %v3292_v16 = vrot.slane %v2959_v12, %v7799_v0  ;;  %v3285_v17 = vcombine.high %v2959_v12, %v2959_v12  ;;  %2888 = vst [vmem:[#allocation7 + $0x10] sm:$0xf] %v2886_v13  ;;  %v2932_v18 = vrot.slane %v2930_v10, 7  ;;  %v2954_v21 = vrot.slane %v2951_v11, 7  ;;  %v6403_v55 = vld [vmem:[%s8694_s7 + $0x3c0] ss:$8 sps:$4 sm:$0xff]  }
 0x494   : > { %v2938_v27 = vrot.slane %v2936_v15, 7  ;;  %v6408_v43 = vld [vmem:[%s8694_s7 + $0x3d4] ss:$8 sps:$4 sm:$0xff]   ;;  %v6406_v56 = vld [vmem:[%s8694_s7 + $0x3d0] ss:$8 sps:$4 sm:$0xff]  }
 0x495   : > { %v3300_v23 = vcombine.high %v3292_v16, %v3292_v16  ;;  %v7814_v25 = vrot.slane %v3285_v17, %v7799_v0  ;;  %v2933_v26 = vor.u32 %v2932_v18, %v2929_v3  ;;  %v2955_v28 = vsel %vm7755_vm0, %v5521_v14, %v2954_v21  ;;  %v6411_v57 = vld [vmem:[%s8694_s7 + $0x3e4] ss:$8 sps:$4 sm:$0xff]   ;;  %v6409_v58 = vld [vmem:[%s8694_s7 + $0x3e0] ss:$8 sps:$4 sm:$0xff]   ;;  %v6414_v59 = vld [vmem:[%s8694_s7 + $0x3f4] ss:$8 sps:$4 sm:$0xff]  }
 0x496   : > { %2957 = vst [vmem:[#allocation7 + $0x20] sm:$0xf] %v2955_v28  ;;  %v6412_v61 = vld [vmem:[%s8694_s7 + $0x3f0] ss:$8 sps:$4 sm:$0xff]   ;;  %v6509_v63 = vld [vmem:[%s8694_s7] ss:$8 sps:$4 sm:$0xff]  }
 0x497   : > { %4916 = vmatprep.mubr.bf16.mxu1 %v3300_v23  ;;  %v3301_v30 = vcombine.high %v7814_v25, %v7814_v25  ;;  %v2934_v53 = vrot.slane %v2933_v26, 2  ;;  %v6511_v62 = vld [vmem:[%s8694_s7 + $0x4] ss:$8 sps:$4 sm:$0xff]   ;;  %v6415_v5 = vld [vmem:[%s8694_s7 + $0x400] ss:$8 sps:$4 sm:$0xff]  }
 0x498   : > { %4917 = vmatmul.mubr.bf16.vlgmr.msra.gmra.mrb[4].mxu1 %v3292_v16  ;;  %v6417_v2 = vld [vmem:[%s8694_s7 + $0x404] ss:$8 sps:$4 sm:$0xff]   ;;  %4802 = vmatprep.subr.bf16.mxu0 %v6511_v62  ;;  %v6515_v6 = vld [vmem:[%s8694_s7 + $0x10] ss:$8 sps:$4 sm:$0xff]   ;;  %v6517_v7 = vld [vmem:[%s8694_s7 + $0x14] ss:$8 sps:$4 sm:$0xff]  }
 0x499   : > { %4926 = vmatpush1.bf16.msra.mxu1 %v6366_v24  ;;  %4957 = vmatprep.mubr.bf16.mxu1 %v3301_v30  ;;  %v2939_v8 = vsel %vm7801_vm11, %v2934_v53, %v2938_v27  ;;  %v6420_v9 = vld [vmem:[%s8694_s7 + $0x414] ss:$8 sps:$4 sm:$0xff]   ;;  %v6418_v11 = vld [vmem:[%s8694_s7 + $0x410] ss:$8 sps:$4 sm:$0xff]   ;;  %v6521_v12 = vld [vmem:[%s8694_s7 + $0x20] ss:$8 sps:$4 sm:$0xff]  }
 0x49a   : > { %4927 = vmatprep.subr.bf16.mxu1 %v6372_v29  ;;  %2941 = vst [vmem:[#allocation7 + $0x1c] sm:$0xf] %v2939_v8  ;;  %v7909_v60 = vld [vmem:[#allocation7 + $0x10] sm:$0xff]  ;;  %4803 = vmatpush1.bf16.msra.mxu0 %v6509_v63  ;;  %v6527_v14 = vld [vmem:[%s8694_s7 + $0x30] ss:$8 sps:$4 sm:$0xff]  }
 0x49b   : > { %v7925_v4 = vrot.slane %v7909_v60, %v7799_v0  ;;  %4804 = vmatprep.subr.bf16.mxu0 %v6517_v7  ;;  %v6523_v13 = vld [vmem:[%s8694_s7 + $0x24] ss:$8 sps:$4 sm:$0xff]   ;;  %v6421_v15 = vld [vmem:[%s8694_s7 + $0x420] ss:$8 sps:$4 sm:$0xff]   ;;  %v6529_v16 = vld [vmem:[%s8694_s7 + $0x34] ss:$8 sps:$4 sm:$0xff]  }
 0x49c   : > { %v6423_v3 = vld [vmem:[%s8694_s7 + $0x424] ss:$8 sps:$4 sm:$0xff]   ;;  %v6426_v17 = vld [vmem:[%s8694_s7 + $0x434] ss:$8 sps:$4 sm:$0xff]   ;;  %v6424_v18 = vld [vmem:[%s8694_s7 + $0x430] ss:$8 sps:$4 sm:$0xff]  }
 0x49d   : > { %4928 = vmatpush1.bf16.msra.mxu1 %v6370_v31  ;;  %v3317_v10 = vcombine.high %v7925_v4, %v7925_v4  ;;  %v6533_v21 = vld [vmem:[%s8694_s7 + $0x40] ss:$8 sps:$4 sm:$0xff]   ;;  %v6535_v23 = vld [vmem:[%s8694_s7 + $0x44] ss:$8 sps:$4 sm:$0xff]   ;;  %v6539_v26 = vld [vmem:[%s8694_s7 + $0x50] ss:$8 sps:$4 sm:$0xff]  }
 0x49e   : > { %4929 = vmatprep.subr.bf16.mxu1 %v6375_v33  ;;  %4805 = vmatpush1.bf16.msra.mxu0 %v6515_v6  ;;  %v6429_v24 = vld [vmem:[%s8694_s7 + $0x444] ss:$8 sps:$4 sm:$0xff]   ;;  %v6541_v28 = vld [vmem:[%s8694_s7 + $0x54] ss:$8 sps:$4 sm:$0xff]   ;;  %v6430_v30 = vld [vmem:[%s8694_s7 + $0x450] ss:$8 sps:$4 sm:$0xff]  }
 0x49f   : > { %4806 = vmatprep.subr.bf16.mxu0 %v6523_v13  ;;  %v6432_v29 = vld [vmem:[%s8694_s7 + $0x454] ss:$8 sps:$4 sm:$0xff]   ;;  %v6545_v53 = vld [vmem:[%s8694_s7 + $0x60] ss:$8 sps:$4 sm:$0xff]   ;;  %v6547_v27 = vld [vmem:[%s8694_s7 + $0x64] ss:$8 sps:$4 sm:$0xff]  }
 0x4a0   : > { %v6435_v31 = vld [vmem:[%s8694_s7 + $0x464] ss:$8 sps:$4 sm:$0xff]   ;;  %v6433_v8 = vld [vmem:[%s8694_s7 + $0x460] ss:$8 sps:$4 sm:$0xff]   ;;  %v6551_v33 = vld [vmem:[%s8694_s7 + $0x70] ss:$8 sps:$4 sm:$0xff]  }
 0x4a1   : > { %4930 = vmatpush1.bf16.msra.mxu1 %v6373_v34  ;;  %v6553_v34 = vld [vmem:[%s8694_s7 + $0x74] ss:$8 sps:$4 sm:$0xff]   ;;  %v6593_v63 = vld [vmem:[%s8694_s7 + $0xe0] ss:$8 sps:$4 sm:$0xff]   ;;  %v6595_v62 = vld [vmem:[%s8694_s7 + $0xe4] ss:$8 sps:$4 sm:$0xff]  }
 0x4a2   : > { %4931 = vmatprep.subr.bf16.mxu1 %v6378_v36  ;;  %4807 = vmatpush1.bf16.msra.mxu0 %v6521_v12  ;;  %v6438_v36 = vld [vmem:[%s8694_s7 + $0x474] ss:$8 sps:$4 sm:$0xff]  }
 0x4a3   : > { %4808 = vmatprep.subr.bf16.mxu0 %v6529_v16  ;;  %v6462_v13 = vld [vmem:[%s8694_s7 + $0x4f4] ss:$8 sps:$4 sm:$0xff]  }
 0x4a5   : > { %4932 = vmatpush1.bf16.msra.mxu1 %v6376_v37  ;;  %v6436_v37 = vld [vmem:[%s8694_s7 + $0x470] ss:$8 sps:$4 sm:$0xff]  }
 0x4a6   : > { %4933 = vmatprep.subr.bf16.mxu1 %v6381_v38  ;;  %4809 = vmatpush1.bf16.msra.mxu0 %v6527_v14  ;;  %v6557_v38 = vld [vmem:[%s8694_s7 + $0x80] ss:$8 sps:$4 sm:$0xff]   ;;  %v3302_v14 = vcombine.high %v7909_v60, %v7909_v60  ;;  %v6607_v60 = vld [vmem:[%s8694_s7 + $0x104] ss:$8 sps:$4 sm:$0xff]  }
 0x4a7   : > { %4810 = vmatprep.subr.bf16.mxu0 %v6535_v23 }
 0x4a9   : > { %4934 = vmatpush1.bf16.msra.mxu1 %v6379_v40  ;;  %v6559_v40 = vld [vmem:[%s8694_s7 + $0x84] ss:$8 sps:$4 sm:$0xff]  }
 0x4aa   : > { %4935 = vmatprep.subr.bf16.mxu1 %v6384_v41  ;;  %4811 = vmatpush1.bf16.msra.mxu0 %v6533_v21  ;;  %v6441_v41 = vld [vmem:[%s8694_s7 + $0x484] ss:$8 sps:$4 sm:$0xff]  }
 0x4ab   : > { %4812 = vmatprep.subr.bf16.mxu0 %v6541_v28  ;;  %v5510_v21 = vld.sshfl [vmem:[#allocation4] sm:$0xf pattern:$0x76325410] }
 0x4ac   : > { %2795 = vst [vmem:[#allocation7] sm:$0xf] %v5510_v21  ;;  %v6508_v21 = vld [vmem:[%s8694_s7 + $0x5e4] ss:$8 sps:$4 sm:$0xff]  }
 0x4ad   : > { %4936 = vmatpush1.bf16.msra.mxu1 %v6382_v42  ;;  %v6439_v42 = vld [vmem:[%s8694_s7 + $0x480] ss:$8 sps:$4 sm:$0xff]  }
 0x4ae   : > { %4937 = vmatprep.subr.bf16.mxu1 %v6387_v44  ;;  %4813 = vmatpush1.bf16.msra.mxu0 %v6539_v26  ;;  %v6563_v44 = vld [vmem:[%s8694_s7 + $0x90] ss:$8 sps:$4 sm:$0xff]   ;;  %v8122_v26 = vrot.slane %v3302_v14, %v7799_v0  ;;  %v6505_v14 = vld [vmem:[%s8694_s7 + $0x5d4] ss:$8 sps:$4 sm:$0xff]  }
 0x4af   : > { %4814 = vmatprep.subr.bf16.mxu0 %v6547_v27  ;;  %v6472_v27 = vld [vmem:[%s8694_s7 + $0x524] ss:$8 sps:$4 sm:$0xff]  }
 0x4b1   : > { %4938 = vmatpush1.bf16.msra.mxu1 %v6385_v45  ;;  %v6565_v45 = vld [vmem:[%s8694_s7 + $0x94] ss:$8 sps:$4 sm:$0xff]  }
 0x4b2   : > { %4939 = vmatprep.subr.bf16.mxu1 %v6390_v46  ;;  %4815 = vmatpush1.bf16.msra.mxu0 %v6545_v53  ;;  %v6444_v46 = vld [vmem:[%s8694_s7 + $0x494] ss:$8 sps:$4 sm:$0xff]   ;;  %v3318_v53 = vcombine.high %v8122_v26, %v8122_v26 }
 0x4b3   : > { %4816 = vmatprep.subr.bf16.mxu0 %v6553_v34 }
 0x4b5   : > { %4940 = vmatpush1.bf16.msra.mxu1 %v6388_v47  ;;  %v6442_v47 = vld [vmem:[%s8694_s7 + $0x490] ss:$8 sps:$4 sm:$0xff]  }
 0x4b6   : > { %4941 = vmatprep.subr.bf16.mxu1 %v6393_v48  ;;  %4817 = vmatpush1.bf16.msra.mxu0 %v6551_v33  ;;  %v6569_v48 = vld [vmem:[%s8694_s7 + $0xa0] ss:$8 sps:$4 sm:$0xff]   ;;  %v6475_v33 = vld [vmem:[%s8694_s7 + $0x534] ss:$8 sps:$4 sm:$0xff]  }
 0x4b7   : > { %4818 = vmatprep.subr.bf16.mxu0 %v6559_v40  ;;  %v6478_v40 = vld [vmem:[%s8694_s7 + $0x544] ss:$8 sps:$4 sm:$0xff]  }
 0x4b9   : > { %4942 = vmatpush1.bf16.msra.mxu1 %v6391_v49  ;;  %v6571_v49 = vld [vmem:[%s8694_s7 + $0xa4] ss:$8 sps:$4 sm:$0xff]  }
 0x4ba   : > { %4943 = vmatprep.subr.bf16.mxu1 %v6396_v50  ;;  %4819 = vmatpush1.bf16.msra.mxu0 %v6557_v38  ;;  %v6447_v50 = vld [vmem:[%s8694_s7 + $0x4a4] ss:$8 sps:$4 sm:$0xff]   ;;  %v6473_v38 = vld [vmem:[%s8694_s7 + $0x530] ss:$8 sps:$4 sm:$0xff]  }
 0x4bb   : > { %4820 = vmatprep.subr.bf16.mxu0 %v6565_v45  ;;  %v6481_v45 = vld [vmem:[%s8694_s7 + $0x554] ss:$8 sps:$4 sm:$0xff]  }
 0x4bd   : > { %4944 = vmatpush1.bf16.msra.mxu1 %v6394_v32  ;;  %v6445_v32 = vld [vmem:[%s8694_s7 + $0x4a0] ss:$8 sps:$4 sm:$0xff]  }
 0x4be   : > { %4945 = vmatprep.subr.bf16.mxu1 %v6399_v51  ;;  %4821 = vmatpush1.bf16.msra.mxu0 %v6563_v44  ;;  %v6575_v51 = vld [vmem:[%s8694_s7 + $0xb0] ss:$8 sps:$4 sm:$0xff]   ;;  %v6476_v44 = vld [vmem:[%s8694_s7 + $0x540] ss:$8 sps:$4 sm:$0xff]  }
 0x4bf   : > { %4822 = vmatprep.subr.bf16.mxu0 %v6571_v49  ;;  %v6484_v49 = vld [vmem:[%s8694_s7 + $0x564] ss:$8 sps:$4 sm:$0xff]  }
 0x4c1   : > { %4946 = vmatpush1.bf16.msra.mxu1 %v6397_v35  ;;  %v6577_v35 = vld [vmem:[%s8694_s7 + $0xb4] ss:$8 sps:$4 sm:$0xff]  }
 0x4c2   : > { %4947 = vmatprep.subr.bf16.mxu1 %v6402_v39  ;;  %4823 = vmatpush1.bf16.msra.mxu0 %v6569_v48  ;;  %v6450_v39 = vld [vmem:[%s8694_s7 + $0x4b4] ss:$8 sps:$4 sm:$0xff]   ;;  %v6479_v48 = vld [vmem:[%s8694_s7 + $0x550] ss:$8 sps:$4 sm:$0xff]  }
 0x4c3   : > { %4824 = vmatprep.subr.bf16.mxu0 %v6577_v35  ;;  %v6487_v35 = vld [vmem:[%s8694_s7 + $0x574] ss:$8 sps:$4 sm:$0xff]  }
 0x4c5   : > { %4948 = vmatpush1.bf16.msra.mxu1 %v6400_v52  ;;  %v6448_v52 = vld [vmem:[%s8694_s7 + $0x4b0] ss:$8 sps:$4 sm:$0xff]  }
 0x4c6   : > { %4949 = vmatprep.subr.bf16.mxu1 %v6405_v54  ;;  %4825 = vmatpush1.bf16.msra.mxu0 %v6575_v51  ;;  %v6581_v54 = vld [vmem:[%s8694_s7 + $0xc0] ss:$8 sps:$4 sm:$0xff]  }
 0x4c7   : > { %v6482_v51 = vld [vmem:[%s8694_s7 + $0x560] ss:$8 sps:$4 sm:$0xff]  }
 0x4c9   : > { %4950 = vmatpush1.bf16.msra.mxu1 %v6403_v55  ;;  %v6583_v55 = vld [vmem:[%s8694_s7 + $0xc4] ss:$8 sps:$4 sm:$0xff]  }
 0x4ca   : > { %4951 = vmatprep.subr.bf16.mxu1 %v6408_v43  ;;  %v6453_v43 = vld [vmem:[%s8694_s7 + $0x4c4] ss:$8 sps:$4 sm:$0xff]   ;;  %4826 = vmatprep.subr.bf16.mxu0 %v6583_v55 }
 0x4cb   : > { %4827 = vmatpush1.bf16.msra.mxu0 %v6581_v54  ;;  %v6485_v54 = vld [vmem:[%s8694_s7 + $0x570] ss:$8 sps:$4 sm:$0xff]   ;;  %v6490_v55 = vld [vmem:[%s8694_s7 + $0x584] ss:$8 sps:$4 sm:$0xff]  }
 0x4cd   : > { %4952 = vmatpush1.bf16.msra.mxu1 %v6406_v56  ;;  %v6451_v56 = vld [vmem:[%s8694_s7 + $0x4c0] ss:$8 sps:$4 sm:$0xff]  }
 0x4ce   : > { %4953 = vmatprep.subr.bf16.mxu1 %v6411_v57  ;;  %v6587_v57 = vld [vmem:[%s8694_s7 + $0xd0] ss:$8 sps:$4 sm:$0xff]  }
 0x4d1   : > { %4954 = vmatpush1.bf16.msra.mxu1 %v6409_v58  ;;  %v6589_v58 = vld [vmem:[%s8694_s7 + $0xd4] ss:$8 sps:$4 sm:$0xff]  }
 0x4d2   : > { %4955 = vmatprep.subr.bf16.mxu1 %v6414_v59  ;;  %v6456_v59 = vld [vmem:[%s8694_s7 + $0x4d4] ss:$8 sps:$4 sm:$0xff]   ;;  %4828 = vmatprep.subr.bf16.mxu0 %v6589_v58 }
 0x4d3   : > { %4829 = vmatpush1.bf16.msra.mxu0 %v6587_v57  ;;  %v6488_v57 = vld [vmem:[%s8694_s7 + $0x580] ss:$8 sps:$4 sm:$0xff]   ;;  %v6493_v58 = vld [vmem:[%s8694_s7 + $0x594] ss:$8 sps:$4 sm:$0xff]  }
 0x4d4   : > { %4830 = vmatprep.subr.bf16.mxu0 %v6595_v62  ;;  %v6496_v62 = vld [vmem:[%s8694_s7 + $0x5a4] ss:$8 sps:$4 sm:$0xff]  }
 0x4d5   : > { %4956 = vmatpush1.bf16.msra.mxu1 %v6412_v61  ;;  %v6454_v61 = vld [vmem:[%s8694_s7 + $0x4d0] ss:$8 sps:$4 sm:$0xff]  }
 0x4d6   : > { %4966 = vmatprep.subr.bf16.mxu1 %v6417_v2  ;;  %v6459_v2 = vld [vmem:[%s8694_s7 + $0x4e4] ss:$8 sps:$4 sm:$0xff]  }
 0x4d7   : > { %4831 = vmatpush1.bf16.msra.mxu0 %v6593_v63  ;;  %v6491_v63 = vld [vmem:[%s8694_s7 + $0x590] ss:$8 sps:$4 sm:$0xff]  }
 0x4d8   : > { %4958 = vmatmul.mubr.bf16.vlgmr.msra.gmra.mrb[4].mxu1 %v7814_v25  ;;  %v6427_v25 = vld [vmem:[%s8694_s7 + $0x440] ss:$8 sps:$4 sm:$0xff]  }
 0x4d9   : > { %4967 = vmatpush1.bf16.msra.mxu1 %v6415_v5  ;;  %4998 = vmatprep.mubr.bf16.mxu1 %v3317_v10  ;;  %v5511_v5 = vld.sshfl [vmem:[#allocation4] sm:$0x5f pattern:$0x76325410]  ;;  %v6599_v10 = vld [vmem:[%s8694_s7 + $0xf0] ss:$8 sps:$4 sm:$0xff]  }
 0x4da   : > { %4968 = vmatprep.subr.bf16.mxu1 %v6420_v9  ;;  %v2814_v6 = vshrl.u32 %v5511_v5, 16  ;;  %v2817_v7 = vshll.u32 %v5511_v5, 16  ;;  %v6457_v9 = vld [vmem:[%s8694_s7 + $0x4e0] ss:$8 sps:$4 sm:$0xff]   ;;  %v2805_v12 = vcombine.high %v5511_v5, %v5511_v5  ;;  %v6656_v5 = vld [vmem:[%s8694_s7 + $0x184] ss:$8 sps:$4 sm:$0xff]  }
 0x4dc   : > { %v2823_v16 = vshll.u32 %v2805_v12, 16  ;;  %v6502_v12 = vld [vmem:[%s8694_s7 + $0x5c4] ss:$8 sps:$4 sm:$0xff]  }
 0x4dd   : > { %4969 = vmatpush1.bf16.msra.mxu1 %v6418_v11  ;;  %v6601_v11 = vld [vmem:[%s8694_s7 + $0xf4] ss:$8 sps:$4 sm:$0xff]  }
 0x4de   : > { %4970 = vmatprep.subr.bf16.mxu1 %v6423_v3  ;;  %v2816_v3 = vrot.slane %v2814_v6, 6  ;;  %4832 = vmatprep.subr.bf16.mxu0 %v6601_v11  ;;  %v2825_v23 = vrot.slane %v2823_v16, 7  ;;  %v6494_v6 = vld [vmem:[%s8694_s7 + $0x5a0] ss:$8 sps:$4 sm:$0xff]   ;;  %v6497_v11 = vld [vmem:[%s8694_s7 + $0x5b0] ss:$8 sps:$4 sm:$0xff]  }
 0x4df   : > { %4833 = vmatpush1.bf16.msra.mxu0 %v6599_v10  ;;  %v6662_v10 = vld [vmem:[%s8694_s7 + $0x194] ss:$8 sps:$4 sm:$0xff]   ;;  %v6666_v16 = vld [vmem:[%s8694_s7 + $0x1a0] ss:$8 sps:$4 sm:$0xff]  }
 0x4e0   : > { %4843 = vmatprep.subr.bf16.mxu0 %v6607_v60  ;;  %v6514_v60 = vld [vmem:[%s8694_s7 + $0x5f4] ss:$8 sps:$4 sm:$0xff]  }
 0x4e1   : > { %4971 = vmatpush1.bf16.msra.mxu1 %v6421_v15  ;;  %v2819_v15 = vrot.slane %v2817_v7, 7  ;;  %v6499_v7 = vld [vmem:[%s8694_s7 + $0x5b4] ss:$8 sps:$4 sm:$0xff]  }
 0x4e2   : > { %4972 = vmatprep.subr.bf16.mxu1 %v6426_v17  ;;  %v6460_v17 = vld [vmem:[%s8694_s7 + $0x4f0] ss:$8 sps:$4 sm:$0xff]  }
 0x4e5   : > { %4973 = vmatpush1.bf16.msra.mxu1 %v6424_v18  ;;  %v2820_v18 = vor.u32 %v2819_v15, %v2816_v3  ;;  %v6668_v3 = vld [vmem:[%s8694_s7 + $0x1a4] ss:$8 sps:$4 sm:$0xff]   ;;  %v6500_v15 = vld [vmem:[%s8694_s7 + $0x5c0] ss:$8 sps:$4 sm:$0xff]  }
 0x4e6   : > { %4974 = vmatprep.subr.bf16.mxu1 %v6429_v24  ;;  %v6465_v24 = vld [vmem:[%s8694_s7 + $0x504] ss:$8 sps:$4 sm:$0xff]  }
 0x4e9   : > { %4975 = vmatpush1.bf16.msra.mxu1 %v6427_v25  ;;  %v2821_v25 = vrot.slane %v2820_v18, 2  ;;  %v6503_v18 = vld [vmem:[%s8694_s7 + $0x5d0] ss:$8 sps:$4 sm:$0xff]  }
 0x4ea   : > { %4976 = vmatprep.subr.bf16.mxu1 %v6432_v29  ;;  %v6463_v29 = vld [vmem:[%s8694_s7 + $0x500] ss:$8 sps:$4 sm:$0xff]  }
 0x4eb   : > { %v2826_v28 = vsel %vm7801_vm11, %v2821_v25, %v2825_v23  ;;  %v6672_v23 = vld [vmem:[%s8694_s7 + $0x1b0] ss:$8 sps:$4 sm:$0xff]   ;;  %v6506_v25 = vld [vmem:[%s8694_s7 + $0x5e0] ss:$8 sps:$4 sm:$0xff]  }
 0x4ec   : > { %2828 = vst [vmem:[#allocation7 + $0x4] sm:$0xf] %v2826_v28  ;;  %v6678_v28 = vld [vmem:[%s8694_s7 + $0x1c0] ss:$8 sps:$4 sm:$0xff]  }
 0x4ed   : > { %4977 = vmatpush1.bf16.msra.mxu1 %v6430_v30  ;;  %v6469_v30 = vld [vmem:[%s8694_s7 + $0x514] ss:$8 sps:$4 sm:$0xff]  }
 0x4ee   : > { %4978 = vmatprep.subr.bf16.mxu1 %v6435_v31 }
 0x4f1   : > { %4979 = vmatpush1.bf16.msra.mxu1 %v6433_v8  ;;  %v6470_v8 = vld [vmem:[%s8694_s7 + $0x520] ss:$8 sps:$4 sm:$0xff]  }
 0x4f2   : > { %4980 = vmatprep.subr.bf16.mxu1 %v6438_v36  ;;  %v6605_v36 = vld [vmem:[%s8694_s7 + $0x100] ss:$8 sps:$4 sm:$0xff]  }
 0x4f3   : > { %v8141_v31 = vld [vmem:[#allocation7] sm:$0xff] }
 0x4f5   : > { %4981 = vmatpush1.bf16.msra.mxu1 %v6436_v37  ;;  %v6613_v37 = vld [vmem:[%s8694_s7 + $0x114] ss:$8 sps:$4 sm:$0xff]  }
 0x4f6   : > { %4982 = vmatprep.subr.bf16.mxu1 %v6441_v41  ;;  %v6611_v41 = vld [vmem:[%s8694_s7 + $0x110] ss:$8 sps:$4 sm:$0xff]  }
 0x4f9   : > { %4983 = vmatpush1.bf16.msra.mxu1 %v6439_v42  ;;  %v6620_v42 = vld [vmem:[%s8694_s7 + $0x124] ss:$8 sps:$4 sm:$0xff]  }
 0x4fa   : > { %4984 = vmatprep.subr.bf16.mxu1 %v6444_v46  ;;  %v6618_v46 = vld [vmem:[%s8694_s7 + $0x120] ss:$8 sps:$4 sm:$0xff]  }
 0x4fd   : > { %4985 = vmatpush1.bf16.msra.mxu1 %v6442_v47  ;;  %v6626_v47 = vld [vmem:[%s8694_s7 + $0x134] ss:$8 sps:$4 sm:$0xff]  }
 0x4fe   : > { %4986 = vmatprep.subr.bf16.mxu1 %v6447_v50  ;;  %v6624_v50 = vld [vmem:[%s8694_s7 + $0x130] ss:$8 sps:$4 sm:$0xff]  }
 0x501   : > { %4987 = vmatpush1.bf16.msra.mxu1 %v6445_v32  ;;  %v6632_v32 = vld [vmem:[%s8694_s7 + $0x144] ss:$8 sps:$4 sm:$0xff]  }
 0x502   : > { %4988 = vmatprep.subr.bf16.mxu1 %v6450_v39  ;;  %v6630_v39 = vld [vmem:[%s8694_s7 + $0x140] ss:$8 sps:$4 sm:$0xff]  }
 0x505   : > { %4989 = vmatpush1.bf16.msra.mxu1 %v6448_v52  ;;  %v6638_v52 = vld [vmem:[%s8694_s7 + $0x154] ss:$8 sps:$4 sm:$0xff]  }
 0x506   : > { %4990 = vmatprep.subr.bf16.mxu1 %v6453_v43  ;;  %v6636_v43 = vld [vmem:[%s8694_s7 + $0x150] ss:$8 sps:$4 sm:$0xff]  }
 0x509   : > { %4991 = vmatpush1.bf16.msra.mxu1 %v6451_v56  ;;  %v6644_v56 = vld [vmem:[%s8694_s7 + $0x164] ss:$8 sps:$4 sm:$0xff]  }
 0x50a   : > { %4992 = vmatprep.subr.bf16.mxu1 %v6456_v59  ;;  %v6642_v59 = vld [vmem:[%s8694_s7 + $0x160] ss:$8 sps:$4 sm:$0xff]  }
 0x50d   : > { %4993 = vmatpush1.bf16.msra.mxu1 %v6454_v61  ;;  %v6650_v61 = vld [vmem:[%s8694_s7 + $0x174] ss:$8 sps:$4 sm:$0xff]  }
 0x50e   : > { %4994 = vmatprep.subr.bf16.mxu1 %v6459_v2  ;;  %v6648_v2 = vld [vmem:[%s8694_s7 + $0x170] ss:$8 sps:$4 sm:$0xff]  }
 0x511   : > { %4995 = vmatpush1.bf16.msra.mxu1 %v6457_v9  ;;  %v6654_v9 = vld [vmem:[%s8694_s7 + $0x180] ss:$8 sps:$4 sm:$0xff]  }
 0x512   : > { %4996 = vmatprep.subr.bf16.mxu1 %v6462_v13  ;;  %v6660_v13 = vld [vmem:[%s8694_s7 + $0x190] ss:$8 sps:$4 sm:$0xff]  }
 0x515   : > { %4997 = vmatpush1.bf16.msra.mxu1 %v6460_v17  ;;  %v6674_v17 = vld [vmem:[%s8694_s7 + $0x1b4] ss:$8 sps:$4 sm:$0xff]  }
 0x516   : > { %5007 = vmatprep.subr.bf16.mxu1 %v6465_v24  ;;  %v6680_v24 = vld [vmem:[%s8694_s7 + $0x1c4] ss:$8 sps:$4 sm:$0xff]  }
 0x518   : > { %4999 = vmatmul.mubr.bf16.vlgmr.msra.gmra.mrb[4].mxu1 %v7925_v4  ;;  %v3275_v4 = vrot.slane %v8141_v31, %v7799_v0 }
 0x519   : > { %5008 = vmatpush1.bf16.msra.mxu1 %v6463_v29  ;;  %5039 = vmatprep.mubr.bf16.mxu1 %v3318_v53  ;;  %v8298_v29 = vld [vmem:[#allocation7 + $0x18] sm:$0xff] }
 0x51a   : > { %5009 = vmatprep.subr.bf16.mxu1 %v6469_v30  ;;  %v3283_v34 = vcombine.high %v3275_v4, %v3275_v4  ;;  %v6686_v30 = vld [vmem:[%s8694_s7 + $0x1d4] ss:$8 sps:$4 sm:$0xff]   ;;  %v6512_v53 = vld [vmem:[%s8694_s7 + $0x5f0] ss:$8 sps:$4 sm:$0xff]  }
 0x51c   : > { %4834 = vmatprep.mubr.bf16.mxu0 %v3283_v34  ;;  %v6518_v34 = vld [vmem:[%s8694_s7 + $0x600] ss:$8 sps:$4 sm:$0xff]  }
 0x51d   : > { %5010 = vmatpush1.bf16.msra.mxu1 %v6467_v1  ;;  %4835 = vmatmul.mubr.bf16.vlgmr.msra.gmra.mrb[20].mxu0 %v3275_v4  ;;  %v3268_v1 = vcombine.high %v8141_v31, %v8141_v31  ;;  %v6684_v4 = vld [vmem:[%s8694_s7 + $0x1d0] ss:$8 sps:$4 sm:$0xff]   ;;  %v6692_v31 = vld [vmem:[%s8694_s7 + $0x1e4] ss:$8 sps:$4 sm:$0xff]  }
 0x51e   : > { %5011 = vmatprep.subr.bf16.mxu1 %v6472_v27  ;;  %4844 = vmatpush1.bf16.msra.mxu0 %v6605_v36  ;;  %v6520_v27 = vld [vmem:[%s8694_s7 + $0x604] ss:$8 sps:$4 sm:$0xff]  }
 0x51f   : > { %4845 = vmatprep.subr.bf16.mxu0 %v6613_v37  ;;  %v6526_v37 = vld [vmem:[%s8694_s7 + $0x614] ss:$8 sps:$4 sm:$0xff]  }
 0x521   : > { %5012 = vmatpush1.bf16.msra.mxu1 %v6470_v8  ;;  %v8313_v8 = vrot.slane %v8298_v29, %v7799_v0 }
 0x522   : > { %5013 = vmatprep.subr.bf16.mxu1 %v6475_v33  ;;  %4846 = vmatpush1.bf16.msra.mxu0 %v6611_v41  ;;  %v3282_v33 = vrot.slane %v3268_v1, %v7799_v0  ;;  %v6698_v41 = vld [vmem:[%s8694_s7 + $0x1f4] ss:$8 sps:$4 sm:$0xff]   ;;  %v6665_v1 = vld [vmem:[%s8694_s7 + $0x784] ss:$8 sps:$4 sm:$0xff]  }
 0x523   : > { %4847 = vmatprep.subr.bf16.mxu0 %v6620_v42  ;;  %v6524_v42 = vld [vmem:[%s8694_s7 + $0x610] ss:$8 sps:$4 sm:$0xff]  }
 0x524   : > { %v3284_v36 = vcombine.high %v3282_v33, %v3282_v33 }
 0x525   : > { %5014 = vmatpush1.bf16.msra.mxu1 %v6473_v38  ;;  %v3334_v38 = vcombine.high %v8313_v8, %v8313_v8 }
 0x526   : > { %5015 = vmatprep.subr.bf16.mxu1 %v6478_v40  ;;  %4848 = vmatpush1.bf16.msra.mxu0 %v6618_v46  ;;  %v6690_v40 = vld [vmem:[%s8694_s7 + $0x1e0] ss:$8 sps:$4 sm:$0xff]   ;;  %v6538_v46 = vld [vmem:[%s8694_s7 + $0x634] ss:$8 sps:$4 sm:$0xff]  }
 0x527   : > { %4849 = vmatprep.subr.bf16.mxu0 %v6626_v47  ;;  %4875 = vmatprep.mubr.bf16.mxu0 %v3284_v36  ;;  %v6536_v47 = vld [vmem:[%s8694_s7 + $0x630] ss:$8 sps:$4 sm:$0xff]  }
 0x528   : > { %v6681_v36 = vld [vmem:[%s8694_s7 + $0x7b0] ss:$8 sps:$4 sm:$0xff]  }
 0x529   : > { %5016 = vmatpush1.bf16.msra.mxu1 %v6476_v44  ;;  %v6532_v44 = vld [vmem:[%s8694_s7 + $0x624] ss:$8 sps:$4 sm:$0xff]  }
 0x52a   : > { %5017 = vmatprep.subr.bf16.mxu1 %v6481_v45  ;;  %4850 = vmatpush1.bf16.msra.mxu0 %v6624_v50  ;;  %v6530_v45 = vld [vmem:[%s8694_s7 + $0x620] ss:$8 sps:$4 sm:$0xff]   ;;  %v6550_v50 = vld [vmem:[%s8694_s7 + $0x654] ss:$8 sps:$4 sm:$0xff]  }
 0x52b   : > { %4851 = vmatprep.subr.bf16.mxu0 %v6632_v32  ;;  %v6548_v32 = vld [vmem:[%s8694_s7 + $0x650] ss:$8 sps:$4 sm:$0xff]  }
 0x52d   : > { %5018 = vmatpush1.bf16.msra.mxu1 %v6479_v48  ;;  %v6544_v48 = vld [vmem:[%s8694_s7 + $0x644] ss:$8 sps:$4 sm:$0xff]  }
 0x52e   : > { %5019 = vmatprep.subr.bf16.mxu1 %v6484_v49  ;;  %4852 = vmatpush1.bf16.msra.mxu0 %v6630_v39  ;;  %v6542_v49 = vld [vmem:[%s8694_s7 + $0x640] ss:$8 sps:$4 sm:$0xff]   ;;  %v6562_v39 = vld [vmem:[%s8694_s7 + $0x674] ss:$8 sps:$4 sm:$0xff]  }
 0x52f   : > { %4853 = vmatprep.subr.bf16.mxu0 %v6638_v52  ;;  %v6560_v52 = vld [vmem:[%s8694_s7 + $0x670] ss:$8 sps:$4 sm:$0xff]  }
 0x531   : > { %5020 = vmatpush1.bf16.msra.mxu1 %v6482_v51  ;;  %v6556_v51 = vld [vmem:[%s8694_s7 + $0x664] ss:$8 sps:$4 sm:$0xff]  }
 0x532   : > { %5021 = vmatprep.subr.bf16.mxu1 %v6487_v35  ;;  %4854 = vmatpush1.bf16.msra.mxu0 %v6636_v43  ;;  %v6554_v35 = vld [vmem:[%s8694_s7 + $0x660] ss:$8 sps:$4 sm:$0xff]   ;;  %v6574_v43 = vld [vmem:[%s8694_s7 + $0x694] ss:$8 sps:$4 sm:$0xff]  }
 0x533   : > { %4855 = vmatprep.subr.bf16.mxu0 %v6644_v56  ;;  %v6572_v56 = vld [vmem:[%s8694_s7 + $0x690] ss:$8 sps:$4 sm:$0xff]  }
 0x535   : > { %5022 = vmatpush1.bf16.msra.mxu1 %v6485_v54  ;;  %v6568_v54 = vld [vmem:[%s8694_s7 + $0x684] ss:$8 sps:$4 sm:$0xff]  }
 0x536   : > { %5023 = vmatprep.subr.bf16.mxu1 %v6490_v55  ;;  %4856 = vmatpush1.bf16.msra.mxu0 %v6642_v59  ;;  %v6566_v55 = vld [vmem:[%s8694_s7 + $0x680] ss:$8 sps:$4 sm:$0xff]   ;;  %v6586_v59 = vld [vmem:[%s8694_s7 + $0x6b4] ss:$8 sps:$4 sm:$0xff]  }
 0x537   : > { %4857 = vmatprep.subr.bf16.mxu0 %v6650_v61  ;;  %v6584_v61 = vld [vmem:[%s8694_s7 + $0x6b0] ss:$8 sps:$4 sm:$0xff]  }
 0x539   : > { %5024 = vmatpush1.bf16.msra.mxu1 %v6488_v57  ;;  %v6580_v57 = vld [vmem:[%s8694_s7 + $0x6a4] ss:$8 sps:$4 sm:$0xff]  }
 0x53a   : > { %5025 = vmatprep.subr.bf16.mxu1 %v6493_v58  ;;  %4858 = vmatpush1.bf16.msra.mxu0 %v6648_v2  ;;  %v6578_v58 = vld [vmem:[%s8694_s7 + $0x6a0] ss:$8 sps:$4 sm:$0xff]   ;;  %v6598_v2 = vld [vmem:[%s8694_s7 + $0x6d4] ss:$8 sps:$4 sm:$0xff]  }
 0x53b   : > { %4859 = vmatprep.subr.bf16.mxu0 %v6656_v5  ;;  %v6596_v5 = vld [vmem:[%s8694_s7 + $0x6d0] ss:$8 sps:$4 sm:$0xff]  }
 0x53d   : > { %5026 = vmatpush1.bf16.msra.mxu1 %v6491_v63  ;;  %v6592_v63 = vld [vmem:[%s8694_s7 + $0x6c4] ss:$8 sps:$4 sm:$0xff]  }
 0x53e   : > { %5027 = vmatprep.subr.bf16.mxu1 %v6496_v62  ;;  %4860 = vmatpush1.bf16.msra.mxu0 %v6654_v9  ;;  %v6590_v62 = vld [vmem:[%s8694_s7 + $0x6c0] ss:$8 sps:$4 sm:$0xff]   ;;  %v6610_v9 = vld [vmem:[%s8694_s7 + $0x6f4] ss:$8 sps:$4 sm:$0xff]  }
 0x53f   : > { %4861 = vmatprep.subr.bf16.mxu0 %v6662_v10  ;;  %v3319_v10 = vcombine.high %v8298_v29, %v8298_v29  ;;  %v6651_v29 = vld [vmem:[%s8694_s7 + $0x760] ss:$8 sps:$4 sm:$0xff]  }
 0x541   : > { %5028 = vmatpush1.bf16.msra.mxu1 %v6494_v6  ;;  %v6604_v6 = vld [vmem:[%s8694_s7 + $0x6e4] ss:$8 sps:$4 sm:$0xff]  }
 0x542   : > { %5029 = vmatprep.subr.bf16.mxu1 %v6499_v7  ;;  %4862 = vmatpush1.bf16.msra.mxu0 %v6660_v13  ;;  %v6602_v7 = vld [vmem:[%s8694_s7 + $0x6e0] ss:$8 sps:$4 sm:$0xff]   ;;  %v8433_v13 = vrot.slane %v3319_v10, %v7799_v0  ;;  %v6621_v0 = vld [vmem:[%s8694_s7 + $0x710] ss:$8 sps:$4 sm:$0xff]  }
 0x543   : > { %4863 = vmatprep.subr.bf16.mxu0 %v6668_v3  ;;  %v6614_v3 = vld [vmem:[%s8694_s7 + $0x700] ss:$8 sps:$4 sm:$0xff]   ;;  %v6739_v10 = vld [vmem:[%s8694_s7 + $0x8b0] ss:$8 sps:$4 sm:$0xff]  }
 0x545   : > { %5030 = vmatpush1.bf16.msra.mxu1 %v6497_v11  ;;  %v6608_v11 = vld [vmem:[%s8694_s7 + $0x6f0] ss:$8 sps:$4 sm:$0xff]  }
 0x546   : > { %5031 = vmatprep.subr.bf16.mxu1 %v6502_v12  ;;  %4864 = vmatpush1.bf16.msra.mxu0 %v6666_v16  ;;  %v6616_v12 = vld [vmem:[%s8694_s7 + $0x704] ss:$8 sps:$4 sm:$0xff]  }
 0x547   : > { %4865 = vmatprep.subr.bf16.mxu0 %v6674_v17  ;;  %v6629_v16 = vld [vmem:[%s8694_s7 + $0x724] ss:$8 sps:$4 sm:$0xff]   ;;  %v6627_v17 = vld [vmem:[%s8694_s7 + $0x720] ss:$8 sps:$4 sm:$0xff]  }
 0x549   : > { %5032 = vmatpush1.bf16.msra.mxu1 %v6500_v15  ;;  %v6623_v15 = vld [vmem:[%s8694_s7 + $0x714] ss:$8 sps:$4 sm:$0xff]  }
 0x54a   : > { %5033 = vmatprep.subr.bf16.mxu1 %v6505_v14  ;;  %4866 = vmatpush1.bf16.msra.mxu0 %v6672_v23  ;;  %v3335_v14 = vcombine.high %v8433_v13, %v8433_v13  ;;  %v6641_v23 = vld [vmem:[%s8694_s7 + $0x744] ss:$8 sps:$4 sm:$0xff]  }
 0x54b   : > { %4867 = vmatprep.subr.bf16.mxu0 %v6680_v24  ;;  %v6639_v24 = vld [vmem:[%s8694_s7 + $0x740] ss:$8 sps:$4 sm:$0xff]  }
 0x54d   : > { %5034 = vmatpush1.bf16.msra.mxu1 %v6503_v18  ;;  %v6635_v18 = vld [vmem:[%s8694_s7 + $0x734] ss:$8 sps:$4 sm:$0xff]  }
 0x54e   : > { %5035 = vmatprep.subr.bf16.mxu1 %v6508_v21  ;;  %4868 = vmatpush1.bf16.msra.mxu0 %v6678_v28  ;;  %v6633_v21 = vld [vmem:[%s8694_s7 + $0x730] ss:$8 sps:$4 sm:$0xff]   ;;  %v6653_v28 = vld [vmem:[%s8694_s7 + $0x764] ss:$8 sps:$4 sm:$0xff]  }
 0x54f   : > { %4869 = vmatprep.subr.bf16.mxu0 %v6686_v30  ;;  %v6659_v30 = vld [vmem:[%s8694_s7 + $0x774] ss:$8 sps:$4 sm:$0xff]  }
 0x551   : > { %5036 = vmatpush1.bf16.msra.mxu1 %v6506_v25  ;;  %v6647_v25 = vld [vmem:[%s8694_s7 + $0x754] ss:$8 sps:$4 sm:$0xff]  }
 0x552   : > { %5037 = vmatprep.subr.bf16.mxu1 %v6514_v60  ;;  %4870 = vmatpush1.bf16.msra.mxu0 %v6684_v4  ;;  %v6645_v60 = vld [vmem:[%s8694_s7 + $0x750] ss:$8 sps:$4 sm:$0xff]  }
 0x553   : > { %4871 = vmatprep.subr.bf16.mxu0 %v6692_v31  ;;  %v6669_v4 = vld [vmem:[%s8694_s7 + $0x790] ss:$8 sps:$4 sm:$0xff]   ;;  %v6675_v31 = vld [vmem:[%s8694_s7 + $0x7a0] ss:$8 sps:$4 sm:$0xff]  }
 0x555   : > { %5038 = vmatpush1.bf16.msra.mxu1 %v6512_v53  ;;  %v6657_v53 = vld [vmem:[%s8694_s7 + $0x770] ss:$8 sps:$4 sm:$0xff]  }
 0x556   : > { %5048 = vmatprep.subr.bf16.mxu1 %v6520_v27  ;;  %4872 = vmatpush1.bf16.msra.mxu0 %v6690_v40  ;;  %v6663_v27 = vld [vmem:[%s8694_s7 + $0x780] ss:$8 sps:$4 sm:$0xff]   ;;  %v6695_v40 = vld [vmem:[%s8694_s7 + $0x7d4] ss:$8 sps:$4 sm:$0xff]  }
 0x557   : > { %4873 = vmatprep.subr.bf16.mxu0 %v6698_v41  ;;  %v6693_v41 = vld [vmem:[%s8694_s7 + $0x7d0] ss:$8 sps:$4 sm:$0xff]  }
 0x558   : > { %5040 = vmatmul.mubr.bf16.vlgmr.msra.gmra.mrb[4].mxu1 %v8122_v26  ;;  %v6696_v26 = vld [vmem:[%s8694_s7 + $0x1f0] ss:$8 sps:$4 sm:$0xff]  }
 0x559   : > { %5049 = vmatpush1.bf16.msra.mxu1 %v6518_v34  ;;  %5080 = vmatprep.mubr.bf16.mxu1 %v3334_v38  ;;  %v6683_v34 = vld [vmem:[%s8694_s7 + $0x7b4] ss:$8 sps:$4 sm:$0xff]   ;;  %v6687_v38 = vld [vmem:[%s8694_s7 + $0x7c0] ss:$8 sps:$4 sm:$0xff]  }
 0x55a   : > { %5050 = vmatprep.subr.bf16.mxu1 %v6526_v37  ;;  %4874 = vmatpush1.bf16.msra.mxu0 %v6696_v26  ;;  %v6689_v37 = vld [vmem:[%s8694_s7 + $0x7c4] ss:$8 sps:$4 sm:$0xff]   ;;  %v6705_v26 = vld [vmem:[%s8694_s7 + $0x7f4] ss:$8 sps:$4 sm:$0xff]  }
 0x55d   : > { %5051 = vmatpush1.bf16.msra.mxu1 %v6524_v42  ;;  %4876 = vmatmul.mubr.bf16.vlgmr.msra.gmra.mrb[20].mxu0 %v3282_v33  ;;  %v6677_v33 = vld [vmem:[%s8694_s7 + $0x7a4] ss:$8 sps:$4 sm:$0xff]  }
 0x55e   : > { %5052 = vmatprep.subr.bf16.mxu1 %v6532_v44  ;;  %v6701_v42 = vld [vmem:[%s8694_s7 + $0x7e4] ss:$8 sps:$4 sm:$0xff]   ;;  %v6699_v44 = vld [vmem:[%s8694_s7 + $0x7e0] ss:$8 sps:$4 sm:$0xff]  }
 0x561   : > { %5053 = vmatpush1.bf16.msra.mxu1 %v6530_v45  ;;  %v6703_v45 = vld [vmem:[%s8694_s7 + $0x7f0] ss:$8 sps:$4 sm:$0xff]  }
 0x562   : > { %5054 = vmatprep.subr.bf16.mxu1 %v6538_v46  ;;  %v6708_v46 = vld [vmem:[%s8694_s7 + $0x804] ss:$8 sps:$4 sm:$0xff]  }
 0x565   : > { %5055 = vmatpush1.bf16.msra.mxu1 %v6536_v47  ;;  %v8534_v47 = vld.sshfl [vmem:[#allocation7 + $0x20] sm:$0x33 pattern:$0x76325410] }
 0x566   : > { %5056 = vmatprep.subr.bf16.mxu1 %v6544_v48  ;;  %v6706_v48 = vld [vmem:[%s8694_s7 + $0x800] ss:$8 sps:$4 sm:$0xff]  }
 0x569   : > { %5057 = vmatpush1.bf16.msra.mxu1 %v6542_v49  ;;  %v6711_v49 = vld [vmem:[%s8694_s7 + $0x814] ss:$8 sps:$4 sm:$0xff]  }
 0x56a   : > { %5058 = vmatprep.subr.bf16.mxu1 %v6550_v50  ;;  %v3343_v50 = vcombine.high %v8534_v47, %v8534_v47 }
 0x56d   : > { %5059 = vmatpush1.bf16.msra.mxu1 %v6548_v32  ;;  %v6709_v32 = vld [vmem:[%s8694_s7 + $0x810] ss:$8 sps:$4 sm:$0xff]  }
 0x56e   : > { %5060 = vmatprep.subr.bf16.mxu1 %v6556_v51  ;;  %v6714_v51 = vld [vmem:[%s8694_s7 + $0x824] ss:$8 sps:$4 sm:$0xff]  }
 0x571   : > { %5061 = vmatpush1.bf16.msra.mxu1 %v6554_v35  ;;  %v6712_v35 = vld [vmem:[%s8694_s7 + $0x820] ss:$8 sps:$4 sm:$0xff]  }
 0x572   : > { %5062 = vmatprep.subr.bf16.mxu1 %v6562_v39  ;;  %v6717_v39 = vld [vmem:[%s8694_s7 + $0x834] ss:$8 sps:$4 sm:$0xff]  }
 0x575   : > { %5063 = vmatpush1.bf16.msra.mxu1 %v6560_v52  ;;  %v6715_v52 = vld [vmem:[%s8694_s7 + $0x830] ss:$8 sps:$4 sm:$0xff]  }
 0x576   : > { %5064 = vmatprep.subr.bf16.mxu1 %v6568_v54  ;;  %v6720_v54 = vld [vmem:[%s8694_s7 + $0x844] ss:$8 sps:$4 sm:$0xff]  }
 0x579   : > { %5065 = vmatpush1.bf16.msra.mxu1 %v6566_v55  ;;  %v6718_v55 = vld [vmem:[%s8694_s7 + $0x840] ss:$8 sps:$4 sm:$0xff]  }
 0x57a   : > { %5066 = vmatprep.subr.bf16.mxu1 %v6574_v43  ;;  %v6723_v43 = vld [vmem:[%s8694_s7 + $0x854] ss:$8 sps:$4 sm:$0xff]  }
 0x57d   : > { %5067 = vmatpush1.bf16.msra.mxu1 %v6572_v56  ;;  %v6721_v56 = vld [vmem:[%s8694_s7 + $0x850] ss:$8 sps:$4 sm:$0xff]  }
 0x57e   : > { %5068 = vmatprep.subr.bf16.mxu1 %v6580_v57  ;;  %v6726_v57 = vld [vmem:[%s8694_s7 + $0x864] ss:$8 sps:$4 sm:$0xff]  }
 0x581   : > { %5069 = vmatpush1.bf16.msra.mxu1 %v6578_v58  ;;  %v6724_v58 = vld [vmem:[%s8694_s7 + $0x860] ss:$8 sps:$4 sm:$0xff]  }
 0x582   : > { %5070 = vmatprep.subr.bf16.mxu1 %v6586_v59  ;;  %v6729_v59 = vld [vmem:[%s8694_s7 + $0x874] ss:$8 sps:$4 sm:$0xff]  }
 0x585   : > { %5071 = vmatpush1.bf16.msra.mxu1 %v6584_v61  ;;  %v6727_v61 = vld [vmem:[%s8694_s7 + $0x870] ss:$8 sps:$4 sm:$0xff]  }
 0x586   : > { %5072 = vmatprep.subr.bf16.mxu1 %v6592_v63  ;;  %v6732_v63 = vld [vmem:[%s8694_s7 + $0x884] ss:$8 sps:$4 sm:$0xff]  }
 0x589   : > { %5073 = vmatpush1.bf16.msra.mxu1 %v6590_v62  ;;  %v6730_v62 = vld [vmem:[%s8694_s7 + $0x880] ss:$8 sps:$4 sm:$0xff]  }
 0x58a   : > { %5074 = vmatprep.subr.bf16.mxu1 %v6598_v2  ;;  %v6735_v2 = vld [vmem:[%s8694_s7 + $0x894] ss:$8 sps:$4 sm:$0xff]  }
 0x58d   : > { %5075 = vmatpush1.bf16.msra.mxu1 %v6596_v5  ;;  %v6733_v5 = vld [vmem:[%s8694_s7 + $0x890] ss:$8 sps:$4 sm:$0xff]  }
 0x58e   : > { %5076 = vmatprep.subr.bf16.mxu1 %v6604_v6  ;;  %v6738_v6 = vld [vmem:[%s8694_s7 + $0x8a4] ss:$8 sps:$4 sm:$0xff]  }
 0x591   : > { %5077 = vmatpush1.bf16.msra.mxu1 %v6602_v7  ;;  %v6736_v7 = vld [vmem:[%s8694_s7 + $0x8a0] ss:$8 sps:$4 sm:$0xff]  }
 0x592   : > { %5078 = vmatprep.subr.bf16.mxu1 %v6610_v9  ;;  %v6741_v9 = vld [vmem:[%s8694_s7 + $0x8b4] ss:$8 sps:$4 sm:$0xff]  }
 0x595   : > { %5079 = vmatpush1.bf16.msra.mxu1 %v6608_v11  ;;  %v6744_v11 = vld [vmem:[%s8694_s7 + $0x8c4] ss:$8 sps:$4 sm:$0xff]  }
 0x596   : > { %5089 = vmatprep.subr.bf16.mxu1 %v6616_v12  ;;  %v6742_v12 = vld [vmem:[%s8694_s7 + $0x8c0] ss:$8 sps:$4 sm:$0xff]  }
 0x598   : > { %5081 = vmatmul.mubr.bf16.vlgmr.msra.gmra.mrb[4].mxu1 %v8313_v8  ;;  %v6671_v8 = vld [vmem:[%s8694_s7 + $0x794] ss:$8 sps:$4 sm:$0xff]  }
 0x599   : > { %5090 = vmatpush1.bf16.msra.mxu1 %v6614_v3  ;;  %5121 = vmatprep.mubr.bf16.mxu1 %v3335_v14  ;;  %v6745_v3 = vld [vmem:[%s8694_s7 + $0x8d0] ss:$8 sps:$4 sm:$0xff]   ;;  %v6748_v14 = vld [vmem:[%s8694_s7 + $0x8e0] ss:$8 sps:$4 sm:$0xff]  }
 0x59a   : > { %5091 = vmatprep.subr.bf16.mxu1 %v6623_v15  ;;  %v6750_v15 = vld [vmem:[%s8694_s7 + $0x8e4] ss:$8 sps:$4 sm:$0xff]  }
 0x59d   : > { %5092 = vmatpush1.bf16.msra.mxu1 %v6621_v0  ;;  %v6753_v0 = vld [vmem:[%s8694_s7 + $0x8f4] ss:$8 sps:$4 sm:$0xff]  }
 0x59e   : > { %5093 = vmatprep.subr.bf16.mxu1 %v6629_v16  ;;  %v6751_v16 = vld [vmem:[%s8694_s7 + $0x8f0] ss:$8 sps:$4 sm:$0xff]  }
 0x5a1   : > { %5094 = vmatpush1.bf16.msra.mxu1 %v6627_v17 }
 0x5a2   : > { %5095 = vmatprep.subr.bf16.mxu1 %v6635_v18 }
 0x5a5   : > { %5096 = vmatpush1.bf16.msra.mxu1 %v6633_v21 }
 0x5a6   : > { %5097 = vmatprep.subr.bf16.mxu1 %v6641_v23 }
 0x5a9   : > { %5098 = vmatpush1.bf16.msra.mxu1 %v6639_v24  ;;  %v3251_v24 = vld [vmem:[%s8695_s8] sm:$0x3] }
 0x5aa   : > { %5099 = vmatprep.subr.bf16.mxu1 %v6647_v25  ;;  %v3256_v25 = vrot.slane %v3251_v24, %v1786_v20 }
 0x5ad   : > { %5100 = vmatpush1.bf16.msra.mxu1 %v6645_v60  ;;  %v3260_v60 = vrot.slane %v3251_v24, %v1790_v22 }
 0x5ae   : > { %5101 = vmatprep.subr.bf16.mxu1 %v6653_v28 }
 0x5b1   : > { %5102 = vmatpush1.bf16.msra.mxu1 %v6651_v29 }
 0x5b2   : > { %5103 = vmatprep.subr.bf16.mxu1 %v6659_v30 }
 0x5b5   : > { %5104 = vmatpush1.bf16.msra.mxu1 %v6657_v53 }
 0x5b6   : > { %5105 = vmatprep.subr.bf16.mxu1 %v6665_v1 }
 0x5b9   : > { %5106 = vmatpush1.bf16.msra.mxu1 %v6663_v27 }
 0x5ba   : > { %5107 = vmatprep.subr.bf16.mxu1 %v6671_v8 }
 0x5bd   : > { %5108 = vmatpush1.bf16.msra.mxu1 %v6669_v4 }
 0x5be   : > { %5109 = vmatprep.subr.bf16.mxu1 %v6677_v33 }
 0x5c1   : > { %5110 = vmatpush1.bf16.msra.mxu1 %v6675_v31 }
 0x5c2   : > { %5111 = vmatprep.subr.bf16.mxu1 %v6683_v34 }
 0x5c5   : > { %5112 = vmatpush1.bf16.msra.mxu1 %v6681_v36 }
 0x5c6   : > { %5113 = vmatprep.subr.bf16.mxu1 %v6689_v37 }
 0x5c9   : > { %5114 = vmatpush1.bf16.msra.mxu1 %v6687_v38 }
 0x5ca   : > { %5115 = vmatprep.subr.bf16.mxu1 %v6695_v40 }
 0x5cd   : > { %5116 = vmatpush1.bf16.msra.mxu1 %v6693_v41 }
 0x5ce   : > { %5117 = vmatprep.subr.bf16.mxu1 %v6701_v42 }
 0x5d1   : > { %5118 = vmatpush1.bf16.msra.mxu1 %v6699_v44 }
 0x5d2   : > { %5119 = vmatprep.subr.bf16.mxu1 %v6705_v26 }
 0x5d5   : > { %5120 = vmatpush1.bf16.msra.mxu1 %v6703_v45 }
 0x5d6   : > { %5130 = vmatprep.subr.bf16.mxu1 %v6708_v46 }
 0x5d8   : > { %5122 = vmatmul.mubr.bf16.vlgmr.msra.gmra.mrb[4].mxu1 %v8433_v13  ;;  %v6747_v13 = vld [vmem:[%s8694_s7 + $0x8d4] ss:$8 sps:$4 sm:$0xff]  }
 0x5d9   : > { %5131 = vmatpush1.bf16.msra.mxu1 %v6706_v48  ;;  %5162 = vmatprep.mubr.bf16.mxu1 %v3343_v50 }
 0x5da   : > { %5132 = vmatprep.subr.bf16.mxu1 %v6711_v49 }
 0x5dd   : > { %5133 = vmatpush1.bf16.msra.mxu1 %v6709_v32 }
 0x5de   : > { %5134 = vmatprep.subr.bf16.mxu1 %v6714_v51 }
 0x5e1   : > { %5135 = vmatpush1.bf16.msra.mxu1 %v6712_v35 }
 0x5e2   : > { %5136 = vmatprep.subr.bf16.mxu1 %v6717_v39 }
 0x5e5   : > { %5137 = vmatpush1.bf16.msra.mxu1 %v6715_v52 }
 0x5e6   : > { %5138 = vmatprep.subr.bf16.mxu1 %v6720_v54 }
 0x5e9   : > { %5139 = vmatpush1.bf16.msra.mxu1 %v6718_v55 }
 0x5ea   : > { %5140 = vmatprep.subr.bf16.mxu1 %v6723_v43 }
 0x5ed   : > { %5141 = vmatpush1.bf16.msra.mxu1 %v6721_v56 }
 0x5ee   : > { %5142 = vmatprep.subr.bf16.mxu1 %v6726_v57 }
 0x5f1   : > { %5143 = vmatpush1.bf16.msra.mxu1 %v6724_v58 }
 0x5f2   : > { %5144 = vmatprep.subr.bf16.mxu1 %v6729_v59 }
 0x5f5   : > { %5145 = vmatpush1.bf16.msra.mxu1 %v6727_v61 }
 0x5f6   : > { %5146 = vmatprep.subr.bf16.mxu1 %v6732_v63 }
 0x5f9   : > { %5147 = vmatpush1.bf16.msra.mxu1 %v6730_v62 }
 0x5fa   : > { %5148 = vmatprep.subr.bf16.mxu1 %v6735_v2 }
 0x5fd   : > { %5149 = vmatpush1.bf16.msra.mxu1 %v6733_v5 }
 0x5fe   : > { %5150 = vmatprep.subr.bf16.mxu1 %v6738_v6 }
 0x601   : > { %5151 = vmatpush1.bf16.msra.mxu1 %v6736_v7 }
 0x602   : > { %5152 = vmatprep.subr.bf16.mxu1 %v6741_v9 }
 0x605   : > { %5153 = vmatpush1.bf16.msra.mxu1 %v6739_v10 }
 0x606   : > { %5154 = vmatprep.subr.bf16.mxu1 %v6744_v11 }
 0x609   : > { %5155 = vmatpush1.bf16.msra.mxu1 %v6742_v12 }
 0x60a   : > { %5156 = vmatprep.subr.bf16.mxu1 %v6747_v13 }
 0x60d   : > { %5157 = vmatpush1.bf16.msra.mxu1 %v6745_v3 }
 0x60e   : > { %5158 = vmatprep.subr.bf16.mxu1 %v6750_v15 }
 0x611   : > { %5159 = vmatpush1.bf16.msra.mxu1 %v6748_v14 }
 0x612   : > { %5160 = vmatprep.subr.bf16.mxu1 %v6753_v0 }
 0x615   : > { %5161 = vmatpush1.bf16.msra.mxu1 %v6751_v16 }
 0x618   : > { %5163 = vmatmul.mubr.bf16.vlgmr.msra.gmra.mrb[4].mxu1 %v8534_v47 }
 0x630   : > { %v4877_v17 = vpop.f32.mrb[20].mxu0 }
 0x631   : > { %v4879_v18 = vpop.f32.mrb[21].mxu0  ;;  %v5924_v28 = vadd.f32 %v4877_v17, %v3256_v25 }
 0x632   : > { %v4881_v21 = vpop.f32.mrb[22].mxu0  ;;  %v5926_v29 = vadd.f32 %v4879_v18, %v3260_v60 }
 0x633   : > { %v4882_v23 = vpop.f32.mrb[23].mxu0 }
 0x6eb   : > { %v5164_v30 = vpop.f32.mrb[4].mxu1 }
 0x6ec   : > { %v5925_v53 = vadd.f32 %v5924_v28, %v5164_v30  ;;  %v5166_v1 = vpop.f32.mrb[5].mxu1 }
 0x6ed   : > { %v5927_v27 = vadd.f32 %v5926_v29, %v5166_v1  ;;  %v5168_v8 = vpop.f32.mrb[6].mxu1 }
 0x6ee   : > { %v5171_v4 = vmax.f32 %v5925_v53, 0.0  ;;  %v5169_v33 = vpop.f32.mrb[7].mxu1 }
 0x6ef   : > { %v5172_v31 = vmax.f32 %v5927_v27, 0.0 }
 0x6f1   : > { %v5175_v34 = vcombine.low %v5171_v4, %v5172_v31 }
 0x6f3   : > { %5177 = vst [vmem:[%s325_s27] sm:$0xff] %v5175_v34 }
 0x6f4   : > { %6767 = shalt.err (!%p6764_p3)
}
 0x6f5   : > { %s6768_s17 = scalar_lea.hbm %s8645_s16, 128  ;;  %s6772_s27 = scalar_lea.hbm %s8696_s9, 256 }
 0x6f6   : > { %p6769_p4 = scmp.ne.s32.totalorder %s8645_s16, %s6768_s17  ;;  %p6773_p9 = scmp.lt.u32.totalorder %s8645_s16, %s8696_s9 }
 0x6f7   : > { %p6774_p10 = scmp.lt.u32.totalorder %s6772_s27, %s6768_s17  ;;  %p6776_p12 = scmp.lt.u32.totalorder %s6768_s17, %s8645_s16 }
 0x6f8   : > { %p6770_p7 = pnand %p6769_p4, %p6910_p5 }
 0x6f9   : > { %p6775_p11 = por %p6774_p10, %p6773_p9 }
 0x6fa   : > { %p6771_p8 = pneg %p6770_p7 }
 0x6fb   : > { %p6777_p13 = por %p6776_p12, %p6775_p11 }
 0x6fd   : > { %p6778_p0 = pnand %p6777_p13, %p6771_p8 }
 0x6ff   : > { %6781 = shalt.err (!%p6778_p0)
}
 0x700   : > { %5973 = dma.vmem_to_hbm [thread:$0]  (%p6910_p5), %s8647_s28, 128, %s8645_s16, %s5179_s21  }
 0x701 PF: > { %p5979_p1 = scmp.ge.s32.totalorder %s6816_s12, 2  ;;  %s5205_s22 = sand.u32 1, %s6804_s30  }
 0x702   : > { %s5206_s13 = scalar_lea.sflag [#allocation9], %s5205_s22 }
 0x703   : > { %p5976_p2 = pnand %p5979_p1, %p6914_p6 }
 0x705   : > { %6799 = dma.done.wait (!%p5976_p2), %s5206_s13, 128  }
 0x706   : > { %6801 = vsyncadd (!%p5976_p2), %s5206_s13, 4294967168  ;;  %p19_p3 = scmp.ge.s32.totalorder %s6897_s15, 4   ;;  %s8709_s30 = smov %s6808_s10 }
 0x707   : > { %s8710_s10 = smov %s6812_s11  ;;  %s8711_s11 = smov %s6908_s18 }
 0x708   : > { %s8712_s12 = smov %s6897_s15  ;;  %21 = sbr.rel (!%p19_p3) target bundleno = 3 (0x3), region = 105 }
 0x70f   :  { %5211 = vsyncpa [#allocation9], 1 }
 0x710   :  { %5213 = vsyncpa [#allocation9 + $0x1], 1 }

</bundles_post_ra>
